<compile_context>
chip_gen: v7x
topology: tpu7x:2x2x1
jax: 0.10.0
libtpu: 0.0.40
codegen_flags: <defaults>
</compile_context>

<pallas_src>
import numpy as np
import jax
import jax.numpy as jnp
from jax.experimental import pallas as pl
from jax.experimental.pallas import tpu as pltpu

# ----------------------------- config (small synthetic) -----------------------------
B = 4             # batch
VOCAB = 64        # bert_config.vocab_size
VOCAB_PAD = 128   # lane-dense padded decoder width (zeros beyond VOCAB)
HID = 32          # bert hidden_size (768 in the real model)
NH = 4            # attention heads
DH = HID // NH
NLAYER = 2        # encoder layers
INTER = 64        # intermediate size (4*HID)
MAXPOS = 64       # max_position_embeddings
FRAME_DIM = 48    # args.frame_embedding_size
MAXF = 4          # args.max_frames
TTEXT = 9         # concat text length (incl. CLS)
SEQ = 1 + MAXF + (TTEXT - 1)
NTOK = B * SEQ
LN_EPS = 1e-12
NEG_XBATCH = -1e9   # bias for cross-batch attention entries (block-diagonal attention)

PAD_ID, CLS_ID, SEP_ID, MASK_ID = 0, 1, 2, 3

# ----------------------------- in-kernel math helpers -----------------------------

def _ln(x, g, b, eps=LN_EPS):
    mu = jnp.mean(x, axis=-1, keepdims=True)
    var = jnp.mean(jnp.square(x - mu), axis=-1, keepdims=True)
    return (x - mu) * jax.lax.rsqrt(var + eps) * g + b


def _gelu(x):  # exact (erf) gelu, as in HF BERT
    return 0.5 * x * (1.0 + jax.lax.erf(x * 0.7071067811865476))


def _softmax_rows(s):
    s = s - jnp.max(s, axis=-1, keepdims=True)
    p = jnp.exp(s)
    # EUP approximate reciprocal (off the VALU path); ~1e-3 rel. diff vs exact divide.
    return p * pl.reciprocal(jnp.sum(p, axis=-1, keepdims=True), approx=True)


# ----------------------------- kernel 1: embeddings -----------------------------

def _embed_kernel(tsum_ref, vfeat_ref, vadd_ref, vfc_w_ref, vfc_b_ref,
                  tg_ref, tb_ref, vg_ref, vb_ref, t_out_ref, v_out_ref):
    # text: (word+pos+type) already summed in JAX -> LayerNorm here
    t_out_ref[...] = _ln(tsum_ref[...], tg_ref[...], tb_ref[...])
    # vision_fc: Linear + ReLU, then + (pos+type), then LayerNorm
    v = jnp.dot(vfeat_ref[...], vfc_w_ref[...],
                preferred_element_type=jnp.float32) + vfc_b_ref[...]
    v = jnp.maximum(v, 0.0) + vadd_ref[...]
    v_out_ref[...] = _ln(v, vg_ref[...], vb_ref[...])


def embed_forward(t_sum, v_feat, v_add, vfc_w, vfc_b, t_g, t_b, v_g, v_b):
    nt, h = t_sum.shape
    nv, f = v_feat.shape

    def full(shp):
        return pl.BlockSpec(shp, lambda i: (0,) * len(shp))

    return pl.pallas_call(
        _embed_kernel,
        grid=(1,),
        in_specs=[full((nt, h)), full((nv, f)), full((nv, h)),
                  full((f, h)), full((1, h)),
                  full((1, h)), full((1, h)), full((1, h)), full((1, h))],
        out_specs=[full((nt, h)), full((nv, h))],
        out_shape=[jax.ShapeDtypeStruct((nt, h), jnp.float32),
                   jax.ShapeDtypeStruct((nv, h), jnp.float32)],
        compiler_params=pltpu.CompilerParams(dimension_semantics=("arbitrary",)),
    )(t_sum, v_feat, v_add, vfc_w, vfc_b.reshape(1, h),
      t_g.reshape(1, h), t_b.reshape(1, h), v_g.reshape(1, h), v_b.reshape(1, h))


# ----------------------------- kernel 2: full encoder (all layers, one launch) ----

def _encoder_kernel(x0_ref, bias_ref,
                    qkv_w_ref, qkv_b_ref, ao_w_ref, ao_b_ref, ao_g_ref, ao_bb_ref,
                    i_w_ref, i_b_ref, o_w_ref, o_b_ref, o_g_ref, o_bb_ref,
                    out_ref, x_scr):
    l = pl.program_id(0)

    @pl.when(l == 0)
    def _():
        x_scr[...] = x0_ref[...]

    xf = x_scr[...]                       # (NTOK, HID) activation carried in VMEM
    bias = bias_ref[...]                  # (NTOK, NTOK) block-diag + padding bias

    # fused QKV projection: (NTOK, HID) @ (HID, 3*HID)
    qkv = jnp.dot(xf, qkv_w_ref[0], preferred_element_type=jnp.float32) + qkv_b_ref[0]

    scale = 1.0 / float(np.sqrt(DH))
    ao_w = ao_w_ref[0]
    acc = None
    for h in range(NH):                   # static head loop, all in VMEM
        q = qkv[:, h * DH:(h + 1) * DH]
        k = qkv[:, HID + h * DH:HID + (h + 1) * DH]
        v = qkv[:, 2 * HID + h * DH:2 * HID + (h + 1) * DH]
        s = jax.lax.dot_general(q, k, (((1,), (1,)), ((), ())),
                                preferred_element_type=jnp.float32) * scale + bias
        p = _softmax_rows(s)
        ctx_h = jnp.dot(p, v, preferred_element_type=jnp.float32)          # (NTOK, DH)
        # fold the attention-output projection into the head loop (avoids lane concat)
        part = jnp.dot(ctx_h, ao_w[h * DH:(h + 1) * DH, :],
                       preferred_element_type=jnp.float32)
        acc = part if acc is None else acc + part
    ao = acc + ao_b_ref[0]

    x1 = _ln(ao + xf, ao_g_ref[0], ao_bb_ref[0])                            # residual + LN
    inter = _gelu(jnp.dot(x1, i_w_ref[0], preferred_element_type=jnp.float32) + i_b_ref[0])
    out = jnp.dot(inter, o_w_ref[0], preferred_element_type=jnp.float32) + o_b_ref[0]
    x2 = _ln(out + x1, o_g_ref[0], o_bb_ref[0])

    x_scr[...] = x2

    @pl.when(l == NLAYER - 1)
    def _():
        out_ref[...] = x2


def encoder_forward(x0, attn_bias, stacked):
    n, h = x0.shape

    def rep(shp):
        return pl.BlockSpec(shp, lambda l: (0,) * len(shp))

    def per_layer(shp):  # shp excludes the leading layer dim
        return pl.BlockSpec((1,) + shp, lambda l: (l,) + (0,) * len(shp))

    in_specs = [rep((n, h)), rep((n, n)),
                per_layer((h, 3 * h)), per_layer((1, 3 * h)),
                per_layer((h, h)), per_layer((1, h)), per_layer((1, h)), per_layer((1, h)),
                per_layer((h, INTER)), per_layer((1, INTER)),
                per_layer((INTER, h)), per_layer((1, h)), per_layer((1, h)), per_layer((1, h))]

    return pl.pallas_call(
        _encoder_kernel,
        grid=(NLAYER,),
        in_specs=in_specs,
        out_specs=pl.BlockSpec((n, h), lambda l: (0, 0)),
        out_shape=jax.ShapeDtypeStruct((n, h), jnp.float32),
        scratch_shapes=[pltpu.VMEM((n, h), jnp.float32)],
        compiler_params=pltpu.CompilerParams(dimension_semantics=("arbitrary",)),
    )(x0, attn_bias,
      stacked["qkv_w"], stacked["qkv_b"], stacked["ao_w"], stacked["ao_b"],
      stacked["ao_g"], stacked["ao_bb"], stacked["i_w"], stacked["i_b"],
      stacked["o_w"], stacked["o_b"], stacked["o_g"], stacked["o_bb"])


# ----------------------------- kernel 3: all heads in one launch -----------------

def _heads_kernel(text_ref, vid_ref, cls_ref, vmin_ref,
                  mt_w_ref, mt_b_ref, mg_ref, mb_ref, md_w_ref, md_b_ref,
                  ft_w_ref, ft_b_ref, fg_ref, fb_ref, fd_w_ref,
                  itm_w_ref, itm_b_ref,
                  lm_ref, sim_ref, itm_ref):
    # MLM head (applied only to text rows — equivalent to applying to all rows then slicing)
    t = _gelu(jnp.dot(text_ref[...], mt_w_ref[...],
                      preferred_element_type=jnp.float32) + mt_b_ref[...])
    t = _ln(t, mg_ref[...], mb_ref[...])
    lm_ref[...] = jnp.dot(t, md_w_ref[...],
                          preferred_element_type=jnp.float32) + md_b_ref[...]
    # MFM head + NCE similarity logits: vm_output @ vm_input^T
    tv = _gelu(jnp.dot(vid_ref[...], ft_w_ref[...],
                       preferred_element_type=jnp.float32) + ft_b_ref[...])
    tv = _ln(tv, fg_ref[...], fb_ref[...])
    vm_out = jnp.dot(tv, fd_w_ref[...], preferred_element_type=jnp.float32)
    sim_ref[...] = jax.lax.dot_general(vm_out, vmin_ref[...], (((1,), (1,)), ((), ())),
                                       preferred_element_type=jnp.float32)
    # ITM head
    itm_ref[...] = jnp.dot(cls_ref[...], itm_w_ref[...],
                           preferred_element_type=jnp.float32) + itm_b_ref[...]


def heads_forward(text_h, vid_h, cls_h, vm_in,
                  mt_w, mt_b, mg, mb, md_w, md_b,
                  ft_w, ft_b, fg, fb, fd_w, itm_w, itm_b):
    nt = text_h.shape[0]
    nv = vid_h.shape[0]
    nb = cls_h.shape[0]

    def full(shp):
        return pl.BlockSpec(shp, lambda i: (0,) * len(shp))

    return pl.pallas_call(
        _heads_kernel,
        grid=(1,),
        in_specs=[full((nt, HID)), full((nv, HID)), full((nb, HID)), full((nv, FRAME_DIM)),
                  full((HID, HID)), full((1, HID)), full((1, HID)), full((1, HID)),
                  full((HID, VOCAB_PAD)), full((1, VOCAB_PAD)),
                  full((HID, HID)), full((1, HID)), full((1, HID)), full((1, HID)),
                  full((HID, FRAME_DIM)),
                  full((HID, 1)), full((1, 1))],
        out_specs=[full((nt, VOCAB_PAD)), full((nv, nv)), full((nb, 1))],
        out_shape=[jax.ShapeDtypeStruct((nt, VOCAB_PAD), jnp.float32),
                   jax.ShapeDtypeStruct((nv, nv), jnp.float32),
                   jax.ShapeDtypeStruct((nb, 1), jnp.float32)],
        compiler_params=pltpu.CompilerParams(dimension_semantics=("arbitrary",)),
    )(text_h, vid_h, cls_h, vm_in,
      mt_w, mt_b.reshape(1, HID), mg.reshape(1, HID), mb.reshape(1, HID),
      md_w, md_b.reshape(1, VOCAB_PAD),
      ft_w, ft_b.reshape(1, HID), fg.reshape(1, HID), fb.reshape(1, HID),
      fd_w, itm_w, itm_b.reshape(1, 1))


# ----------------------------- parameter init -----------------------------

def init_params(key):
    keys = iter(jax.random.split(key, 64))

    def nrm(shape, std=0.02):
        return (jax.random.normal(next(keys), shape) * std).astype(jnp.float32)

    zeros = lambda *s: jnp.zeros(s, jnp.float32)
    ones = lambda *s: jnp.ones(s, jnp.float32)

    p = {
        # bert.embeddings
        "word_emb": nrm((VOCAB, HID)),
        "pos_emb": nrm((MAXPOS, HID)),
        "type_emb": nrm((2, HID)),
        "emb_ln_g": ones(HID), "emb_ln_b": zeros(HID),
        # vision_bert_embeddings (separate BertEmbeddings instance)
        "v_pos_emb": nrm((MAXPOS, HID)),
        "v_type_emb": nrm((2, HID)),
        "v_emb_ln_g": ones(HID), "v_emb_ln_b": zeros(HID),
        # vision_fc = Linear(frame_dim, hid) + ReLU (bn=False)
        "vfc_w": nrm((FRAME_DIM, HID)), "vfc_b": zeros(HID),
        # mlm head (BertOnlyMLMHead): transform + decoder
        "mlm_t_w": nrm((HID, HID)), "mlm_t_b": zeros(HID),
        "mlm_ln_g": ones(HID), "mlm_ln_b": zeros(HID),
        "mlm_dec_w": nrm((HID, VOCAB)), "mlm_dec_b": zeros(VOCAB),
        # mfm head (VisualOnlyMLMHead): transform + decoder (no bias)
        "mfm_t_w": nrm((HID, HID)), "mfm_t_b": zeros(HID),
        "mfm_ln_g": ones(HID), "mfm_ln_b": zeros(HID),
        "mfm_dec_w": nrm((HID, FRAME_DIM)),
        # itm head
        "itm_w": nrm((HID, 1)), "itm_b": zeros(1),
    }
    layers = []
    for _ in range(NLAYER):
        layers.append({
            "q_w": nrm((HID, HID)), "q_b": zeros(HID),
            "k_w": nrm((HID, HID)), "k_b": zeros(HID),
            "v_w": nrm((HID, HID)), "v_b": zeros(HID),
            "ao_w": nrm((HID, HID)), "ao_b": zeros(HID),
            "ao_ln_g": ones(HID), "ao_ln_b": zeros(HID),
            "i_w": nrm((HID, INTER)), "i_b": zeros(INTER),
            "o_w": nrm((INTER, HID)), "o_b": zeros(HID),
            "o_ln_g": ones(HID), "o_ln_b": zeros(HID),
        })
    p["layers"] = layers
    return p


# ----------------------------- losses (tiny scalar glue, stays in JAX) -------------

def cross_entropy_ignore(logits, labels, ignore=-100):
    # torch.nn.CrossEntropyLoss(ignore_index=-100), mean over non-ignored.
    logp = jax.nn.log_softmax(logits, axis=-1)
    valid = labels != ignore
    safe = jnp.where(valid, labels, 0)
    picked = jnp.take_along_axis(logp, safe[:, None], axis=-1)[:, 0]
    cnt = jnp.sum(valid)
    # TODO(synk): torch returns nan when no label is valid; we return 0.0 in that degenerate case.
    return jnp.where(cnt > 0, -jnp.sum(jnp.where(valid, picked, 0.0)) / cnt, 0.0)


def bce_with_logits(logits, targets):
    # torch.nn.BCEWithLogitsLoss (mean)
    l = jnp.maximum(logits, 0.0) - logits * targets + jnp.log1p(jnp.exp(-jnp.abs(logits)))
    return jnp.mean(l)


def mfm_loss_fn(sim_logits, video_mask, video_labels_index):
    # calculate_mfm_loss: sim_logits == vm_output @ vm_input^T computed in the heads kernel.
    mf = video_mask.astype(jnp.float32).reshape(-1)
    mask_matrix = mf[:, None] * mf[None, :]
    masked_logits = sim_logits + (1.0 - mask_matrix) * -1e8
    logpt = jax.nn.log_softmax(masked_logits, axis=-1)
    nce = -jnp.diagonal(logpt)
    valid = video_labels_index.reshape(-1) != -100
    cnt = jnp.sum(valid)
    # TODO(synk): torch .masked_select(...).mean() is nan if nothing was masked; we return 0.0 then.
    return jnp.where(cnt > 0, jnp.sum(jnp.where(valid, nce, 0.0)) / cnt, 0.0)


# ----------------------------- full forward -----------------------------

def model_forward(params, text_input_ids, text_input_mask, video_feature,
                  video_input_mask, lm_label, vm_input, video_label,
                  video_text_match_label):
    # ---- bert.embeddings / vision_fc / vision_bert_embeddings (1 fused kernel) ----
    t_sum = (params["word_emb"][text_input_ids]
             + params["pos_emb"][:TTEXT][None, :, :]
             + params["type_emb"][0][None, None, :]).reshape(-1, HID)          # (B*TTEXT, HID)
    v_add = jnp.tile(params["v_pos_emb"][:MAXF] + params["v_type_emb"][0][None, :],
                     (B, 1))                                                   # (B*MAXF, HID)
    t_emb, v_emb = embed_forward(
        t_sum, video_feature.reshape(-1, FRAME_DIM), v_add,
        params["vfc_w"], params["vfc_b"],
        params["emb_ln_g"], params["emb_ln_b"],
        params["v_emb_ln_g"], params["v_emb_ln_b"])
    # TODO(synk): dropout layers are treated as identity (torch dropout RNG is not reproducible).

    t_emb = t_emb.reshape(B, TTEXT, HID)
    v_emb = v_emb.reshape(B, MAXF, HID)
    x0 = jnp.concatenate([t_emb[:, :1], v_emb, t_emb[:, 1:]], axis=1).reshape(-1, HID)

    # ---- attention bias: key-padding bias within a batch, -1e9 across batches ----
    cls_mask = text_input_mask[:, 0:1]
    bert_mask = jnp.concatenate([cls_mask, video_input_mask, text_input_mask[:, 1:]],
                                axis=1).astype(jnp.float32)                    # (B, SEQ)
    col_bias = ((1.0 - bert_mask) * -10000.0).reshape(-1)                      # (B*SEQ,)
    batch_ids = jnp.repeat(jnp.arange(B), SEQ)
    attn_bias = jnp.where(batch_ids[:, None] == batch_ids[None, :],
                          col_bias[None, :], NEG_XBATCH).astype(jnp.float32)   # (NTOK, NTOK)

    # ---- stack per-layer weights for the single fused encoder kernel ----
    L = params["layers"]
    stacked = {
        "qkv_w": jnp.stack([jnp.concatenate([lp["q_w"], lp["k_w"], lp["v_w"]], axis=1)
                            for lp in L]),
        "qkv_b": jnp.stack([jnp.concatenate([lp["q_b"], lp["k_b"], lp["v_b"]])[None, :]
                            for lp in L]),
        "ao_w": jnp.stack([lp["ao_w"] for lp in L]),
        "ao_b": jnp.stack([lp["ao_b"][None, :] for lp in L]),
        "ao_g": jnp.stack([lp["ao_ln_g"][None, :] for lp in L]),
        "ao_bb": jnp.stack([lp["ao_ln_b"][None, :] for lp in L]),
        "i_w": jnp.stack([lp["i_w"] for lp in L]),
        "i_b": jnp.stack([lp["i_b"][None, :] for lp in L]),
        "o_w": jnp.stack([lp["o_w"] for lp in L]),
        "o_b": jnp.stack([lp["o_b"][None, :] for lp in L]),
        "o_g": jnp.stack([lp["o_ln_g"][None, :] for lp in L]),
        "o_bb": jnp.stack([lp["o_ln_b"][None, :] for lp in L]),
    }
    hidden = encoder_forward(x0, attn_bias, stacked).reshape(B, SEQ, HID)      # last_hidden_state

    # ---- heads (1 fused kernel) ----
    text_h = hidden[:, 1 + MAXF:, :].reshape(-1, HID)      # (B*(TTEXT-1), HID)
    vid_h = hidden[:, 1:1 + MAXF, :].reshape(-1, HID)      # (B*MAXF, HID)
    cls_h = hidden[:, 0, :]                                # (B, HID)
    # lane-dense MLM decoder: pad VOCAB -> 128 columns with zeros, slice back afterwards
    md_w = jnp.zeros((HID, VOCAB_PAD), jnp.float32).at[:, :VOCAB].set(params["mlm_dec_w"])
    md_b = jnp.zeros((VOCAB_PAD,), jnp.float32).at[:VOCAB].set(params["mlm_dec_b"])

    lm_logits, mfm_sim, itm_pred = heads_forward(
        text_h, vid_h, cls_h, vm_input.reshape(-1, FRAME_DIM),
        params["mlm_t_w"], params["mlm_t_b"], params["mlm_ln_g"], params["mlm_ln_b"],
        md_w, md_b,
        params["mfm_t_w"], params["mfm_t_b"], params["mfm_ln_g"], params["mfm_ln_b"],
        params["mfm_dec_w"], params["itm_w"], params["itm_b"])

    mlm_loss = cross_entropy_ignore(lm_logits[:, :VOCAB], lm_label.reshape(-1))
    mfm_loss = mfm_loss_fn(mfm_sim, video_input_mask, video_label)
    itm_loss = bce_with_logits(itm_pred.reshape(-1), video_text_match_label.reshape(-1))

    denom = 3.0  # use_mlm + use_mfm + use_itm
    loss = mlm_loss / 1.25 / denom + mfm_loss / 3.0 / denom + itm_loss / 100.0 / denom
    return mlm_loss, mfm_loss, itm_loss, loss


# ----------------------------- CPU-side augmentation (deterministic numpy) ---------

def mask_tokens(rng, ids):
    """MaskWord.torch_mask_tokens (BERT MLM masking)."""
    labels = ids.copy()
    special = np.isin(ids, [PAD_ID, CLS_ID, SEP_ID, MASK_ID])
    prob = np.full(ids.shape, 0.15)
    prob[special] = 0.0
    masked = rng.random(ids.shape) < prob
    labels = np.where(masked, labels, -100)
    replaced = (rng.random(ids.shape) < 0.8) & masked
    out = np.where(replaced, MASK_ID, ids)
    randw = (rng.random(ids.shape) < 0.5) & masked & ~replaced
    rand_ids = rng.integers(0, VOCAB, ids.shape)
    out = np.where(randw, rand_ids, out)
    return out.astype(np.int32), labels.astype(np.int32)


def mask_frames(rng, feat, vmask):
    """MaskVideo.torch_mask_frames."""
    prob = 0.9 * 0.15 * vmask.astype(np.float64)
    masked = rng.random(vmask.shape) < prob
    idx = np.arange(feat.shape[0] * feat.shape[1]).reshape(feat.shape[0], feat.shape[1])
    labels_index = np.where(masked, idx, -100).astype(np.int32)
    inputs = np.where(masked[..., None], 0.0, feat).astype(np.float32)
    return inputs, vmask, labels_index


def shuf_video(feat):
    """ShuffleVideo.torch_shuf_video: first half keeps order, second half reversed."""
    bs = feat.shape[0]
    shuf = np.array(list(range(bs // 2)) + list(range(bs // 2, bs))[::-1])
    label = (np.arange(bs) == shuf).astype(np.float32)
    return feat[shuf], label


# ----------------------------- main -----------------------------

if __name__ == "__main__":
    params = init_params(jax.random.PRNGKey(0))
    rng = np.random.default_rng(0)

    # inputs (synthetic, deterministic)
    text_ids = np.zeros((B, TTEXT), dtype=np.int32)
    text_mask = np.zeros((B, TTEXT), dtype=np.int32)
    lengths = [9, 8, 7, 9]
    for b in range(B):
        Lb = lengths[b]
        text_ids[b, 0] = CLS_ID
        text_ids[b, 1:Lb - 1] = rng.integers(4, VOCAB, size=Lb - 2)
        text_ids[b, Lb - 1] = SEP_ID
        text_mask[b, :Lb] = 1

    frame_key = jax.random.PRNGKey(0)
    frame_input = np.asarray(
        jax.random.normal(frame_key, (B, MAXF, FRAME_DIM), dtype=jnp.float32))
    frame_mask = np.ones((B, MAXF), dtype=np.int32)
    frame_mask[2, 3] = 0  # one padded frame

    # --- augmentation exactly as in MultiModal.forward ---
    masked_ids, lm_labels = mask_tokens(rng, text_ids)          # MLM
    lm_label = lm_labels[:, 1:]
    vm_input = frame_input.copy()                                # MFM uses un-masked frames
    video_feature, video_input_mask, video_label = mask_frames(rng, frame_input, frame_mask)
    video_feature, video_text_match_label = shuf_video(video_feature)  # ITM shuffle

    fwd = jax.jit(model_forward)
    mlm_loss, mfm_loss, itm_loss, loss = fwd(
        params,
        jnp.asarray(masked_ids),
        jnp.asarray(text_mask),
        jnp.asarray(video_feature),
        jnp.asarray(video_input_mask),
        jnp.asarray(lm_label),
        jnp.asarray(vm_input),
        jnp.asarray(video_label),
        jnp.asarray(video_text_match_label),
    )
    jax.block_until_ready(loss)
    print("KERNEL_OK")
</pallas_src>

<mosaic_0001>
module attributes {stable_mosaic.version = 11 : i64} {
  func.func @_embed_kernel(%arg0: i32, %arg1: memref<36x32xf32, #tpu.memory_space<vmem>>, %arg2: memref<16x48xf32, #tpu.memory_space<vmem>>, %arg3: memref<16x32xf32, #tpu.memory_space<vmem>>, %arg4: memref<48x32xf32, #tpu.memory_space<vmem>>, %arg5: memref<1x32xf32, #tpu.memory_space<vmem>>, %arg6: memref<1x32xf32, #tpu.memory_space<vmem>>, %arg7: memref<1x32xf32, #tpu.memory_space<vmem>>, %arg8: memref<1x32xf32, #tpu.memory_space<vmem>>, %arg9: memref<1x32xf32, #tpu.memory_space<vmem>>, %arg10: memref<36x32xf32, #tpu.memory_space<vmem>>, %arg11: memref<16x32xf32, #tpu.memory_space<vmem>>) attributes {dimension_semantics = [#tpu.dimension_semantics<arbitrary>], iteration_bounds = array<i64: 1>, scalar_prefetch = 0 : i64, scratch_operands = 0 : i64, tpu.core_type = #tpu.core_type<tc>, window_params = [{pipeline_mode = #tpu.pipeline_mode<synchronous>, transform_indices = @transform_0, window_bounds = array<i64: 36, 32>}, {pipeline_mode = #tpu.pipeline_mode<synchronous>, transform_indices = @transform_1, window_bounds = array<i64: 16, 48>}, {pipeline_mode = #tpu.pipeline_mode<synchronous>, transform_indices = @transform_2, window_bounds = array<i64: 16, 32>}, {pipeline_mode = #tpu.pipeline_mode<synchronous>, transform_indices = @transform_3, window_bounds = array<i64: 48, 32>}, {pipeline_mode = #tpu.pipeline_mode<synchronous>, transform_indices = @transform_4, window_bounds = array<i64: 1, 32>}, {pipeline_mode = #tpu.pipeline_mode<synchronous>, transform_indices = @transform_5, window_bounds = array<i64: 1, 32>}, {pipeline_mode = #tpu.pipeline_mode<synchronous>, transform_indices = @transform_6, window_bounds = array<i64: 1, 32>}, {pipeline_mode = #tpu.pipeline_mode<synchronous>, transform_indices = @transform_7, window_bounds = array<i64: 1, 32>}, {pipeline_mode = #tpu.pipeline_mode<synchronous>, transform_indices = @transform_8, window_bounds = array<i64: 1, 32>}, {pipeline_mode = #tpu.pipeline_mode<synchronous>, transform_indices = @transform_9, window_bounds = array<i64: 36, 32>}, {pipeline_mode = #tpu.pipeline_mode<synchronous>, transform_indices = @transform_10, window_bounds = array<i64: 16, 32>}]} {
    %c0 = arith.constant 0 : index
    %c0_0 = arith.constant 0 : index
    %0 = vector.load %arg1[%c0, %c0_0] : memref<36x32xf32, #tpu.memory_space<vmem>>, vector<36x32xf32>
    %c0_1 = arith.constant 0 : index
    %c0_2 = arith.constant 0 : index
    %1 = vector.load %arg6[%c0_1, %c0_2] : memref<1x32xf32, #tpu.memory_space<vmem>>, vector<1x32xf32>
    %c0_3 = arith.constant 0 : index
    %c0_4 = arith.constant 0 : index
    %2 = vector.load %arg7[%c0_3, %c0_4] : memref<1x32xf32, #tpu.memory_space<vmem>>, vector<1x32xf32>
    %cst = arith.constant dense<0.000000e+00> : vector<36xf32>
    %3 = vector.multi_reduction <add>, %0, %cst [1] : vector<36x32xf32> to vector<36xf32>
    %4 = vector.shape_cast %3 : vector<36xf32> to vector<36x1xf32>
    %cst_5 = arith.constant 3.200000e+01 : f32
    %5 = vector.broadcast %cst_5 : f32 to vector<36x1xf32>
    %6 = arith.divf %4, %5 : vector<36x1xf32>
    %7 = vector.broadcast %6 : vector<36x1xf32> to vector<36x32xf32>
    %8 = arith.subf %0, %7 : vector<36x32xf32>
    %9 = arith.mulf %8, %8 : vector<36x32xf32>
    %cst_6 = arith.constant dense<0.000000e+00> : vector<36xf32>
    %10 = vector.multi_reduction <add>, %9, %cst_6 [1] : vector<36x32xf32> to vector<36xf32>
    %11 = vector.shape_cast %10 : vector<36xf32> to vector<36x1xf32>
    %cst_7 = arith.constant 3.200000e+01 : f32
    %12 = vector.broadcast %cst_7 : f32 to vector<36x1xf32>
    %13 = arith.divf %11, %12 : vector<36x1xf32>
    %14 = vector.broadcast %6 : vector<36x1xf32> to vector<36x32xf32>
    %15 = arith.subf %0, %14 : vector<36x32xf32>
    %cst_8 = arith.constant 9.99999996E-13 : f32
    %16 = vector.broadcast %cst_8 : f32 to vector<36x1xf32>
    %17 = arith.addf %13, %16 : vector<36x1xf32>
    %18 = math.rsqrt %17 : vector<36x1xf32>
    %19 = vector.broadcast %18 : vector<36x1xf32> to vector<36x32xf32>
    %20 = arith.mulf %15, %19 : vector<36x32xf32>
    %21 = vector.broadcast %1 : vector<1x32xf32> to vector<36x32xf32>
    %22 = arith.mulf %20, %21 : vector<36x32xf32>
    %23 = vector.broadcast %2 : vector<1x32xf32> to vector<36x32xf32>
    %24 = arith.addf %22, %23 : vector<36x32xf32>
    %c0_9 = arith.constant 0 : index
    %c0_10 = arith.constant 0 : index
    %25 = vector.load %arg10[%c0_9, %c0_10] : memref<36x32xf32, #tpu.memory_space<vmem>>, vector<36x32xf32>
    tpu.vector_store %arg10[%c0_9, %c0_10], %24 {strides = array<i32>} : memref<36x32xf32, #tpu.memory_space<vmem>>, vector<36x32xf32>,
    %c0_11 = arith.constant 0 : index
    %c0_12 = arith.constant 0 : index
    %26 = vector.load %arg2[%c0_11, %c0_12] : memref<16x48xf32, #tpu.memory_space<vmem>>, vector<16x48xf32>
    %c0_13 = arith.constant 0 : index
    %c0_14 = arith.constant 0 : index
    %27 = vector.load %arg4[%c0_13, %c0_14] : memref<48x32xf32, #tpu.memory_space<vmem>>, vector<48x32xf32>
    %cst_15 = arith.constant dense<0.000000e+00> : vector<16x32xf32>
    %28 = tpu.matmul %26, %27, %cst_15 {dimension_numbers = #tpu.dot_dimension_numbers<[1], [0], [0], [1], [0, 0, 1, 1], [], []>} : vector<16x48xf32>, vector<48x32xf32>, vector<16x32xf32> -> vector<16x32xf32>
    %c0_16 = arith.constant 0 : index
    %c0_17 = arith.constant 0 : index
    %29 = vector.load %arg5[%c0_16, %c0_17] : memref<1x32xf32, #tpu.memory_space<vmem>>, vector<1x32xf32>
    %30 = vector.broadcast %29 : vector<1x32xf32> to vector<16x32xf32>
    %31 = arith.addf %28, %30 : vector<16x32xf32>
    %cst_18 = arith.constant 0.000000e+00 : f32
    %32 = vector.broadcast %cst_18 : f32 to vector<16x32xf32>
    %33 = arith.maximumf %31, %32 : vector<16x32xf32>
    %c0_19 = arith.constant 0 : index
    %c0_20 = arith.constant 0 : index
    %34 = vector.load %arg3[%c0_19, %c0_20] : memref<16x32xf32, #tpu.memory_space<vmem>>, vector<16x32xf32>
    %35 = arith.addf %33, %34 : vector<16x32xf32>
    %c0_21 = arith.constant 0 : index
    %c0_22 = arith.constant 0 : index
    %36 = vector.load %arg8[%c0_21, %c0_22] : memref<1x32xf32, #tpu.memory_space<vmem>>, vector<1x32xf32>
    %c0_23 = arith.constant 0 : index
    %c0_24 = arith.constant 0 : index
    %37 = vector.load %arg9[%c0_23, %c0_24] : memref<1x32xf32, #tpu.memory_space<vmem>>, vector<1x32xf32>
    %cst_25 = arith.constant dense<0.000000e+00> : vector<16xf32>
    %38 = vector.multi_reduction <add>, %35, %cst_25 [1] : vector<16x32xf32> to vector<16xf32>
    %39 = vector.shape_cast %38 : vector<16xf32> to vector<16x1xf32>
    %cst_26 = arith.constant 3.200000e+01 : f32
    %40 = vector.broadcast %cst_26 : f32 to vector<16x1xf32>
    %41 = arith.divf %39, %40 : vector<16x1xf32>
    %42 = vector.broadcast %41 : vector<16x1xf32> to vector<16x32xf32>
    %43 = arith.subf %35, %42 : vector<16x32xf32>
    %44 = arith.mulf %43, %43 : vector<16x32xf32>
    %cst_27 = arith.constant dense<0.000000e+00> : vector<16xf32>
    %45 = vector.multi_reduction <add>, %44, %cst_27 [1] : vector<16x32xf32> to vector<16xf32>
    %46 = vector.shape_cast %45 : vector<16xf32> to vector<16x1xf32>
    %cst_28 = arith.constant 3.200000e+01 : f32
    %47 = vector.broadcast %cst_28 : f32 to vector<16x1xf32>
    %48 = arith.divf %46, %47 : vector<16x1xf32>
    %49 = vector.broadcast %41 : vector<16x1xf32> to vector<16x32xf32>
    %50 = arith.subf %35, %49 : vector<16x32xf32>
    %cst_29 = arith.constant 9.99999996E-13 : f32
    %51 = vector.broadcast %cst_29 : f32 to vector<16x1xf32>
    %52 = arith.addf %48, %51 : vector<16x1xf32>
    %53 = math.rsqrt %52 : vector<16x1xf32>
    %54 = vector.broadcast %53 : vector<16x1xf32> to vector<16x32xf32>
    %55 = arith.mulf %50, %54 : vector<16x32xf32>
    %56 = vector.broadcast %36 : vector<1x32xf32> to vector<16x32xf32>
    %57 = arith.mulf %55, %56 : vector<16x32xf32>
    %58 = vector.broadcast %37 : vector<1x32xf32> to vector<16x32xf32>
    %59 = arith.addf %57, %58 : vector<16x32xf32>
    %c0_30 = arith.constant 0 : index
    %c0_31 = arith.constant 0 : index
    %60 = vector.load %arg11[%c0_30, %c0_31] : memref<16x32xf32, #tpu.memory_space<vmem>>, vector<16x32xf32>
    tpu.vector_store %arg11[%c0_30, %c0_31], %59 {strides = array<i32>} : memref<16x32xf32, #tpu.memory_space<vmem>>, vector<16x32xf32>,
    return
  }
  func.func @transform_0(%arg0: i32) -> (i32, i32) {
    %c0_i32 = arith.constant 0 : i32
    %c0_i32_0 = arith.constant 0 : i32
    %c0_i32_1 = arith.constant 0 : i32
    return %c0_i32, %c0_i32_0 : i32, i32
  }
  func.func @transform_1(%arg0: i32) -> (i32, i32) {
    %c0_i32 = arith.constant 0 : i32
    %c0_i32_0 = arith.constant 0 : i32
    %c0_i32_1 = arith.constant 0 : i32
    return %c0_i32, %c0_i32_0 : i32, i32
  }
  func.func @transform_2(%arg0: i32) -> (i32, i32) {
    %c0_i32 = arith.constant 0 : i32
    %c0_i32_0 = arith.constant 0 : i32
    %c0_i32_1 = arith.constant 0 : i32
    return %c0_i32, %c0_i32_0 : i32, i32
  }
  func.func @transform_3(%arg0: i32) -> (i32, i32) {
    %c0_i32 = arith.constant 0 : i32
    %c0_i32_0 = arith.constant 0 : i32
    %c0_i32_1 = arith.constant 0 : i32
    return %c0_i32, %c0_i32_0 : i32, i32
  }
  func.func @transform_4(%arg0: i32) -> (i32, i32) {
    %c0_i32 = arith.constant 0 : i32
    %c0_i32_0 = arith.constant 0 : i32
    %c0_i32_1 = arith.constant 0 : i32
    return %c0_i32, %c0_i32_0 : i32, i32
  }
  func.func @transform_5(%arg0: i32) -> (i32, i32) {
    %c0_i32 = arith.constant 0 : i32
    %c0_i32_0 = arith.constant 0 : i32
    %c0_i32_1 = arith.constant 0 : i32
    return %c0_i32, %c0_i32_0 : i32, i32
  }
  func.func @transform_6(%arg0: i32) -> (i32, i32) {
    %c0_i32 = arith.constant 0 : i32
    %c0_i32_0 = arith.constant 0 : i32
    %c0_i32_1 = arith.constant 0 : i32
    return %c0_i32, %c0_i32_0 : i32, i32
  }
  func.func @transform_7(%arg0: i32) -> (i32, i32) {
    %c0_i32 = arith.constant 0 : i32
    %c0_i32_0 = arith.constant 0 : i32
    %c0_i32_1 = arith.constant 0 : i32
    return %c0_i32, %c0_i32_0 : i32, i32
  }
  func.func @transform_8(%arg0: i32) -> (i32, i32) {
    %c0_i32 = arith.constant 0 : i32
    %c0_i32_0 = arith.constant 0 : i32
    %c0_i32_1 = arith.constant 0 : i32
    return %c0_i32, %c0_i32_0 : i32, i32
  }
  func.func @transform_9(%arg0: i32) -> (i32, i32) {
    %c0_i32 = arith.constant 0 : i32
    %c0_i32_0 = arith.constant 0 : i32
    %c0_i32_1 = arith.constant 0 : i32
    return %c0_i32, %c0_i32_0 : i32, i32
  }
  func.func @transform_10(%arg0: i32) -> (i32, i32) {
    %c0_i32 = arith.constant 0 : i32
    %c0_i32_0 = arith.constant 0 : i32
    %c0_i32_1 = arith.constant 0 : i32
    return %c0_i32, %c0_i32_0 : i32, i32
  }
}

module attributes {stable_mosaic.version = 11 : i64} {
  func.func @_heads_kernel(%arg0: i32, %arg1: memref<32x32xf32, #tpu.memory_space<vmem>>, %arg2: memref<16x32xf32, #tpu.memory_space<vmem>>, %arg3: memref<4x32xf32, #tpu.memory_space<vmem>>, %arg4: memref<16x48xf32, #tpu.memory_space<vmem>>, %arg5: memref<32x32xf32, #tpu.memory_space<vmem>>, %arg6: memref<1x32xf32, #tpu.memory_space<vmem>>, %arg7: memref<1x32xf32, #tpu.memory_space<vmem>>, %arg8: memref<1x32xf32, #tpu.memory_space<vmem>>, %arg9: memref<32x128xf32, #tpu.memory_space<vmem>>, %arg10: memref<1x128xf32, #tpu.memory_space<vmem>>, %arg11: memref<32x32xf32, #tpu.memory_space<vmem>>, %arg12: memref<1x32xf32, #tpu.memory_space<vmem>>, %arg13: memref<1x32xf32, #tpu.memory_space<vmem>>, %arg14: memref<1x32xf32, #tpu.memory_space<vmem>>, %arg15: memref<32x48xf32, #tpu.memory_space<vmem>>, %arg16: memref<32x1xf32, #tpu.memory_space<vmem>>, %arg17: memref<1x1xf32, #tpu.memory_space<vmem>>, %arg18: memref<32x128xf32, #tpu.memory_space<vmem>>, %arg19: memref<16x16xf32, #tpu.memory_space<vmem>>, %arg20: memref<4x1xf32, #tpu.memory_space<vmem>>) attributes {dimension_semantics = [#tpu.dimension_semantics<arbitrary>], iteration_bounds = array<i64: 1>, scalar_prefetch = 0 : i64, scratch_operands = 0 : i64, tpu.core_type = #tpu.core_type<tc>, window_params = [{pipeline_mode = #tpu.pipeline_mode<synchronous>, transform_indices = @transform_0, window_bounds = array<i64: 32, 32>}, {pipeline_mode = #tpu.pipeline_mode<synchronous>, transform_indices = @transform_1, window_bounds = array<i64: 16, 32>}, {pipeline_mode = #tpu.pipeline_mode<synchronous>, transform_indices = @transform_2, window_bounds = array<i64: 4, 32>}, {pipeline_mode = #tpu.pipeline_mode<synchronous>, transform_indices = @transform_3, window_bounds = array<i64: 16, 48>}, {pipeline_mode = #tpu.pipeline_mode<synchronous>, transform_indices = @transform_4, window_bounds = array<i64: 32, 32>}, {pipeline_mode = #tpu.pipeline_mode<synchronous>, transform_indices = @transform_5, window_bounds = array<i64: 1, 32>}, {pipeline_mode = #tpu.pipeline_mode<synchronous>, transform_indices = @transform_6, window_bounds = array<i64: 1, 32>}, {pipeline_mode = #tpu.pipeline_mode<synchronous>, transform_indices = @transform_7, window_bounds = array<i64: 1, 32>}, {pipeline_mode = #tpu.pipeline_mode<synchronous>, transform_indices = @transform_8, window_bounds = array<i64: 32, 128>}, {pipeline_mode = #tpu.pipeline_mode<synchronous>, transform_indices = @transform_9, window_bounds = array<i64: 1, 128>}, {pipeline_mode = #tpu.pipeline_mode<synchronous>, transform_indices = @transform_10, window_bounds = array<i64: 32, 32>}, {pipeline_mode = #tpu.pipeline_mode<synchronous>, transform_indices = @transform_11, window_bounds = array<i64: 1, 32>}, {pipeline_mode = #tpu.pipeline_mode<synchronous>, transform_indices = @transform_12, window_bounds = array<i64: 1, 32>}, {pipeline_mode = #tpu.pipeline_mode<synchronous>, transform_indices = @transform_13, window_bounds = array<i64: 1, 32>}, {pipeline_mode = #tpu.pipeline_mode<synchronous>, transform_indices = @transform_14, window_bounds = array<i64: 32, 48>}, {pipeline_mode = #tpu.pipeline_mode<synchronous>, transform_indices = @transform_15, window_bounds = array<i64: 32, 1>}, {pipeline_mode = #tpu.pipeline_mode<synchronous>, transform_indices = @transform_16, window_bounds = array<i64: 1, 1>}, {pipeline_mode = #tpu.pipeline_mode<synchronous>, transform_indices = @transform_17, window_bounds = array<i64: 32, 128>}, {pipeline_mode = #tpu.pipeline_mode<synchronous>, transform_indices = @transform_18, window_bounds = array<i64: 16, 16>}, {pipeline_mode = #tpu.pipeline_mode<synchronous>, transform_indices = @transform_19, window_bounds = array<i64: 4, 1>}]} {
    %c0 = arith.constant 0 : index
    %c0_0 = arith.constant 0 : index
    %0 = vector.load %arg1[%c0, %c0_0] : memref<32x32xf32, #tpu.memory_space<vmem>>, vector<32x32xf32>
    %c0_1 = arith.constant 0 : index
    %c0_2 = arith.constant 0 : index
    %1 = vector.load %arg5[%c0_1, %c0_2] : memref<32x32xf32, #tpu.memory_space<vmem>>, vector<32x32xf32>
    %cst = arith.constant dense<0.000000e+00> : vector<32x32xf32>
    %2 = tpu.matmul %0, %1, %cst {dimension_numbers = #tpu.dot_dimension_numbers<[1], [0], [0], [1], [0, 0, 1, 1], [], []>} : vector<32x32xf32>, vector<32x32xf32>, vector<32x32xf32> -> vector<32x32xf32>
    %c0_3 = arith.constant 0 : index
    %c0_4 = arith.constant 0 : index
    %3 = vector.load %arg6[%c0_3, %c0_4] : memref<1x32xf32, #tpu.memory_space<vmem>>, vector<1x32xf32>
    %4 = vector.broadcast %3 : vector<1x32xf32> to vector<32x32xf32>
    %5 = arith.addf %2, %4 : vector<32x32xf32>
    %cst_5 = arith.constant 5.000000e-01 : f32
    %6 = vector.broadcast %cst_5 : f32 to vector<32x32xf32>
    %7 = arith.mulf %6, %5 : vector<32x32xf32>
    %cst_6 = arith.constant 0.707106769 : f32
    %8 = vector.broadcast %cst_6 : f32 to vector<32x32xf32>
    %9 = arith.mulf %5, %8 : vector<32x32xf32>
    %10 = math.erf %9 : vector<32x32xf32>
    %cst_7 = arith.constant 1.000000e+00 : f32
    %11 = vector.broadcast %cst_7 : f32 to vector<32x32xf32>
    %12 = arith.addf %11, %10 : vector<32x32xf32>
    %13 = arith.mulf %7, %12 : vector<32x32xf32>
    %c0_8 = arith.constant 0 : index
    %c0_9 = arith.constant 0 : index
    %14 = vector.load %arg7[%c0_8, %c0_9] : memref<1x32xf32, #tpu.memory_space<vmem>>, vector<1x32xf32>
    %c0_10 = arith.constant 0 : index
    %c0_11 = arith.constant 0 : index
    %15 = vector.load %arg8[%c0_10, %c0_11] : memref<1x32xf32, #tpu.memory_space<vmem>>, vector<1x32xf32>
    %cst_12 = arith.constant dense<0.000000e+00> : vector<32xf32>
    %16 = vector.multi_reduction <add>, %13, %cst_12 [1] : vector<32x32xf32> to vector<32xf32>
    %17 = vector.shape_cast %16 : vector<32xf32> to vector<32x1xf32>
    %cst_13 = arith.constant 3.200000e+01 : f32
    %18 = vector.broadcast %cst_13 : f32 to vector<32x1xf32>
    %19 = arith.divf %17, %18 : vector<32x1xf32>
    %20 = vector.broadcast %19 : vector<32x1xf32> to vector<32x32xf32>
    %21 = arith.subf %13, %20 : vector<32x32xf32>
    %22 = arith.mulf %21, %21 : vector<32x32xf32>
    %cst_14 = arith.constant dense<0.000000e+00> : vector<32xf32>
    %23 = vector.multi_reduction <add>, %22, %cst_14 [1] : vector<32x32xf32> to vector<32xf32>
    %24 = vector.shape_cast %23 : vector<32xf32> to vector<32x1xf32>
    %cst_15 = arith.constant 3.200000e+01 : f32
    %25 = vector.broadcast %cst_15 : f32 to vector<32x1xf32>
    %26 = arith.divf %24, %25 : vector<32x1xf32>
    %27 = vector.broadcast %19 : vector<32x1xf32> to vector<32x32xf32>
    %28 = arith.subf %13, %27 : vector<32x32xf32>
    %cst_16 = arith.constant 9.99999996E-13 : f32
    %29 = vector.broadcast %cst_16 : f32 to vector<32x1xf32>
    %30 = arith.addf %26, %29 : vector<32x1xf32>
    %31 = math.rsqrt %30 : vector<32x1xf32>
    %32 = vector.broadcast %31 : vector<32x1xf32> to vector<32x32xf32>
    %33 = arith.mulf %28, %32 : vector<32x32xf32>
    %34 = vector.broadcast %14 : vector<1x32xf32> to vector<32x32xf32>
    %35 = arith.mulf %33, %34 : vector<32x32xf32>
    %36 = vector.broadcast %15 : vector<1x32xf32> to vector<32x32xf32>
    %37 = arith.addf %35, %36 : vector<32x32xf32>
    %c0_17 = arith.constant 0 : index
    %c0_18 = arith.constant 0 : index
    %38 = vector.load %arg9[%c0_17, %c0_18] : memref<32x128xf32, #tpu.memory_space<vmem>>, vector<32x128xf32>
    %cst_19 = arith.constant dense<0.000000e+00> : vector<32x128xf32>
    %39 = tpu.matmul %37, %38, %cst_19 {dimension_numbers = #tpu.dot_dimension_numbers<[1], [0], [0], [1], [0, 0, 1, 1], [], []>} : vector<32x32xf32>, vector<32x128xf32>, vector<32x128xf32> -> vector<32x128xf32>
    %c0_20 = arith.constant 0 : index
    %c0_21 = arith.constant 0 : index
    %40 = vector.load %arg10[%c0_20, %c0_21] : memref<1x128xf32, #tpu.memory_space<vmem>>, vector<1x128xf32>
    %41 = vector.broadcast %40 : vector<1x128xf32> to vector<32x128xf32>
    %42 = arith.addf %39, %41 : vector<32x128xf32>
    %c0_22 = arith.constant 0 : index
    %c0_23 = arith.constant 0 : index
    %43 = vector.load %arg18[%c0_22, %c0_23] : memref<32x128xf32, #tpu.memory_space<vmem>>, vector<32x128xf32>
    tpu.vector_store %arg18[%c0_22, %c0_23], %42 {strides = array<i32>} : memref<32x128xf32, #tpu.memory_space<vmem>>, vector<32x128xf32>,
    %c0_24 = arith.constant 0 : index
    %c0_25 = arith.constant 0 : index
    %44 = vector.load %arg2[%c0_24, %c0_25] : memref<16x32xf32, #tpu.memory_space<vmem>>, vector<16x32xf32>
    %c0_26 = arith.constant 0 : index
    %c0_27 = arith.constant 0 : index
    %45 = vector.load %arg11[%c0_26, %c0_27] : memref<32x32xf32, #tpu.memory_space<vmem>>, vector<32x32xf32>
    %cst_28 = arith.constant dense<0.000000e+00> : vector<16x32xf32>
    %46 = tpu.matmul %44, %45, %cst_28 {dimension_numbers = #tpu.dot_dimension_numbers<[1], [0], [0], [1], [0, 0, 1, 1], [], []>} : vector<16x32xf32>, vector<32x32xf32>, vector<16x32xf32> -> vector<16x32xf32>
    %c0_29 = arith.constant 0 : index
    %c0_30 = arith.constant 0 : index
    %47 = vector.load %arg12[%c0_29, %c0_30] : memref<1x32xf32, #tpu.memory_space<vmem>>, vector<1x32xf32>
    %48 = vector.broadcast %47 : vector<1x32xf32> to vector<16x32xf32>
    %49 = arith.addf %46, %48 : vector<16x32xf32>
    %cst_31 = arith.constant 5.000000e-01 : f32
    %50 = vector.broadcast %cst_31 : f32 to vector<16x32xf32>
    %51 = arith.mulf %50, %49 : vector<16x32xf32>
    %cst_32 = arith.constant 0.707106769 : f32
    %52 = vector.broadcast %cst_32 : f32 to vector<16x32xf32>
    %53 = arith.mulf %49, %52 : vector<16x32xf32>
    %54 = math.erf %53 : vector<16x32xf32>
    %cst_33 = arith.constant 1.000000e+00 : f32
    %55 = vector.broadcast %cst_33 : f32 to vector<16x32xf32>
    %56 = arith.addf %55, %54 : vector<16x32xf32>
    %57 = arith.mulf %51, %56 : vector<16x32xf32>
    %c0_34 = arith.constant 0 : index
    %c0_35 = arith.constant 0 : index
    %58 = vector.load %arg13[%c0_34, %c0_35] : memref<1x32xf32, #tpu.memory_space<vmem>>, vector<1x32xf32>
    %c0_36 = arith.constant 0 : index
    %c0_37 = arith.constant 0 : index
    %59 = vector.load %arg14[%c0_36, %c0_37] : memref<1x32xf32, #tpu.memory_space<vmem>>, vector<1x32xf32>
    %cst_38 = arith.constant dense<0.000000e+00> : vector<16xf32>
    %60 = vector.multi_reduction <add>, %57, %cst_38 [1] : vector<16x32xf32> to vector<16xf32>
    %61 = vector.shape_cast %60 : vector<16xf32> to vector<16x1xf32>
    %cst_39 = arith.constant 3.200000e+01 : f32
    %62 = vector.broadcast %cst_39 : f32 to vector<16x1xf32>
    %63 = arith.divf %61, %62 : vector<16x1xf32>
    %64 = vector.broadcast %63 : vector<16x1xf32> to vector<16x32xf32>
    %65 = arith.subf %57, %64 : vector<16x32xf32>
    %66 = arith.mulf %65, %65 : vector<16x32xf32>
    %cst_40 = arith.constant dense<0.000000e+00> : vector<16xf32>
    %67 = vector.multi_reduction <add>, %66, %cst_40 [1] : vector<16x32xf32> to vector<16xf32>
    %68 = vector.shape_cast %67 : vector<16xf32> to vector<16x1xf32>
    %cst_41 = arith.constant 3.200000e+01 : f32
    %69 = vector.broadcast %cst_41 : f32 to vector<16x1xf32>
    %70 = arith.divf %68, %69 : vector<16x1xf32>
    %71 = vector.broadcast %63 : vector<16x1xf32> to vector<16x32xf32>
    %72 = arith.subf %57, %71 : vector<16x32xf32>
    %cst_42 = arith.constant 9.99999996E-13 : f32
    %73 = vector.broadcast %cst_42 : f32 to vector<16x1xf32>
    %74 = arith.addf %70, %73 : vector<16x1xf32>
    %75 = math.rsqrt %74 : vector<16x1xf32>
    %76 = vector.broadcast %75 : vector<16x1xf32> to vector<16x32xf32>
    %77 = arith.mulf %72, %76 : vector<16x32xf32>
    %78 = vector.broadcast %58 : vector<1x32xf32> to vector<16x32xf32>
    %79 = arith.mulf %77, %78 : vector<16x32xf32>
    %80 = vector.broadcast %59 : vector<1x32xf32> to vector<16x32xf32>
    %81 = arith.addf %79, %80 : vector<16x32xf32>
    %c0_43 = arith.constant 0 : index
    %c0_44 = arith.constant 0 : index
    %82 = vector.load %arg15[%c0_43, %c0_44] : memref<32x48xf32, #tpu.memory_space<vmem>>, vector<32x48xf32>
    %cst_45 = arith.constant dense<0.000000e+00> : vector<16x48xf32>
    %83 = tpu.matmul %81, %82, %cst_45 {dimension_numbers = #tpu.dot_dimension_numbers<[1], [0], [0], [1], [0, 0, 1, 1], [], []>} : vector<16x32xf32>, vector<32x48xf32>, vector<16x48xf32> -> vector<16x48xf32>
    %c0_46 = arith.constant 0 : index
    %c0_47 = arith.constant 0 : index
    %84 = vector.load %arg4[%c0_46, %c0_47] : memref<16x48xf32, #tpu.memory_space<vmem>>, vector<16x48xf32>
    %cst_48 = arith.constant dense<0.000000e+00> : vector<16x16xf32>
    %85 = tpu.matmul %83, %84, %cst_48 {dimension_numbers = #tpu.dot_dimension_numbers<[1], [1], [0], [0], [0, 0, 1, 0], [], []>} : vector<16x48xf32>, vector<16x48xf32>, vector<16x16xf32> -> vector<16x16xf32>
    %c0_49 = arith.constant 0 : index
    %c0_50 = arith.constant 0 : index
    %86 = vector.load %arg19[%c0_49, %c0_50] : memref<16x16xf32, #tpu.memory_space<vmem>>, vector<16x16xf32>
    tpu.vector_store %arg19[%c0_49, %c0_50], %85 {strides = array<i32>} : memref<16x16xf32, #tpu.memory_space<vmem>>, vector<16x16xf32>,
    %c0_51 = arith.constant 0 : index
    %c0_52 = arith.constant 0 : index
    %87 = vector.load %arg3[%c0_51, %c0_52] : memref<4x32xf32, #tpu.memory_space<vmem>>, vector<4x32xf32>
    %c0_53 = arith.constant 0 : index
    %c0_54 = arith.constant 0 : index
    %88 = vector.load %arg16[%c0_53, %c0_54] : memref<32x1xf32, #tpu.memory_space<vmem>>, vector<32x1xf32>
    %cst_55 = arith.constant dense<0.000000e+00> : vector<4x1xf32>
    %89 = tpu.matmul %87, %88, %cst_55 {dimension_numbers = #tpu.dot_dimension_numbers<[1], [0], [0], [1], [0, 0, 1, 1], [], []>} : vector<4x32xf32>, vector<32x1xf32>, vector<4x1xf32> -> vector<4x1xf32>
    %c0_56 = arith.constant 0 : index
    %c0_57 = arith.constant 0 : index
    %90 = vector.load %arg17[%c0_56, %c0_57] : memref<1x1xf32, #tpu.memory_space<vmem>>, vector<1x1xf32>
    %91 = vector.broadcast %90 : vector<1x1xf32> to vector<4x1xf32>
    %92 = arith.addf %89, %91 : vector<4x1xf32>
    %c0_58 = arith.constant 0 : index
    %c0_59 = arith.constant 0 : index
    %93 = vector.load %arg20[%c0_58, %c0_59] : memref<4x1xf32, #tpu.memory_space<vmem>>, vector<4x1xf32>
    tpu.vector_store %arg20[%c0_58, %c0_59], %92 {strides = array<i32>} : memref<4x1xf32, #tpu.memory_space<vmem>>, vector<4x1xf32>,
    return
  }
  func.func @transform_0(%arg0: i32) -> (i32, i32) {
    %c0_i32 = arith.constant 0 : i32
    %c0_i32_0 = arith.constant 0 : i32
    %c0_i32_1 = arith.constant 0 : i32
    return %c0_i32, %c0_i32_0 : i32, i32
  }
  func.func @transform_1(%arg0: i32) -> (i32, i32) {
    %c0_i32 = arith.constant 0 : i32
    %c0_i32_0 = arith.constant 0 : i32
    %c0_i32_1 = arith.constant 0 : i32
    return %c0_i32, %c0_i32_0 : i32, i32
  }
  func.func @transform_2(%arg0: i32) -> (i32, i32) {
    %c0_i32 = arith.constant 0 : i32
    %c0_i32_0 = arith.constant 0 : i32
    %c0_i32_1 = arith.constant 0 : i32
    return %c0_i32, %c0_i32_0 : i32, i32
  }
  func.func @transform_3(%arg0: i32) -> (i32, i32) {
    %c0_i32 = arith.constant 0 : i32
    %c0_i32_0 = arith.constant 0 : i32
    %c0_i32_1 = arith.constant 0 : i32
    return %c0_i32, %c0_i32_0 : i32, i32
  }
  func.func @transform_4(%arg0: i32) -> (i32, i32) {
    %c0_i32 = arith.constant 0 : i32
    %c0_i32_0 = arith.constant 0 : i32
    %c0_i32_1 = arith.constant 0 : i32
    return %c0_i32, %c0_i32_0 : i32, i32
  }
  func.func @transform_5(%arg0: i32) -> (i32, i32) {
    %c0_i32 = arith.constant 0 : i32
    %c0_i32_0 = arith.constant 0 : i32
    %c0_i32_1 = arith.constant 0 : i32
    return %c0_i32, %c0_i32_0 : i32, i32
  }
  func.func @transform_6(%arg0: i32) -> (i32, i32) {
    %c0_i32 = arith.constant 0 : i32
    %c0_i32_0 = arith.constant 0 : i32
    %c0_i32_1 = arith.constant 0 : i32
    return %c0_i32, %c0_i32_0 : i32, i32
  }
  func.func @transform_7(%arg0: i32) -> (i32, i32) {
    %c0_i32 = arith.constant 0 : i32
    %c0_i32_0 = arith.constant 0 : i32
    %c0_i32_1 = arith.constant 0 : i32
    return %c0_i32, %c0_i32_0 : i32, i32
  }
  func.func @transform_8(%arg0: i32) -> (i32, i32) {
    %c0_i32 = arith.constant 0 : i32
    %c0_i32_0 = arith.constant 0 : i32
    %c0_i32_1 = arith.constant 0 : i32
    return %c0_i32, %c0_i32_0 : i32, i32
  }
  func.func @transform_9(%arg0: i32) -> (i32, i32) {
    %c0_i32 = arith.constant 0 : i32
    %c0_i32_0 = arith.constant 0 : i32
    %c0_i32_1 = arith.constant 0 : i32
    return %c0_i32, %c0_i32_0 : i32, i32
  }
  func.func @transform_10(%arg0: i32) -> (i32, i32) {
    %c0_i32 = arith.constant 0 : i32
    %c0_i32_0 = arith.constant 0 : i32
    %c0_i32_1 = arith.constant 0 : i32
    return %c0_i32, %c0_i32_0 : i32, i32
  }
  func.func @transform_11(%arg0: i32) -> (i32, i32) {
    %c0_i32 = arith.constant 0 : i32
    %c0_i32_0 = arith.constant 0 : i32
    %c0_i32_1 = arith.constant 0 : i32
    return %c0_i32, %c0_i32_0 : i32, i32
  }
  func.func @transform_12(%arg0: i32) -> (i32, i32) {
    %c0_i32 = arith.constant 0 : i32
    %c0_i32_0 = arith.constant 0 : i32
    %c0_i32_1 = arith.constant 0 : i32
    return %c0_i32, %c0_i32_0 : i32, i32
  }
  func.func @transform_13(%arg0: i32) -> (i32, i32) {
    %c0_i32 = arith.constant 0 : i32
    %c0_i32_0 = arith.constant 0 : i32
    %c0_i32_1 = arith.constant 0 : i32
    return %c0_i32, %c0_i32_0 : i32, i32
  }
  func.func @transform_14(%arg0: i32) -> (i32, i32) {
    %c0_i32 = arith.constant 0 : i32
    %c0_i32_0 = arith.constant 0 : i32
    %c0_i32_1 = arith.constant 0 : i32
    return %c0_i32, %c0_i32_0 : i32, i32
  }
  func.func @transform_15(%arg0: i32) -> (i32, i32) {
    %c0_i32 = arith.constant 0 : i32
    %c0_i32_0 = arith.constant 0 : i32
    %c0_i32_1 = arith.constant 0 : i32
    return %c0_i32, %c0_i32_0 : i32, i32
  }
  func.func @transform_16(%arg0: i32) -> (i32, i32) {
    %c0_i32 = arith.constant 0 : i32
    %c0_i32_0 = arith.constant 0 : i32
    %c0_i32_1 = arith.constant 0 : i32
    return %c0_i32, %c0_i32_0 : i32, i32
  }
  func.func @transform_17(%arg0: i32) -> (i32, i32) {
    %c0_i32 = arith.constant 0 : i32
    %c0_i32_0 = arith.constant 0 : i32
    %c0_i32_1 = arith.constant 0 : i32
    return %c0_i32, %c0_i32_0 : i32, i32
  }
  func.func @transform_18(%arg0: i32) -> (i32, i32) {
    %c0_i32 = arith.constant 0 : i32
    %c0_i32_0 = arith.constant 0 : i32
    %c0_i32_1 = arith.constant 0 : i32
    return %c0_i32, %c0_i32_0 : i32, i32
  }
  func.func @transform_19(%arg0: i32) -> (i32, i32) {
    %c0_i32 = arith.constant 0 : i32
    %c0_i32_0 = arith.constant 0 : i32
    %c0_i32_1 = arith.constant 0 : i32
    return %c0_i32, %c0_i32_0 : i32, i32
  }
}

module attributes {stable_mosaic.version = 11 : i64} {
  func.func @_encoder_kernel(%arg0: i32, %arg1: memref<52x32xf32, #tpu.memory_space<vmem>>, %arg2: memref<52x52xf32, #tpu.memory_space<vmem>>, %arg3: memref<1x32x96xf32, #tpu.memory_space<vmem>>, %arg4: memref<1x1x96xf32, #tpu.memory_space<vmem>>, %arg5: memref<1x32x32xf32, #tpu.memory_space<vmem>>, %arg6: memref<1x1x32xf32, #tpu.memory_space<vmem>>, %arg7: memref<1x1x32xf32, #tpu.memory_space<vmem>>, %arg8: memref<1x1x32xf32, #tpu.memory_space<vmem>>, %arg9: memref<1x32x64xf32, #tpu.memory_space<vmem>>, %arg10: memref<1x1x64xf32, #tpu.memory_space<vmem>>, %arg11: memref<1x64x32xf32, #tpu.memory_space<vmem>>, %arg12: memref<1x1x32xf32, #tpu.memory_space<vmem>>, %arg13: memref<1x1x32xf32, #tpu.memory_space<vmem>>, %arg14: memref<1x1x32xf32, #tpu.memory_space<vmem>>, %arg15: memref<52x32xf32, #tpu.memory_space<vmem>>, %arg16: memref<52x32xf32, #tpu.memory_space<vmem>>) attributes {dimension_semantics = [#tpu.dimension_semantics<arbitrary>], iteration_bounds = array<i64: 2>, scalar_prefetch = 0 : i64, scratch_operands = 1 : i64, tpu.core_type = #tpu.core_type<tc>, window_params = [{pipeline_mode = #tpu.pipeline_mode<synchronous>, transform_indices = @transform_0, window_bounds = array<i64: 52, 32>}, {pipeline_mode = #tpu.pipeline_mode<synchronous>, transform_indices = @transform_1, window_bounds = array<i64: 52, 52>}, {transform_indices = @transform_2, window_bounds = array<i64: 1, 32, 96>}, {transform_indices = @transform_3, window_bounds = array<i64: 1, 1, 96>}, {transform_indices = @transform_4, window_bounds = array<i64: 1, 32, 32>}, {transform_indices = @transform_5, window_bounds = array<i64: 1, 1, 32>}, {transform_indices = @transform_6, window_bounds = array<i64: 1, 1, 32>}, {transform_indices = @transform_7, window_bounds = array<i64: 1, 1, 32>}, {transform_indices = @transform_8, window_bounds = array<i64: 1, 32, 64>}, {transform_indices = @transform_9, window_bounds = array<i64: 1, 1, 64>}, {transform_indices = @transform_10, window_bounds = array<i64: 1, 64, 32>}, {transform_indices = @transform_11, window_bounds = array<i64: 1, 1, 32>}, {transform_indices = @transform_12, window_bounds = array<i64: 1, 1, 32>}, {transform_indices = @transform_13, window_bounds = array<i64: 1, 1, 32>}, {pipeline_mode = #tpu.pipeline_mode<synchronous>, transform_indices = @transform_14, window_bounds = array<i64: 52, 32>}]} {
    %c0_i32 = arith.constant 0 : i32
    %0 = arith.cmpi eq, %arg0, %c0_i32 : i32
    %1 = arith.extui %0 : i1 to i32
    %c0_i32_0 = arith.constant 0 : i32
    %2 = arith.cmpi ne, %1, %c0_i32_0 : i32
    scf.if %2 {
      %c0_82 = arith.constant 0 : index
      %c0_83 = arith.constant 0 : index
      %181 = vector.load %arg1[%c0_82, %c0_83] : memref<52x32xf32, #tpu.memory_space<vmem>>, vector<52x32xf32>
      %c0_84 = arith.constant 0 : index
      %c0_85 = arith.constant 0 : index
      %182 = vector.load %arg16[%c0_84, %c0_85] : memref<52x32xf32, #tpu.memory_space<vmem>>, vector<52x32xf32>
      tpu.vector_store %arg16[%c0_84, %c0_85], %181 {strides = array<i32>} : memref<52x32xf32, #tpu.memory_space<vmem>>, vector<52x32xf32>,
    } else {
    }
    %c0 = arith.constant 0 : index
    %c0_1 = arith.constant 0 : index
    %3 = vector.load %arg16[%c0, %c0_1] : memref<52x32xf32, #tpu.memory_space<vmem>>, vector<52x32xf32>
    %c0_2 = arith.constant 0 : index
    %c0_3 = arith.constant 0 : index
    %4 = vector.load %arg2[%c0_2, %c0_3] : memref<52x52xf32, #tpu.memory_space<vmem>>, vector<52x52xf32>
    %c0_4 = arith.constant 0 : index
    %c0_5 = arith.constant 0 : index
    %c0_6 = arith.constant 0 : index
    %5 = vector.load %arg3[%c0_4, %c0_5, %c0_6] : memref<1x32x96xf32, #tpu.memory_space<vmem>>, vector<1x32x96xf32>
    %6 = vector.shape_cast %5 : vector<1x32x96xf32> to vector<32x96xf32>
    %cst = arith.constant dense<0.000000e+00> : vector<52x96xf32>
    %7 = tpu.matmul %3, %6, %cst {dimension_numbers = #tpu.dot_dimension_numbers<[1], [0], [0], [1], [0, 0, 1, 1], [], []>} : vector<52x32xf32>, vector<32x96xf32>, vector<52x96xf32> -> vector<52x96xf32>
    %c0_7 = arith.constant 0 : index
    %c0_8 = arith.constant 0 : index
    %c0_9 = arith.constant 0 : index
    %8 = vector.load %arg4[%c0_7, %c0_8, %c0_9] : memref<1x1x96xf32, #tpu.memory_space<vmem>>, vector<1x1x96xf32>
    %9 = vector.shape_cast %8 : vector<1x1x96xf32> to vector<1x96xf32>
    %10 = vector.broadcast %9 : vector<1x96xf32> to vector<52x96xf32>
    %11 = arith.addf %7, %10 : vector<52x96xf32>
    %c0_10 = arith.constant 0 : index
    %c0_11 = arith.constant 0 : index
    %c0_12 = arith.constant 0 : index
    %12 = vector.load %arg5[%c0_10, %c0_11, %c0_12] : memref<1x32x32xf32, #tpu.memory_space<vmem>>, vector<1x32x32xf32>
    %13 = vector.shape_cast %12 : vector<1x32x32xf32> to vector<32x32xf32>
    %14 = vector.extract_strided_slice %11 {offsets = [0, 0], sizes = [52, 8], strides = [1, 1]} : vector<52x96xf32> to vector<52x8xf32>
    %15 = vector.extract_strided_slice %11 {offsets = [0, 32], sizes = [52, 8], strides = [1, 1]} : vector<52x96xf32> to vector<52x8xf32>
    %16 = vector.extract_strided_slice %11 {offsets = [0, 64], sizes = [52, 8], strides = [1, 1]} : vector<52x96xf32> to vector<52x8xf32>
    %cst_13 = arith.constant dense<0.000000e+00> : vector<52x52xf32>
    %17 = tpu.matmul %14, %15, %cst_13 {dimension_numbers = #tpu.dot_dimension_numbers<[1], [1], [0], [0], [0, 0, 1, 0], [], []>} : vector<52x8xf32>, vector<52x8xf32>, vector<52x52xf32> -> vector<52x52xf32>
    %cst_14 = arith.constant 0.353553385 : f32
    %18 = vector.broadcast %cst_14 : f32 to vector<52x52xf32>
    %19 = arith.mulf %17, %18 : vector<52x52xf32>
    %20 = arith.addf %19, %4 : vector<52x52xf32>
    %cst_15 = arith.constant dense<0xFF800000> : vector<52xf32>
    %21 = vector.multi_reduction <maximumf>, %20, %cst_15 [1] : vector<52x52xf32> to vector<52xf32>
    %22 = vector.shape_cast %21 : vector<52xf32> to vector<52x1xf32>
    %23 = vector.broadcast %22 : vector<52x1xf32> to vector<52x52xf32>
    %24 = arith.subf %20, %23 : vector<52x52xf32>
    %25 = math.exp %24 : vector<52x52xf32>
    %cst_16 = arith.constant dense<0.000000e+00> : vector<52xf32>
    %26 = vector.multi_reduction <add>, %25, %cst_16 [1] : vector<52x52xf32> to vector<52xf32>
    %27 = vector.shape_cast %26 : vector<52xf32> to vector<52x1xf32>
    %28 = tpu.reciprocal %27 {approx = true} : vector<52x1xf32> -> vector<52x1xf32>
    %29 = vector.broadcast %28 : vector<52x1xf32> to vector<52x52xf32>
    %30 = arith.mulf %25, %29 : vector<52x52xf32>
    %cst_17 = arith.constant dense<0.000000e+00> : vector<52x8xf32>
    %31 = tpu.matmul %30, %16, %cst_17 {dimension_numbers = #tpu.dot_dimension_numbers<[1], [0], [0], [1], [0, 0, 1, 1], [], []>} : vector<52x52xf32>, vector<52x8xf32>, vector<52x8xf32> -> vector<52x8xf32>
    %32 = vector.extract_strided_slice %13 {offsets = [0, 0], sizes = [8, 32], strides = [1, 1]} : vector<32x32xf32> to vector<8x32xf32>
    %cst_18 = arith.constant dense<0.000000e+00> : vector<52x32xf32>
    %33 = tpu.matmul %31, %32, %cst_18 {dimension_numbers = #tpu.dot_dimension_numbers<[1], [0], [0], [1], [0, 0, 1, 1], [], []>} : vector<52x8xf32>, vector<8x32xf32>, vector<52x32xf32> -> vector<52x32xf32>
    %34 = vector.extract_strided_slice %11 {offsets = [0, 8], sizes = [52, 8], strides = [1, 1]} : vector<52x96xf32> to vector<52x8xf32>
    %35 = vector.extract_strided_slice %11 {offsets = [0, 40], sizes = [52, 8], strides = [1, 1]} : vector<52x96xf32> to vector<52x8xf32>
    %36 = vector.extract_strided_slice %11 {offsets = [0, 72], sizes = [52, 8], strides = [1, 1]} : vector<52x96xf32> to vector<52x8xf32>
    %cst_19 = arith.constant dense<0.000000e+00> : vector<52x52xf32>
    %37 = tpu.matmul %34, %35, %cst_19 {dimension_numbers = #tpu.dot_dimension_numbers<[1], [1], [0], [0], [0, 0, 1, 0], [], []>} : vector<52x8xf32>, vector<52x8xf32>, vector<52x52xf32> -> vector<52x52xf32>
    %cst_20 = arith.constant 0.353553385 : f32
    %38 = vector.broadcast %cst_20 : f32 to vector<52x52xf32>
    %39 = arith.mulf %37, %38 : vector<52x52xf32>
    %40 = arith.addf %39, %4 : vector<52x52xf32>
    %cst_21 = arith.constant dense<0xFF800000> : vector<52xf32>
    %41 = vector.multi_reduction <maximumf>, %40, %cst_21 [1] : vector<52x52xf32> to vector<52xf32>
    %42 = vector.shape_cast %41 : vector<52xf32> to vector<52x1xf32>
    %43 = vector.broadcast %42 : vector<52x1xf32> to vector<52x52xf32>
    %44 = arith.subf %40, %43 : vector<52x52xf32>
    %45 = math.exp %44 : vector<52x52xf32>
    %cst_22 = arith.constant dense<0.000000e+00> : vector<52xf32>
    %46 = vector.multi_reduction <add>, %45, %cst_22 [1] : vector<52x52xf32> to vector<52xf32>
    %47 = vector.shape_cast %46 : vector<52xf32> to vector<52x1xf32>
    %48 = tpu.reciprocal %47 {approx = true} : vector<52x1xf32> -> vector<52x1xf32>
    %49 = vector.broadcast %48 : vector<52x1xf32> to vector<52x52xf32>
    %50 = arith.mulf %45, %49 : vector<52x52xf32>
    %cst_23 = arith.constant dense<0.000000e+00> : vector<52x8xf32>
    %51 = tpu.matmul %50, %36, %cst_23 {dimension_numbers = #tpu.dot_dimension_numbers<[1], [0], [0], [1], [0, 0, 1, 1], [], []>} : vector<52x52xf32>, vector<52x8xf32>, vector<52x8xf32> -> vector<52x8xf32>
    %52 = vector.extract_strided_slice %13 {offsets = [8, 0], sizes = [8, 32], strides = [1, 1]} : vector<32x32xf32> to vector<8x32xf32>
    %cst_24 = arith.constant dense<0.000000e+00> : vector<52x32xf32>
    %53 = tpu.matmul %51, %52, %cst_24 {dimension_numbers = #tpu.dot_dimension_numbers<[1], [0], [0], [1], [0, 0, 1, 1], [], []>} : vector<52x8xf32>, vector<8x32xf32>, vector<52x32xf32> -> vector<52x32xf32>
    %54 = arith.addf %33, %53 : vector<52x32xf32>
    %55 = vector.extract_strided_slice %11 {offsets = [0, 16], sizes = [52, 8], strides = [1, 1]} : vector<52x96xf32> to vector<52x8xf32>
    %56 = vector.extract_strided_slice %11 {offsets = [0, 48], sizes = [52, 8], strides = [1, 1]} : vector<52x96xf32> to vector<52x8xf32>
    %57 = vector.extract_strided_slice %11 {offsets = [0, 80], sizes = [52, 8], strides = [1, 1]} : vector<52x96xf32> to vector<52x8xf32>
    %cst_25 = arith.constant dense<0.000000e+00> : vector<52x52xf32>
    %58 = tpu.matmul %55, %56, %cst_25 {dimension_numbers = #tpu.dot_dimension_numbers<[1], [1], [0], [0], [0, 0, 1, 0], [], []>} : vector<52x8xf32>, vector<52x8xf32>, vector<52x52xf32> -> vector<52x52xf32>
    %cst_26 = arith.constant 0.353553385 : f32
    %59 = vector.broadcast %cst_26 : f32 to vector<52x52xf32>
    %60 = arith.mulf %58, %59 : vector<52x52xf32>
    %61 = arith.addf %60, %4 : vector<52x52xf32>
    %cst_27 = arith.constant dense<0xFF800000> : vector<52xf32>
    %62 = vector.multi_reduction <maximumf>, %61, %cst_27 [1] : vector<52x52xf32> to vector<52xf32>
    %63 = vector.shape_cast %62 : vector<52xf32> to vector<52x1xf32>
    %64 = vector.broadcast %63 : vector<52x1xf32> to vector<52x52xf32>
    %65 = arith.subf %61, %64 : vector<52x52xf32>
    %66 = math.exp %65 : vector<52x52xf32>
    %cst_28 = arith.constant dense<0.000000e+00> : vector<52xf32>
    %67 = vector.multi_reduction <add>, %66, %cst_28 [1] : vector<52x52xf32> to vector<52xf32>
    %68 = vector.shape_cast %67 : vector<52xf32> to vector<52x1xf32>
    %69 = tpu.reciprocal %68 {approx = true} : vector<52x1xf32> -> vector<52x1xf32>
    %70 = vector.broadcast %69 : vector<52x1xf32> to vector<52x52xf32>
    %71 = arith.mulf %66, %70 : vector<52x52xf32>
    %cst_29 = arith.constant dense<0.000000e+00> : vector<52x8xf32>
    %72 = tpu.matmul %71, %57, %cst_29 {dimension_numbers = #tpu.dot_dimension_numbers<[1], [0], [0], [1], [0, 0, 1, 1], [], []>} : vector<52x52xf32>, vector<52x8xf32>, vector<52x8xf32> -> vector<52x8xf32>
    %73 = vector.extract_strided_slice %13 {offsets = [16, 0], sizes = [8, 32], strides = [1, 1]} : vector<32x32xf32> to vector<8x32xf32>
    %cst_30 = arith.constant dense<0.000000e+00> : vector<52x32xf32>
    %74 = tpu.matmul %72, %73, %cst_30 {dimension_numbers = #tpu.dot_dimension_numbers<[1], [0], [0], [1], [0, 0, 1, 1], [], []>} : vector<52x8xf32>, vector<8x32xf32>, vector<52x32xf32> -> vector<52x32xf32>
    %75 = arith.addf %54, %74 : vector<52x32xf32>
    %76 = vector.extract_strided_slice %11 {offsets = [0, 24], sizes = [52, 8], strides = [1, 1]} : vector<52x96xf32> to vector<52x8xf32>
    %77 = vector.extract_strided_slice %11 {offsets = [0, 56], sizes = [52, 8], strides = [1, 1]} : vector<52x96xf32> to vector<52x8xf32>
    %78 = vector.extract_strided_slice %11 {offsets = [0, 88], sizes = [52, 8], strides = [1, 1]} : vector<52x96xf32> to vector<52x8xf32>
    %cst_31 = arith.constant dense<0.000000e+00> : vector<52x52xf32>
    %79 = tpu.matmul %76, %77, %cst_31 {dimension_numbers = #tpu.dot_dimension_numbers<[1], [1], [0], [0], [0, 0, 1, 0], [], []>} : vector<52x8xf32>, vector<52x8xf32>, vector<52x52xf32> -> vector<52x52xf32>
    %cst_32 = arith.constant 0.353553385 : f32
    %80 = vector.broadcast %cst_32 : f32 to vector<52x52xf32>
    %81 = arith.mulf %79, %80 : vector<52x52xf32>
    %82 = arith.addf %81, %4 : vector<52x52xf32>
    %cst_33 = arith.constant dense<0xFF800000> : vector<52xf32>
    %83 = vector.multi_reduction <maximumf>, %82, %cst_33 [1] : vector<52x52xf32> to vector<52xf32>
    %84 = vector.shape_cast %83 : vector<52xf32> to vector<52x1xf32>
    %85 = vector.broadcast %84 : vector<52x1xf32> to vector<52x52xf32>
    %86 = arith.subf %82, %85 : vector<52x52xf32>
    %87 = math.exp %86 : vector<52x52xf32>
    %cst_34 = arith.constant dense<0.000000e+00> : vector<52xf32>
    %88 = vector.multi_reduction <add>, %87, %cst_34 [1] : vector<52x52xf32> to vector<52xf32>
    %89 = vector.shape_cast %88 : vector<52xf32> to vector<52x1xf32>
    %90 = tpu.reciprocal %89 {approx = true} : vector<52x1xf32> -> vector<52x1xf32>
    %91 = vector.broadcast %90 : vector<52x1xf32> to vector<52x52xf32>
    %92 = arith.mulf %87, %91 : vector<52x52xf32>
    %cst_35 = arith.constant dense<0.000000e+00> : vector<52x8xf32>
    %93 = tpu.matmul %92, %78, %cst_35 {dimension_numbers = #tpu.dot_dimension_numbers<[1], [0], [0], [1], [0, 0, 1, 1], [], []>} : vector<52x52xf32>, vector<52x8xf32>, vector<52x8xf32> -> vector<52x8xf32>
    %94 = vector.extract_strided_slice %13 {offsets = [24, 0], sizes = [8, 32], strides = [1, 1]} : vector<32x32xf32> to vector<8x32xf32>
    %cst_36 = arith.constant dense<0.000000e+00> : vector<52x32xf32>
    %95 = tpu.matmul %93, %94, %cst_36 {dimension_numbers = #tpu.dot_dimension_numbers<[1], [0], [0], [1], [0, 0, 1, 1], [], []>} : vector<52x8xf32>, vector<8x32xf32>, vector<52x32xf32> -> vector<52x32xf32>
    %96 = arith.addf %75, %95 : vector<52x32xf32>
    %c0_37 = arith.constant 0 : index
    %c0_38 = arith.constant 0 : index
    %c0_39 = arith.constant 0 : index
    %97 = vector.load %arg6[%c0_37, %c0_38, %c0_39] : memref<1x1x32xf32, #tpu.memory_space<vmem>>, vector<1x1x32xf32>
    %98 = vector.shape_cast %97 : vector<1x1x32xf32> to vector<1x32xf32>
    %99 = vector.broadcast %98 : vector<1x32xf32> to vector<52x32xf32>
    %100 = arith.addf %96, %99 : vector<52x32xf32>
    %101 = arith.addf %100, %3 : vector<52x32xf32>
    %c0_40 = arith.constant 0 : index
    %c0_41 = arith.constant 0 : index
    %c0_42 = arith.constant 0 : index
    %102 = vector.load %arg7[%c0_40, %c0_41, %c0_42] : memref<1x1x32xf32, #tpu.memory_space<vmem>>, vector<1x1x32xf32>
    %103 = vector.shape_cast %102 : vector<1x1x32xf32> to vector<1x32xf32>
    %c0_43 = arith.constant 0 : index
    %c0_44 = arith.constant 0 : index
    %c0_45 = arith.constant 0 : index
    %104 = vector.load %arg8[%c0_43, %c0_44, %c0_45] : memref<1x1x32xf32, #tpu.memory_space<vmem>>, vector<1x1x32xf32>
    %105 = vector.shape_cast %104 : vector<1x1x32xf32> to vector<1x32xf32>
    %cst_46 = arith.constant dense<0.000000e+00> : vector<52xf32>
    %106 = vector.multi_reduction <add>, %101, %cst_46 [1] : vector<52x32xf32> to vector<52xf32>
    %107 = vector.shape_cast %106 : vector<52xf32> to vector<52x1xf32>
    %cst_47 = arith.constant 3.200000e+01 : f32
    %108 = vector.broadcast %cst_47 : f32 to vector<52x1xf32>
    %109 = arith.divf %107, %108 : vector<52x1xf32>
    %110 = vector.broadcast %109 : vector<52x1xf32> to vector<52x32xf32>
    %111 = arith.subf %101, %110 : vector<52x32xf32>
    %112 = arith.mulf %111, %111 : vector<52x32xf32>
    %cst_48 = arith.constant dense<0.000000e+00> : vector<52xf32>
    %113 = vector.multi_reduction <add>, %112, %cst_48 [1] : vector<52x32xf32> to vector<52xf32>
    %114 = vector.shape_cast %113 : vector<52xf32> to vector<52x1xf32>
    %cst_49 = arith.constant 3.200000e+01 : f32
    %115 = vector.broadcast %cst_49 : f32 to vector<52x1xf32>
    %116 = arith.divf %114, %115 : vector<52x1xf32>
    %117 = vector.broadcast %109 : vector<52x1xf32> to vector<52x32xf32>
    %118 = arith.subf %101, %117 : vector<52x32xf32>
    %cst_50 = arith.constant 9.99999996E-13 : f32
    %119 = vector.broadcast %cst_50 : f32 to vector<52x1xf32>
    %120 = arith.addf %116, %119 : vector<52x1xf32>
    %121 = math.rsqrt %120 : vector<52x1xf32>
    %122 = vector.broadcast %121 : vector<52x1xf32> to vector<52x32xf32>
    %123 = arith.mulf %118, %122 : vector<52x32xf32>
    %124 = vector.broadcast %103 : vector<1x32xf32> to vector<52x32xf32>
    %125 = arith.mulf %123, %124 : vector<52x32xf32>
    %126 = vector.broadcast %105 : vector<1x32xf32> to vector<52x32xf32>
    %127 = arith.addf %125, %126 : vector<52x32xf32>
    %c0_51 = arith.constant 0 : index
    %c0_52 = arith.constant 0 : index
    %c0_53 = arith.constant 0 : index
    %128 = vector.load %arg9[%c0_51, %c0_52, %c0_53] : memref<1x32x64xf32, #tpu.memory_space<vmem>>, vector<1x32x64xf32>
    %129 = vector.shape_cast %128 : vector<1x32x64xf32> to vector<32x64xf32>
    %cst_54 = arith.constant dense<0.000000e+00> : vector<52x64xf32>
    %130 = tpu.matmul %127, %129, %cst_54 {dimension_numbers = #tpu.dot_dimension_numbers<[1], [0], [0], [1], [0, 0, 1, 1], [], []>} : vector<52x32xf32>, vector<32x64xf32>, vector<52x64xf32> -> vector<52x64xf32>
    %c0_55 = arith.constant 0 : index
    %c0_56 = arith.constant 0 : index
    %c0_57 = arith.constant 0 : index
    %131 = vector.load %arg10[%c0_55, %c0_56, %c0_57] : memref<1x1x64xf32, #tpu.memory_space<vmem>>, vector<1x1x64xf32>
    %132 = vector.shape_cast %131 : vector<1x1x64xf32> to vector<1x64xf32>
    %133 = vector.broadcast %132 : vector<1x64xf32> to vector<52x64xf32>
    %134 = arith.addf %130, %133 : vector<52x64xf32>
    %cst_58 = arith.constant 5.000000e-01 : f32
    %135 = vector.broadcast %cst_58 : f32 to vector<52x64xf32>
    %136 = arith.mulf %135, %134 : vector<52x64xf32>
    %cst_59 = arith.constant 0.707106769 : f32
    %137 = vector.broadcast %cst_59 : f32 to vector<52x64xf32>
    %138 = arith.mulf %134, %137 : vector<52x64xf32>
    %139 = math.erf %138 : vector<52x64xf32>
    %cst_60 = arith.constant 1.000000e+00 : f32
    %140 = vector.broadcast %cst_60 : f32 to vector<52x64xf32>
    %141 = arith.addf %140, %139 : vector<52x64xf32>
    %142 = arith.mulf %136, %141 : vector<52x64xf32>
    %c0_61 = arith.constant 0 : index
    %c0_62 = arith.constant 0 : index
    %c0_63 = arith.constant 0 : index
    %143 = vector.load %arg11[%c0_61, %c0_62, %c0_63] : memref<1x64x32xf32, #tpu.memory_space<vmem>>, vector<1x64x32xf32>
    %144 = vector.shape_cast %143 : vector<1x64x32xf32> to vector<64x32xf32>
    %cst_64 = arith.constant dense<0.000000e+00> : vector<52x32xf32>
    %145 = tpu.matmul %142, %144, %cst_64 {dimension_numbers = #tpu.dot_dimension_numbers<[1], [0], [0], [1], [0, 0, 1, 1], [], []>} : vector<52x64xf32>, vector<64x32xf32>, vector<52x32xf32> -> vector<52x32xf32>
    %c0_65 = arith.constant 0 : index
    %c0_66 = arith.constant 0 : index
    %c0_67 = arith.constant 0 : index
    %146 = vector.load %arg12[%c0_65, %c0_66, %c0_67] : memref<1x1x32xf32, #tpu.memory_space<vmem>>, vector<1x1x32xf32>
    %147 = vector.shape_cast %146 : vector<1x1x32xf32> to vector<1x32xf32>
    %148 = vector.broadcast %147 : vector<1x32xf32> to vector<52x32xf32>
    %149 = arith.addf %145, %148 : vector<52x32xf32>
    %150 = arith.addf %149, %127 : vector<52x32xf32>
    %c0_68 = arith.constant 0 : index
    %c0_69 = arith.constant 0 : index
    %c0_70 = arith.constant 0 : index
    %151 = vector.load %arg13[%c0_68, %c0_69, %c0_70] : memref<1x1x32xf32, #tpu.memory_space<vmem>>, vector<1x1x32xf32>
    %152 = vector.shape_cast %151 : vector<1x1x32xf32> to vector<1x32xf32>
    %c0_71 = arith.constant 0 : index
    %c0_72 = arith.constant 0 : index
    %c0_73 = arith.constant 0 : index
    %153 = vector.load %arg14[%c0_71, %c0_72, %c0_73] : memref<1x1x32xf32, #tpu.memory_space<vmem>>, vector<1x1x32xf32>
    %154 = vector.shape_cast %153 : vector<1x1x32xf32> to vector<1x32xf32>
    %cst_74 = arith.constant dense<0.000000e+00> : vector<52xf32>
    %155 = vector.multi_reduction <add>, %150, %cst_74 [1] : vector<52x32xf32> to vector<52xf32>
    %156 = vector.shape_cast %155 : vector<52xf32> to vector<52x1xf32>
    %cst_75 = arith.constant 3.200000e+01 : f32
    %157 = vector.broadcast %cst_75 : f32 to vector<52x1xf32>
    %158 = arith.divf %156, %157 : vector<52x1xf32>
    %159 = vector.broadcast %158 : vector<52x1xf32> to vector<52x32xf32>
    %160 = arith.subf %150, %159 : vector<52x32xf32>
    %161 = arith.mulf %160, %160 : vector<52x32xf32>
    %cst_76 = arith.constant dense<0.000000e+00> : vector<52xf32>
    %162 = vector.multi_reduction <add>, %161, %cst_76 [1] : vector<52x32xf32> to vector<52xf32>
    %163 = vector.shape_cast %162 : vector<52xf32> to vector<52x1xf32>
    %cst_77 = arith.constant 3.200000e+01 : f32
    %164 = vector.broadcast %cst_77 : f32 to vector<52x1xf32>
    %165 = arith.divf %163, %164 : vector<52x1xf32>
    %166 = vector.broadcast %158 : vector<52x1xf32> to vector<52x32xf32>
    %167 = arith.subf %150, %166 : vector<52x32xf32>
    %cst_78 = arith.constant 9.99999996E-13 : f32
    %168 = vector.broadcast %cst_78 : f32 to vector<52x1xf32>
    %169 = arith.addf %165, %168 : vector<52x1xf32>
    %170 = math.rsqrt %169 : vector<52x1xf32>
    %171 = vector.broadcast %170 : vector<52x1xf32> to vector<52x32xf32>
    %172 = arith.mulf %167, %171 : vector<52x32xf32>
    %173 = vector.broadcast %152 : vector<1x32xf32> to vector<52x32xf32>
    %174 = arith.mulf %172, %173 : vector<52x32xf32>
    %175 = vector.broadcast %154 : vector<1x32xf32> to vector<52x32xf32>
    %176 = arith.addf %174, %175 : vector<52x32xf32>
    %c0_79 = arith.constant 0 : index
    %c0_80 = arith.constant 0 : index
    %177 = vector.load %arg16[%c0_79, %c0_80] : memref<52x32xf32, #tpu.memory_space<vmem>>, vector<52x32xf32>
    tpu.vector_store %arg16[%c0_79, %c0_80], %176 {strides = array<i32>} : memref<52x32xf32, #tpu.memory_space<vmem>>, vector<52x32xf32>,
    %c1_i32 = arith.constant 1 : i32
    %178 = arith.cmpi eq, %arg0, %c1_i32 : i32
    %179 = arith.extui %178 : i1 to i32
    %c0_i32_81 = arith.constant 0 : i32
    %180 = arith.cmpi ne, %179, %c0_i32_81 : i32
    scf.if %180 {
      %c0_82 = arith.constant 0 : index
      %c0_83 = arith.constant 0 : index
      %181 = vector.load %arg15[%c0_82, %c0_83] : memref<52x32xf32, #tpu.memory_space<vmem>>, vector<52x32xf32>
      tpu.vector_store %arg15[%c0_82, %c0_83], %176 {strides = array<i32>} : memref<52x32xf32, #tpu.memory_space<vmem>>, vector<52x32xf32>,
    } else {
    }
    return
  }
  func.func @transform_0(%arg0: i32) -> (i32, i32) {
    %c0_i32 = arith.constant 0 : i32
    %c0_i32_0 = arith.constant 0 : i32
    %c0_i32_1 = arith.constant 0 : i32
    return %c0_i32, %c0_i32_0 : i32, i32
  }
  func.func @transform_1(%arg0: i32) -> (i32, i32) {
    %c0_i32 = arith.constant 0 : i32
    %c0_i32_0 = arith.constant 0 : i32
    %c0_i32_1 = arith.constant 0 : i32
    return %c0_i32, %c0_i32_0 : i32, i32
  }
  func.func @transform_2(%arg0: i32) -> (i32, i32, i32) {
    %c0_i32 = arith.constant 0 : i32
    %c0_i32_0 = arith.constant 0 : i32
    %c0_i32_1 = arith.constant 0 : i32
    return %arg0, %c0_i32, %c0_i32_0 : i32, i32, i32
  }
  func.func @transform_3(%arg0: i32) -> (i32, i32, i32) {
    %c0_i32 = arith.constant 0 : i32
    %c0_i32_0 = arith.constant 0 : i32
    %c0_i32_1 = arith.constant 0 : i32
    return %arg0, %c0_i32, %c0_i32_0 : i32, i32, i32
  }
  func.func @transform_4(%arg0: i32) -> (i32, i32, i32) {
    %c0_i32 = arith.constant 0 : i32
    %c0_i32_0 = arith.constant 0 : i32
    %c0_i32_1 = arith.constant 0 : i32
    return %arg0, %c0_i32, %c0_i32_0 : i32, i32, i32
  }
  func.func @transform_5(%arg0: i32) -> (i32, i32, i32) {
    %c0_i32 = arith.constant 0 : i32
    %c0_i32_0 = arith.constant 0 : i32
    %c0_i32_1 = arith.constant 0 : i32
    return %arg0, %c0_i32, %c0_i32_0 : i32, i32, i32
  }
  func.func @transform_6(%arg0: i32) -> (i32, i32, i32) {
    %c0_i32 = arith.constant 0 : i32
    %c0_i32_0 = arith.constant 0 : i32
    %c0_i32_1 = arith.constant 0 : i32
    return %arg0, %c0_i32, %c0_i32_0 : i32, i32, i32
  }
  func.func @transform_7(%arg0: i32) -> (i32, i32, i32) {
    %c0_i32 = arith.constant 0 : i32
    %c0_i32_0 = arith.constant 0 : i32
    %c0_i32_1 = arith.constant 0 : i32
    return %arg0, %c0_i32, %c0_i32_0 : i32, i32, i32
  }
  func.func @transform_8(%arg0: i32) -> (i32, i32, i32) {
    %c0_i32 = arith.constant 0 : i32
    %c0_i32_0 = arith.constant 0 : i32
    %c0_i32_1 = arith.constant 0 : i32
    return %arg0, %c0_i32, %c0_i32_0 : i32, i32, i32
  }
  func.func @transform_9(%arg0: i32) -> (i32, i32, i32) {
    %c0_i32 = arith.constant 0 : i32
    %c0_i32_0 = arith.constant 0 : i32
    %c0_i32_1 = arith.constant 0 : i32
    return %arg0, %c0_i32, %c0_i32_0 : i32, i32, i32
  }
  func.func @transform_10(%arg0: i32) -> (i32, i32, i32) {
    %c0_i32 = arith.constant 0 : i32
    %c0_i32_0 = arith.constant 0 : i32
    %c0_i32_1 = arith.constant 0 : i32
    return %arg0, %c0_i32, %c0_i32_0 : i32, i32, i32
  }
  func.func @transform_11(%arg0: i32) -> (i32, i32, i32) {
    %c0_i32 = arith.constant 0 : i32
    %c0_i32_0 = arith.constant 0 : i32
    %c0_i32_1 = arith.constant 0 : i32
    return %arg0, %c0_i32, %c0_i32_0 : i32, i32, i32
  }
  func.func @transform_12(%arg0: i32) -> (i32, i32, i32) {
    %c0_i32 = arith.constant 0 : i32
    %c0_i32_0 = arith.constant 0 : i32
    %c0_i32_1 = arith.constant 0 : i32
    return %arg0, %c0_i32, %c0_i32_0 : i32, i32, i32
  }
  func.func @transform_13(%arg0: i32) -> (i32, i32, i32) {
    %c0_i32 = arith.constant 0 : i32
    %c0_i32_0 = arith.constant 0 : i32
    %c0_i32_1 = arith.constant 0 : i32
    return %arg0, %c0_i32, %c0_i32_0 : i32, i32, i32
  }
  func.func @transform_14(%arg0: i32) -> (i32, i32) {
    %c0_i32 = arith.constant 0 : i32
    %c0_i32_0 = arith.constant 0 : i32
    %c0_i32_1 = arith.constant 0 : i32
    return %c0_i32, %c0_i32_0 : i32, i32
  }
}

</mosaic_0001>

<bundles_post_ra>
// kernel: eq.8
= control target key start
LH: loop header
LB: loop body
LE: loop exit
PB: predicated region body
PF: predicated region fallthrough
CT: control target
= control target key end

     0   :  { %vm7_vm0 = vcmask 105472   ;;  %s37_s8 = smov 13   ;;  %s38_s9 = smov 26   ;;  %vm13_vm1 = vcmask 425272   ;;  %vm19_vm2 = vcmask 318672   ;;  %vm25_vm3 = vcmask 212072   ;;  %s55_s0 = inlined_call_operand.vmem [shape: s32[4,13], index: 0, kind: input, shape index: {}]   ;;  %s56_s1 = inlined_call_operand.vmem [shape: s32[52], index: 1, kind: output, shape index: {}]  }
   0x1   :  { %v4_v0 = vld [vmem:[%s55_s0] sm:$0xf]  ;;  %s36_s0 = smov 39  }
   0x2   :  { %5 = vst [vmem:[#allocation1] sm:$0xf] %v4_v0 }
   0x9   :  { %v10_v1 = vld [vmem:[#allocation1 + $0x3] sm:$0x1]   ;;  %v22_v2 = vld [vmem:[#allocation1 + $0x1] sm:$0x1]   ;;  %v6_v3 = vld [vmem:[#allocation1] sm:$0x1]  }
   0xa   :  { %11 = vrot.lane.b32.xlu0 %v10_v1, %s36_s0  ;;  %23 = vrot.lane.b32.xlu1 %v22_v2, %s37_s8  ;;  %v16_v4 = vld [vmem:[#allocation1 + $0x2] sm:$0x1]   ;;  %8 = vst.msk [vmem:[#allocation0] sm:$0x1] %vm7_vm0, %v6_v3  }
   0xe   :  { %17 = vrot.lane.b32.xlu0 %v16_v4, %s38_s9 }
  0x7c   :  { %v12_v5 = vpop.permute.xlu0 %11   ;;  %v24_v6 = vpop.permute.xlu1 %23  }
  0x7d   :  { %14 = vst.msk [vmem:[#allocation0] sm:$0x1] %vm13_vm1, %v12_v5  }
  0x80   :  { %v18_v7 = vpop.permute.xlu0 %17  }
  0x81   :  { %20 = vst.msk [vmem:[#allocation0] sm:$0x1] %vm19_vm2, %v18_v7  }
  0x82   :  { %26 = vst.msk [vmem:[#allocation0] sm:$0x1] %vm25_vm3, %v24_v6  }
  0x89   :  { %v30_v8 = vld [vmem:[#allocation0] sm:$0x1] }
  0x8a   :  { %32 = vst [vmem:[%s56_s1] sm:$0x1] %v30_v8 }

// kernel: mul.16
= control target key start
LH: loop header
LB: loop body
LE: loop exit
PB: predicated region body
PF: predicated region fallthrough
CT: control target
= control target key end

     0   :  { %vm7_vm0 = vcmask 31744   ;;  %s37_s8 = smov 4   ;;  %s38_s9 = smov 8   ;;  %vm13_vm1 = vcmask 130144   ;;  %vm19_vm2 = vcmask 97344   ;;  %vm25_vm3 = vcmask 64544   ;;  %s55_s0 = inlined_call_operand.vmem [shape: f32[4,4], index: 0, kind: input, shape index: {}]   ;;  %s56_s1 = inlined_call_operand.vmem [shape: f32[16], index: 1, kind: output, shape index: {}]  }
   0x1   :  { %v4_v0 = vld [vmem:[%s55_s0] sm:$0xf]  ;;  %s36_s0 = smov 12  }
   0x2   :  { %5 = vst [vmem:[#allocation1] sm:$0xf] %v4_v0 }
   0x9   :  { %v10_v1 = vld [vmem:[#allocation1 + $0x3] sm:$0x1]   ;;  %v22_v2 = vld [vmem:[#allocation1 + $0x1] sm:$0x1]   ;;  %v6_v3 = vld [vmem:[#allocation1] sm:$0x1]  }
   0xa   :  { %11 = vrot.lane.b32.xlu0 %v10_v1, %s36_s0  ;;  %23 = vrot.lane.b32.xlu1 %v22_v2, %s37_s8  ;;  %v16_v4 = vld [vmem:[#allocation1 + $0x2] sm:$0x1]   ;;  %8 = vst.msk [vmem:[#allocation0] sm:$0x1] %vm7_vm0, %v6_v3  }
   0xe   :  { %17 = vrot.lane.b32.xlu0 %v16_v4, %s38_s9 }
  0x7c   :  { %v12_v5 = vpop.permute.xlu0 %11   ;;  %v24_v6 = vpop.permute.xlu1 %23  }
  0x7d   :  { %14 = vst.msk [vmem:[#allocation0] sm:$0x1] %vm13_vm1, %v12_v5  }
  0x80   :  { %v18_v7 = vpop.permute.xlu0 %17  }
  0x81   :  { %20 = vst.msk [vmem:[#allocation0] sm:$0x1] %vm19_vm2, %v18_v7  }
  0x82   :  { %26 = vst.msk [vmem:[#allocation0] sm:$0x1] %vm25_vm3, %v24_v6  }
  0x89   :  { %v30_v8 = vld [vmem:[#allocation0] sm:$0x1] }
  0x8a   :  { %32 = vst [vmem:[%s56_s1] sm:$0x1] %v30_v8 }

// kernel: model_forward.3
= control target key start
LH: loop header
LB: loop body
LE: loop exit
PB: predicated region body
PF: predicated region fallthrough
CT: control target
= control target key end

     0   :  { %vm151_vm0 = vcmask 392192   ;;  %vm41_vm1 = vcmask 261120   ;;  %vm54_vm2 = vcmask 257024   ;;  %s543_s3 = inlined_call_operand.vmem [shape: f32[48,32], index: 3, kind: input, shape index: {}]   ;;  %s544_s1 = inlined_call_operand.vmem [shape: f32[16,48], index: 1, kind: input, shape index: {}]   ;;  %s545_s0 = inlined_call_operand.vmem [shape: f32[36,32], index: 0, kind: input, shape index: {}]   ;;  %s546_s4 = inlined_call_operand.vmem [shape: f32[1,32], index: 4, kind: input, shape index: {}]   ;;  %s547_s2 = inlined_call_operand.vmem [shape: f32[16,32], index: 2, kind: input, shape index: {}]   ;;  %s548_s5 = inlined_call_operand.vmem [shape: f32[1,32], index: 5, kind: input, shape index: {}]   ;;  %s549_s6 = inlined_call_operand.vmem [shape: f32[1,32], index: 6, kind: input, shape index: {}]   ;;  %s550_s9 = inlined_call_operand.vmem [shape: f32[36,32], index: 9, kind: output, shape index: {0}]   ;;  %s551_s7 = inlined_call_operand.vmem [shape: f32[1,32], index: 7, kind: input, shape index: {}]   ;;  %s552_s8 = inlined_call_operand.vmem [shape: f32[1,32], index: 8, kind: input, shape index: {}]   ;;  %s553_s10 = inlined_call_operand.vmem [shape: f32[16,32], index: 10, kind: output, shape index: {1}]  }
   0x1   :  { %v138_v0 = vld [vmem:[%s543_s3] sm:$0xff]  ;;  %v139_v1 = vld [vmem:[%s543_s3 + $0x8] sm:$0xff]  ;;  %v140_v2 = vld [vmem:[%s543_s3 + $0x10] sm:$0xff] }
   0x2   :  { %v323_v3 = vpack.c.bf16 %v139_v1, %v138_v0  ;;  %v141_v4 = vld [vmem:[%s543_s3 + $0x18] sm:$0xff]  ;;  %v142_v5 = vld [vmem:[%s543_s3 + $0x20] sm:$0xff]  ;;  %v143_v7 = vld [vmem:[%s543_s3 + $0x28] sm:$0xff] }
   0x3   :  { %v327_v6 = vpack.c.bf16 %v141_v4, %v140_v2  ;;  %v136_v8 = vld [vmem:[%s544_s1] sm:$0xff]  ;;  %v36_v11 = vld [vmem:[%s545_s0 + $0x10] sm:$0xff]  ;;  %v35_v12 = vld [vmem:[%s545_s0 + $0x8] sm:$0xff]  ;;  %v331_v15 = vpack.c.bf16 %v143_v7, %v142_v5 }
   0x4   :  { %v34_v9 = vld [vmem:[%s545_s0] sm:$0xff]  ;;  %324 = vmatprep.subr.bf16.mxu0 %v323_v3  ;;  %320 = vmatprep.mubr.msk.f32.mxu0 %vm151_vm0, %v136_v8  ;;  %v37_v13 = vld [vmem:[%s545_s0 + $0x18] sm:$0xff]  ;;  %v48_v14 = vsel %vm41_vm1, %v36_v11, 0.0  ;;  %v45_v16 = vsel %vm41_vm1, %v35_v12, 0.0  ;;  %v137_v20 = vld [vmem:[%s544_s1 + $0x8] sm:$0xff] }
   0x5   :  { %v42_v10 = vsel %vm41_vm1, %v34_v9, 0.0  ;;  %326 = vmatpush3.bf16.msra.mxu0 %v323_v3  ;;  %49 = vadd.xlane.f32.xlu1 %v48_v14  ;;  %v51_v17 = vsel %vm41_vm1, %v37_v13, 0.0  ;;  %v38_v18 = vld [vmem:[%s545_s0 + $0x20] sm:$0xf]  ;;  %v236_v36 = vld [vmem:[%s547_s2 + $0x8] sm:$0xff] }
   0x6   :  { %43 = vadd.xlane.f32.xlu0 %v42_v10  ;;  %328 = vmatprep.subr.bf16.mxu0 %v327_v6  ;;  %v55_v19 = vsel %vm54_vm2, %v38_v18, 0.0  ;;  %v295_v25 = vld [vmem:[%s546_s4] ss:$0 sm:$0xff] }
   0x7   :  { %v235_v38 = vld [vmem:[%s547_s2] sm:$0xff] }
   0x9   :  { %330 = vmatpush3.bf16.msra.mxu0 %v327_v6  ;;  %52 = vadd.xlane.f32.xlu1 %v51_v17 }
   0xa   :  { %46 = vadd.xlane.f32.xlu0 %v45_v16  ;;  %332 = vmatprep.subr.bf16.mxu0 %v331_v15 }
   0xd   :  { %334 = vmatpush3.bf16.msra.mxu0 %v331_v15 }
   0xe   :  { %56 = vadd.xlane.f32.xlu0 %v55_v19 }
  0x10   :  { %321 = vmatmul.mubr.msk.f32.vlgmr.msra.gmra.mrb[0].mxu0 %vm151_vm0, %v137_v20 }
  0x92   :  { %v50_v22 = vpop.xlane.xlu1 %49 }
  0x93   :  { %v44_v21 = vpop.xlane.xlu0 %43  ;;  %v61_v35 = vmul.f32 0.03125, %v50_v22 }
  0x94   :  { %v59_v26 = vmul.f32 0.03125, %v44_v21  ;;  %v293_v21 = vld [vmem:[%s548_s5] ss:$0 sm:$0xff] }
  0x95   :  { %v467_v44 = vsub.f32 %v36_v11, %v61_v35 }
  0x96   :  { %v53_v27 = vpop.xlane.xlu1 %52  ;;  %v455_v33 = vsub.f32 %v34_v9, %v59_v26 }
  0x97   :  { %v47_v23 = vpop.xlane.xlu0 %46  ;;  %v62_v32 = vmul.f32 0.03125, %v53_v27  ;;  %v71_v54 = vmul.f32 %v467_v44, %v467_v44 }
  0x98   :  { %v60_v24 = vmul.f32 0.03125, %v47_v23  ;;  %v69_v46 = vmul.f32 %v455_v33, %v455_v33 }
  0x99   :  { %v463_v41 = vsub.f32 %v37_v13, %v62_v32  ;;  %v80_v56 = vsel %vm41_vm1, %v71_v54, 0.0 }
  0x9a   :  { %v453_v31 = vsub.f32 %v35_v12, %v60_v24  ;;  %v74_v52 = vsel %vm41_vm1, %v69_v46, 0.0  ;;  %v294_v24 = vld [vmem:[%s549_s6] ss:$0 sm:$0xff] }
  0x9b   :  { %v57_v39 = vpop.xlane.xlu0 %56  ;;  %v72_v51 = vmul.f32 %v463_v41, %v463_v41 }
  0x9c   :  { %v70_v43 = vmul.f32 %v453_v31, %v453_v31  ;;  %v63_v47 = vmul.f32 0.03125, %v57_v39 }
  0x9d   :  { %v83_v55 = vsel %vm41_vm1, %v72_v51, 0.0 }
  0x9e   :  { %v77_v50 = vsel %vm41_vm1, %v70_v43, 0.0  ;;  %v477_v53 = vsub.f32 %v38_v18, %v63_v47 }
  0xa0   :  { %v73_v57 = vmul.f32 %v477_v53, %v477_v53 }
  0xa2   :  { %v86_v58 = vsel %vm54_vm2, %v73_v57, 0.0 }
  0xe3   :  { %v322_v28 = vpop.f32.mrb[0].mxu0 }
  0xe4   :  { %v230_v29 = vadd.f32 %v322_v28, %v295_v25  ;;  %v224_v30 = vpop.f32.mrb[1].mxu0 }
  0xe5   :  { %v225_v34 = vadd.f32 %v295_v25, %v224_v30 }
  0xe6   :  { %v234_v37 = vmax.f32 %v230_v29, 0.0 }
  0xe7   :  { %v233_v40 = vmax.f32 %v225_v34, 0.0 }
  0xe8   :  { %v238_v42 = vadd.f32 %v236_v36, %v234_v37 }
  0xe9   :  { %v237_v45 = vadd.f32 %v235_v38, %v233_v40 }
  0xea   :  { %v244_v48 = vsel %vm41_vm1, %v238_v42, 0.0 }
  0xeb   :  { %245 = vadd.xlane.f32.xlu0 %v244_v48  ;;  %v241_v49 = vsel %vm41_vm1, %v237_v45, 0.0 }
  0xec   :  { %242 = vadd.xlane.f32.xlu1 %v241_v49  ;;  %v298_v49 = vld [vmem:[%s551_s7] ss:$0 sm:$0xff] }
  0xef   :  { %78 = vadd.xlane.f32.xlu0 %v77_v50 }
  0xf0   :  { %75 = vadd.xlane.f32.xlu1 %v74_v52  ;;  %v299_v52 = vld [vmem:[%s552_s8] ss:$0 sm:$0xff] }
  0xf3   :  { %84 = vadd.xlane.f32.xlu0 %v83_v55 }
  0xf4   :  { %81 = vadd.xlane.f32.xlu1 %v80_v56 }
  0xf8   :  { %87 = vadd.xlane.f32.xlu1 %v86_v58 }
 0x178   :  { %v246_v59 = vpop.xlane.xlu0 %245 }
 0x179   :  { %v248_v60 = vmul.f32 0.03125, %v246_v59  ;;  %v243_v61 = vpop.xlane.xlu1 %242 }
 0x17a   :  { %v247_v62 = vmul.f32 0.03125, %v243_v61 }
 0x17b   :  { %v486_v63 = vsub.f32 %v238_v42, %v248_v60 }
 0x17c   :  { %v488_v0 = vsub.f32 %v237_v45, %v247_v62  ;;  %v79_v1 = vpop.xlane.xlu0 %78 }
 0x17d   :  { %v90_v2 = vmul.f32 0.03125, %v79_v1  ;;  %v76_v3 = vpop.xlane.xlu1 %75  ;;  %v252_v4 = vmul.f32 %v486_v63, %v486_v63 }
 0x17e   :  { %v89_v5 = vmul.f32 0.03125, %v76_v3  ;;  %v251_v6 = vmul.f32 %v488_v0, %v488_v0 }
 0x17f   :  { %v95_v7 = vadd.f32 1e-12, %v90_v2  ;;  %v256_v8 = vsel %vm41_vm1, %v252_v4, 0.0 }
 0x180   :  { %v94_v9 = vadd.f32 1e-12, %v89_v5  ;;  %257 = vadd.xlane.f32.xlu1 %v256_v8  ;;  %v85_v10 = vpop.xlane.xlu0 %84  ;;  %v253_v11 = vsel %vm41_vm1, %v251_v6, 0.0 }
 0x181   :  { %335 = vrsqrt.f32 %v95_v7  ;;  %v92_v12 = vmul.f32 0.03125, %v85_v10  ;;  %v82_v13 = vpop.xlane.xlu1 %81  ;;  %254 = vadd.xlane.f32.xlu0 %v253_v11 }
 0x182   :  { %337 = vrsqrt.f32 %v94_v9  ;;  %v91_v14 = vmul.f32 0.03125, %v82_v13 }
 0x183   :  { %v97_v15 = vadd.f32 1e-12, %v92_v12 }
 0x184   :  { %v96_v16 = vadd.f32 1e-12, %v91_v14 }
 0x185   :  { %339 = vrsqrt.f32 %v97_v15  ;;  %v88_v17 = vpop.xlane.xlu1 %87 }
 0x186   :  { %341 = vrsqrt.f32 %v96_v16  ;;  %v93_v18 = vmul.f32 0.03125, %v88_v17 }
 0x188   :  { %v98_v19 = vadd.f32 1e-12, %v93_v18 }
 0x18a   :  { %343 = vrsqrt.f32 %v98_v19 }
 0x18b   :  { %v336_v20 = vpop.eup %335 }
 0x18c   :  { %v338_v22 = vpop.eup %337  ;;  %v105_v23 = vmul.f32 %v336_v20, %v453_v31 }
 0x18d   :  { %v104_v25 = vmul.f32 %v338_v22, %v455_v33 }
 0x18e   :  { %v116_v26 = vmul.f32 %v293_v21, %v105_v23 }
 0x18f   :  { %v340_v27 = vpop.eup %339  ;;  %v115_v28 = vmul.f32 %v293_v21, %v104_v25 }
 0x190   :  { %v342_v29 = vpop.eup %341  ;;  %v127_v30 = vadd.f32 %v294_v24, %v116_v26  ;;  %v107_v32 = vmul.f32 %v340_v27, %v463_v41 }
 0x191   :  { %v126_v34 = vadd.f32 %v294_v24, %v115_v28  ;;  %v106_v35 = vmul.f32 %v342_v29, %v467_v44 }
 0x192   :  { %132 = vst.msk [vmem:[%s550_s9 + $0x8] sm:$0xff] %vm41_vm1, %v127_v30  ;;  %v118_v31 = vmul.f32 %v293_v21, %v107_v32 }
 0x193   :  { %131 = vst.msk [vmem:[%s550_s9] sm:$0xff] %vm41_vm1, %v126_v34  ;;  %v117_v33 = vmul.f32 %v293_v21, %v106_v35 }
 0x194   :  { %v344_v36 = vpop.eup %343  ;;  %v129_v37 = vadd.f32 %v294_v24, %v118_v31 }
 0x195   :  { %v128_v38 = vadd.f32 %v294_v24, %v117_v33  ;;  %v108_v39 = vmul.f32 %v344_v36, %v477_v53 }
 0x196   :  { %134 = vst.msk [vmem:[%s550_s9 + $0x18] sm:$0xff] %vm41_vm1, %v129_v37 }
 0x197   :  { %133 = vst.msk [vmem:[%s550_s9 + $0x10] sm:$0xff] %vm41_vm1, %v128_v38  ;;  %v119_v40 = vmul.f32 %v293_v21, %v108_v39 }
 0x199   :  { %v130_v41 = vadd.f32 %v294_v24, %v119_v40 }
 0x19b   :  { %135 = vst.msk [vmem:[%s550_s9 + $0x20] sm:$0xf] %vm54_vm2, %v130_v41 }
 0x20d   :  { %v258_v42 = vpop.xlane.xlu1 %257 }
 0x20e   :  { %v260_v43 = vmul.f32 0.03125, %v258_v42  ;;  %v255_v44 = vpop.xlane.xlu0 %254 }
 0x20f   :  { %v259_v45 = vmul.f32 0.03125, %v255_v44 }
 0x210   :  { %v262_v46 = vadd.f32 1e-12, %v260_v43 }
 0x211   :  { %v261_v47 = vadd.f32 1e-12, %v259_v45 }
 0x212   :  { %345 = vrsqrt.f32 %v262_v46 }
 0x213   :  { %347 = vrsqrt.f32 %v261_v47 }
 0x21c   :  { %v346_v48 = vpop.eup %345 }
 0x21d   :  { %v348_v50 = vpop.eup %347  ;;  %v266_v51 = vmul.f32 %v346_v48, %v486_v63 }
 0x21e   :  { %v265_v53 = vmul.f32 %v348_v50, %v488_v0 }
 0x21f   :  { %v274_v54 = vmul.f32 %v298_v49, %v266_v51 }
 0x220   :  { %v273_v55 = vmul.f32 %v298_v49, %v265_v53 }
 0x221   :  { %v282_v56 = vadd.f32 %v299_v52, %v274_v54 }
 0x222   :  { %v281_v57 = vadd.f32 %v299_v52, %v273_v55 }
 0x223   :  { %284 = vst.msk [vmem:[%s553_s10 + $0x8] sm:$0xff] %vm41_vm1, %v282_v56 }
 0x224   :  { %283 = vst.msk [vmem:[%s553_s10] sm:$0xff] %vm41_vm1, %v281_v57 }

// kernel: neg.1
= control target key start
LH: loop header
LB: loop body
LE: loop exit
PB: predicated region body
PF: predicated region fallthrough
CT: control target
= control target key end

     0   :  { %s24_s0 = inlined_call_operand.vmem [shape: f32[16], index: 0, kind: input, shape index: {}]   ;;  %s25_s1 = inlined_call_operand.vmem [shape: f32[16], index: 1, kind: output, shape index: {}]  }
   0x1   :  { %v2_v0 = vld [vmem:[%s24_s0] sm:$0x1] }
   0x2   :  { %v5_v1 = vxor.u32 2147483648, %v2_v0 }
   0x4   :  { %7 = vst [vmem:[%s25_s1] sm:$0x1] %v5_v1 }

// kernel: model_forward.5
= control target key start
LH: loop header
LB: loop body
LE: loop exit
PB: predicated region body
PF: predicated region fallthrough
CT: control target
= control target key end

     0   :  { %vm76_vm0 = vcmask 261120   ;;  %vm616_vm1 = vcmask 392192   ;;  %vm1008_vm3 = vmmov 0   ;;  %vm792_vm4 = vcmask 3072   ;;  %s1301_s4 = inlined_call_operand.vmem [shape: f32[32,32], index: 4, kind: input, shape index: {}]   ;;  %s1302_s0 = inlined_call_operand.vmem [shape: f32[32,32], index: 0, kind: input, shape index: {}]   ;;  %s1303_s10 = inlined_call_operand.vmem [shape: f32[32,32], index: 10, kind: input, shape index: {}]   ;;  %s1304_s1 = inlined_call_operand.vmem [shape: f32[16,32], index: 1, kind: input, shape index: {}]   ;;  %s1305_s5 = inlined_call_operand.vmem [shape: f32[1,32], index: 5, kind: input, shape index: {}]   ;;  %s1306_s11 = inlined_call_operand.vmem [shape: f32[1,32], index: 11, kind: input, shape index: {}]   ;;  %s1307_s8 = inlined_call_operand.vmem [shape: f32[32,128], index: 8, kind: input, shape index: {}]   ;;  %s1308_s14 = inlined_call_operand.vmem [shape: f32[32,48], index: 14, kind: input, shape index: {}]   ;;  %s1309_s6 = inlined_call_operand.vmem [shape: f32[1,32], index: 6, kind: input, shape index: {}]   ;;  %s1310_s7 = inlined_call_operand.vmem [shape: f32[1,32], index: 7, kind: input, shape index: {}]   ;;  %s1311_s12 = inlined_call_operand.vmem [shape: f32[1,32], index: 12, kind: input, shape index: {}]   ;;  %s1312_s13 = inlined_call_operand.vmem [shape: f32[1,32], index: 13, kind: input, shape index: {}]   ;;  %s1313_s15 = inlined_call_operand.vmem [shape: f32[32,1], index: 15, kind: input, shape index: {}]   ;;  %s1314_s3 = inlined_call_operand.vmem [shape: f32[16,48], index: 3, kind: input, shape index: {}]   ;;  %s1315_s2 = inlined_call_operand.vmem [shape: f32[4,32], index: 2, kind: input, shape index: {}]   ;;  %s1316_s16 = inlined_call_operand.<no memory space> [shape: f32[1,1], index: 16, kind: input, shape index: {}]   ;;  %s1317_s9 = inlined_call_operand.vmem [shape: f32[1,128], index: 9, kind: input, shape index: {}]   ;;  %s1318_s17 = inlined_call_operand.vmem [shape: f32[32,128], index: 17, kind: output, shape index: {0}]   ;;  %s1319_s19 = inlined_call_operand.vmem [shape: f32[4,1], index: 19, kind: output, shape index: {2}]   ;;  %s1320_s18 = inlined_call_operand.vmem [shape: f32[16,16], index: 18, kind: output, shape index: {1}]  }
   0x1   :  { %1325 = sst [smem:[#allocation3_spill]] %s1301_s4  ;;  %v806_v18 = vld [vmem:[%s1305_s5] ss:$0 sm:$0xff]  ;;  %vm969_vm2 = vmpackc.low %vm616_vm1, %vm616_vm1  ;;  %vm704_vm5 = vcmask 130048  }
   0x2   :  { %1326 = sst [smem:[#allocation4_spill]] %s1302_s0  ;;  %s1329_s20 = sld [smem:[#allocation3_spill]]  ;;  %v818_v29 = vld [vmem:[%s1306_s11] ss:$0 sm:$0xff] }
   0x3   :  { %1327 = sst [smem:[#allocation5_spill]] %s1303_s10  ;;  %s1330_s26 = sld [smem:[#allocation4_spill]] }
   0x4   :  { %1328 = sst [smem:[#allocation6_spill]] %s1304_s1  ;;  %s1331_s29 = sld [smem:[#allocation5_spill]] }
   0x5   :  { %s1332_s4 = sld [smem:[#allocation6_spill]] }
   0x8   :  { %v65_v0 = vld [vmem:[%s1329_s20] sm:$0xff]  ;;  %v66_v1 = vld [vmem:[%s1329_s20 + $0x8] sm:$0xff]  ;;  %v67_v2 = vld [vmem:[%s1329_s20 + $0x10] sm:$0xff] }
   0x9   :  { %v936_v3 = vpack.c.bf16 %v66_v1, %v65_v0  ;;  %v68_v4 = vld [vmem:[%s1329_s20 + $0x18] sm:$0xff]  ;;  %v61_v5 = vld [vmem:[%s1330_s26] sm:$0xff]  ;;  %v62_v12 = vld [vmem:[%s1330_s26 + $0x8] sm:$0xff] }
   0xa   :  { %v940_v6 = vpack.c.bf16 %v68_v4, %v67_v2  ;;  %876 = vmatprep.mubr.msk.f32.mxu0 %vm76_vm0, %v61_v5  ;;  %v383_v7 = vld [vmem:[%s1331_s29] sm:$0xff]  ;;  %v384_v8 = vld [vmem:[%s1331_s29 + $0x8] sm:$0xff]  ;;  %v385_v10 = vld [vmem:[%s1331_s29 + $0x10] sm:$0xff] }
   0xb   :  { %937 = vmatprep.subr.bf16.mxu0 %v936_v3  ;;  %v952_v9 = vpack.c.bf16 %v384_v8, %v383_v7  ;;  %v386_v11 = vld [vmem:[%s1331_s29 + $0x18] sm:$0xff]  ;;  %v63_v13 = vld [vmem:[%s1330_s26 + $0x10] sm:$0xff]  ;;  %v381_v16 = vld [vmem:[%s1332_s4] sm:$0xff] }
   0xc   :  { %939 = vmatpush3.bf16.msra.mxu0 %v936_v3  ;;  %v956_v14 = vpack.c.bf16 %v386_v11, %v385_v10  ;;  %v64_v15 = vld [vmem:[%s1330_s26 + $0x18] sm:$0xff]  ;;  %v382_v17 = vld [vmem:[%s1332_s4 + $0x8] sm:$0xff] }
   0xd   :  { %941 = vmatprep.subr.bf16.mxu0 %v940_v6 }
  0x10   :  { %943 = vmatpush3.bf16.msra.mxu0 %v940_v6 }
  0x11   :  { %953 = vmatprep.subr.bf16.mxu0 %v952_v9 }
  0x13   :  { %877 = vmatmul.mubr.msk.f32.vlgmr.msra.gmra.mrb[0].mxu0 %vm76_vm0, %v62_v12 }
  0x14   :  { %955 = vmatpush3.bf16.msra.mxu0 %v952_v9  ;;  %879 = vmatprep.mubr.msk.f32.mxu0 %vm76_vm0, %v63_v13 }
  0x15   :  { %957 = vmatprep.subr.bf16.mxu0 %v956_v14 }
  0x17   :  { %880 = vmatmul.mubr.msk.f32.gmra.mrb[2].mxu0 %vm76_vm0, %v64_v15 }
  0x18   :  { %959 = vmatpush3.bf16.msra.mxu0 %v956_v14  ;;  %904 = vmatprep.mubr.msk.f32.mxu0 %vm76_vm0, %v381_v16 }
  0x1b   :  { %905 = vmatmul.mubr.msk.f32.vlgmr.msra.gmra.mrb[4].mxu0 %vm76_vm0, %v382_v17 }
  0xe6   :  { %v878_v19 = vpop.f32.mrb[0].mxu0 }
  0xe7   :  { %v161_v20 = vadd.f32 %v878_v19, %v806_v18  ;;  %v155_v21 = vpop.f32.mrb[1].mxu0 }
  0xe8   :  { %v156_v22 = vadd.f32 %v806_v18, %v155_v21 }
  0xe9   :  { %v179_v23 = vmul.f32 0.70710677, %v161_v20  ;;  %v175_v43 = vmul.f32 0.5, %v161_v20 }
  0xea   :  { %v178_v24 = vmul.f32 0.70710677, %v156_v22  ;;  %v881_v25 = vpop.f32.mrb[2].mxu0  ;;  %v174_v41 = vmul.f32 0.5, %v156_v22 }
  0xeb   :  { %983 = verf.f32 %v179_v23  ;;  %v171_v26 = vadd.f32 %v881_v25, %v806_v18  ;;  %v165_v27 = vpop.f32.mrb[3].mxu0 }
  0xec   :  { %985 = verf.f32 %v178_v24  ;;  %v166_v28 = vadd.f32 %v806_v18, %v165_v27 }
  0xed   :  { %v181_v30 = vmul.f32 0.70710677, %v171_v26  ;;  %v177_v53 = vmul.f32 0.5, %v171_v26 }
  0xee   :  { %v180_v31 = vmul.f32 0.70710677, %v166_v28  ;;  %v906_v32 = vpop.f32.mrb[4].mxu0  ;;  %v176_v48 = vmul.f32 0.5, %v166_v28 }
  0xef   :  { %987 = verf.f32 %v181_v30  ;;  %v472_v33 = vadd.f32 %v906_v32, %v818_v29  ;;  %v466_v34 = vpop.f32.mrb[5].mxu0 }
  0xf0   :  { %989 = verf.f32 %v180_v31  ;;  %v467_v35 = vadd.f32 %v818_v29, %v466_v34  ;;  %v269_v34 = vld [vmem:[%s1307_s8] sm:$0xff] }
  0xf1   :  { %v478_v36 = vmul.f32 0.70710677, %v472_v33  ;;  %v476_v62 = vmul.f32 0.5, %v472_v33 }
  0xf2   :  { %v477_v37 = vmul.f32 0.70710677, %v467_v35  ;;  %v475_v56 = vmul.f32 0.5, %v467_v35  ;;  %v270_v35 = vld [vmem:[%s1307_s8 + $0x8] sm:$0xff] }
  0xf3   :  { %991 = verf.f32 %v478_v36  ;;  %v944_v36 = vpack.c.bf16 %v270_v35, %v269_v34  ;;  %v710_v35 = vld [vmem:[%s1313_s15 + $0x10] sm:$0xff] }
  0xf4   :  { %993 = verf.f32 %v477_v37  ;;  %v271_v37 = vld [vmem:[%s1307_s8 + $0x10] sm:$0xff] }
  0xf5   :  { %v984_v38 = vpop.eup %983  ;;  %945 = vmatprep.subr.bf16.mxu1 %v944_v36 }
  0xf6   :  { %v986_v39 = vpop.eup %985  ;;  %v187_v40 = vadd.f32 1.0, %v984_v38  ;;  %947 = vmatpush3.bf16.msra.mxu1 %v944_v36  ;;  %v272_v38 = vld [vmem:[%s1307_s8 + $0x18] sm:$0xff] }
  0xf7   :  { %v186_v42 = vadd.f32 1.0, %v986_v39  ;;  %v948_v39 = vpack.c.bf16 %v272_v38, %v271_v37  ;;  %v711_v36 = vld [vmem:[%s1313_s15 + $0x18] sm:$0xff]  ;;  %v1009_v38 = vmov 0.0  }
  0xf8   :  { %v191_v47 = vmul.f32 %v187_v40, %v175_v43  ;;  %v529_v40 = vld [vmem:[%s1308_s14] sm:$0xff]  ;;  %v978_v37 = vpack.c.bf16 %v711_v36, %v710_v35 }
  0xf9   :  { %v988_v44 = vpop.eup %987  ;;  %v190_v45 = vmul.f32 %v186_v42, %v174_v41  ;;  %949 = vmatprep.subr.bf16.mxu1 %v948_v39  ;;  %v530_v41 = vld [vmem:[%s1308_s14 + $0x8] sm:$0xff] }
  0xfa   :  { %v990_v46 = vpop.eup %989  ;;  %v189_v51 = vadd.f32 1.0, %v988_v44  ;;  %v199_v57 = vsel %vm76_vm0, %v191_v47, 0.0  ;;  %951 = vmatpush3.bf16.msra.mxu1 %v948_v39  ;;  %v960_v42 = vpack.c.bf16 %v530_v41, %v529_v40  ;;  %v707_v39 = vld [vmem:[%s1315_s2] sm:$0xf]  ;;  %v25_v40 = vstv %s1316_s16 }
  0xfb   :  { %v196_v49 = vsel %vm76_vm0, %v190_v45, 0.0  ;;  %v188_v50 = vadd.f32 1.0, %v990_v46  ;;  %26 = vst [vmem:[#allocation2] sm:$0x1] %v25_v40  ;;  %v813_v41 = vld [vmem:[%s1317_s9] ss:$0 sm:$0xff] }
  0xfc   :  { %197 = vadd.xlane.f32.xlu0 %v196_v49  ;;  %v193_v59 = vmul.f32 %v189_v51, %v177_v53  ;;  %961 = vmatprep.subr.bf16.mxu1 %v960_v42 }
  0xfd   :  { %v992_v52 = vpop.eup %991  ;;  %v192_v54 = vmul.f32 %v188_v50, %v176_v48 }
  0xfe   :  { %v994_v55 = vpop.eup %993  ;;  %v482_v61 = vadd.f32 1.0, %v992_v52  ;;  %v205_v0 = vsel %vm76_vm0, %v193_v59, 0.0 }
  0xff   :  { %v202_v58 = vsel %vm76_vm0, %v192_v54, 0.0  ;;  %v481_v60 = vadd.f32 1.0, %v994_v55 }
 0x100   :  { %203 = vadd.xlane.f32.xlu1 %v202_v58  ;;  %200 = vadd.xlane.f32.xlu0 %v199_v57  ;;  %v484_v2 = vmul.f32 %v482_v61, %v476_v62  ;;  %v811_v62 = vld [vmem:[%s1309_s6] ss:$0 sm:$0xff] }
 0x101   :  { %v483_v63 = vmul.f32 %v481_v60, %v475_v56 }
 0x102   :  { %v490_v3 = vsel %vm76_vm0, %v484_v2, 0.0 }
 0x103   :  { %v487_v1 = vsel %vm76_vm0, %v483_v63, 0.0 }
 0x104   :  { %206 = vadd.xlane.f32.xlu1 %v205_v0  ;;  %488 = vadd.xlane.f32.xlu0 %v487_v1  ;;  %v812_v0 = vld [vmem:[%s1310_s7] ss:$0 sm:$0xff] }
 0x108   :  { %491 = vadd.xlane.f32.xlu1 %v490_v3 }
 0x189   :  { %v198_v4 = vpop.xlane.xlu0 %197 }
 0x18a   :  { %v209_v5 = vmul.f32 0.03125, %v198_v4 }
 0x18c   :  { %v1170_v6 = vsub.f32 %v190_v45, %v209_v5 }
 0x18d   :  { %v204_v7 = vpop.xlane.xlu1 %203  ;;  %v201_v8 = vpop.xlane.xlu0 %200 }
 0x18e   :  { %v211_v9 = vmul.f32 0.03125, %v204_v7  ;;  %v210_v10 = vmul.f32 0.03125, %v201_v8  ;;  %v217_v11 = vmul.f32 %v1170_v6, %v1170_v6  ;;  %v531_v8 = vld [vmem:[%s1308_s14 + $0x10] sm:$0xff] }
 0x190   :  { %v1174_v12 = vsub.f32 %v192_v54, %v211_v9  ;;  %v1176_v13 = vsub.f32 %v191_v47, %v210_v10  ;;  %v221_v14 = vsel %vm76_vm0, %v217_v11, 0.0 }
 0x191   :  { %v207_v15 = vpop.xlane.xlu1 %206  ;;  %222 = vadd.xlane.f32.xlu0 %v221_v14  ;;  %v489_v16 = vpop.xlane.xlu0 %488 }
 0x192   :  { %v212_v17 = vmul.f32 0.03125, %v207_v15  ;;  %v493_v18 = vmul.f32 0.03125, %v489_v16  ;;  %v219_v19 = vmul.f32 %v1174_v12, %v1174_v12  ;;  %v218_v20 = vmul.f32 %v1176_v13, %v1176_v13 }
 0x194   :  { %v1183_v21 = vsub.f32 %v193_v59, %v212_v17  ;;  %v1185_v22 = vsub.f32 %v483_v63, %v493_v18  ;;  %v227_v23 = vsel %vm76_vm0, %v219_v19, 0.0  ;;  %v224_v24 = vsel %vm76_vm0, %v218_v20, 0.0  ;;  %v822_v20 = vld [vmem:[%s1312_s13] ss:$0 sm:$0xff] }
 0x195   :  { %v492_v25 = vpop.xlane.xlu1 %491  ;;  %228 = vadd.xlane.f32.xlu0 %v227_v23  ;;  %225 = vadd.xlane.f32.xlu1 %v224_v24 }
 0x196   :  { %v494_v26 = vmul.f32 0.03125, %v492_v25  ;;  %v220_v27 = vmul.f32 %v1183_v21, %v1183_v21  ;;  %v497_v28 = vmul.f32 %v1185_v22, %v1185_v22 }
 0x198   :  { %v1193_v29 = vsub.f32 %v484_v2, %v494_v26  ;;  %v230_v30 = vsel %vm76_vm0, %v220_v27, 0.0  ;;  %v499_v31 = vsel %vm76_vm0, %v497_v28, 0.0  ;;  %v708_v28 = vld [vmem:[%s1313_s15] sm:$0xff] }
 0x199   :  { %231 = vadd.xlane.f32.xlu1 %v230_v30  ;;  %500 = vadd.xlane.f32.xlu0 %v499_v31  ;;  %v614_v31 = vld [vmem:[%s1314_s3] sm:$0xff] }
 0x19a   :  { %v498_v32 = vmul.f32 %v1193_v29, %v1193_v29 }
 0x19c   :  { %v502_v33 = vsel %vm76_vm0, %v498_v32, 0.0  ;;  %v615_v32 = vld [vmem:[%s1314_s3 + $0x8] sm:$0xff] }
 0x19d   :  { %503 = vadd.xlane.f32.xlu1 %v502_v33  ;;  %v1007_v33 = vmov 0.0|0.0   ;;  %v968_v34 = vpack.c.bf16 %v615_v32, %v614_v31 }
 0x19f   :  { %970 = vmatprep.subr.msk.bf16.mxu0 %vm969_vm2, %v968_v34 }
 0x1a0   :  { %973 = vmatpush3.bf16.xpose.msk.msra.mxu0 %vm969_vm2, %v968_v34 }
 0x21e   :  { %v223_v43 = vpop.xlane.xlu0 %222 }
 0x21f   :  { %v233_v44 = vmul.f32 0.03125, %v223_v43 }
 0x221   :  { %v237_v45 = vadd.f32 1e-12, %v233_v44 }
 0x222   :  { %v226_v46 = vpop.xlane.xlu1 %225  ;;  %v229_v47 = vpop.xlane.xlu0 %228 }
 0x223   :  { %995 = vrsqrt.f32 %v237_v45  ;;  %v234_v48 = vmul.f32 0.03125, %v226_v46  ;;  %v235_v49 = vmul.f32 0.03125, %v229_v47 }
 0x225   :  { %v238_v50 = vadd.f32 1e-12, %v234_v48  ;;  %v239_v51 = vadd.f32 1e-12, %v235_v49 }
 0x226   :  { %v232_v52 = vpop.xlane.xlu1 %231  ;;  %v501_v53 = vpop.xlane.xlu0 %500 }
 0x227   :  { %997 = vrsqrt.f32 %v238_v50  ;;  %v236_v54 = vmul.f32 0.03125, %v232_v52  ;;  %v505_v55 = vmul.f32 0.03125, %v501_v53  ;;  %v829_v52 = vld [vmem:[#allocation2] ss:$0 sm:$0xff] }
 0x228   :  { %999 = vrsqrt.f32 %v239_v51 }
 0x229   :  { %v240_v56 = vadd.f32 1e-12, %v236_v54  ;;  %v507_v57 = vadd.f32 1e-12, %v505_v55 }
 0x22a   :  { %v504_v58 = vpop.xlane.xlu1 %503 }
 0x22b   :  { %1001 = vrsqrt.f32 %v240_v56  ;;  %v506_v59 = vmul.f32 0.03125, %v504_v58 }
 0x22c   :  { %1003 = vrsqrt.f32 %v507_v57 }
 0x22d   :  { %v996_v60 = vpop.eup %995  ;;  %v508_v61 = vadd.f32 1e-12, %v506_v59 }
 0x22e   :  { %v245_v63 = vmul.f32 %v996_v60, %v1170_v6  ;;  %v532_v6 = vld [vmem:[%s1308_s14 + $0x18] sm:$0xff] }
 0x22f   :  { %1005 = vrsqrt.f32 %v508_v61  ;;  %v964_v16 = vpack.c.bf16 %v532_v6, %v531_v8 }
 0x230   :  { %v255_v1 = vmul.f32 %v811_v62, %v245_v63 }
 0x231   :  { %v998_v2 = vpop.eup %997 }
 0x232   :  { %v1000_v3 = vpop.eup %999  ;;  %v265_v4 = vadd.f32 %v812_v0, %v255_v1  ;;  %v246_v5 = vmul.f32 %v998_v2, %v1176_v13 }
 0x233   :  { %v247_v7 = vmul.f32 %v1000_v3, %v1174_v12  ;;  %v821_v12 = vld [vmem:[%s1311_s12] ss:$0 sm:$0xff] }
 0x234   :  { %890 = vmatprep.mubr.msk.f32.mxu1 %vm76_vm0, %v265_v4  ;;  %v256_v9 = vmul.f32 %v811_v62, %v246_v5 }
 0x235   :  { %v1002_v10 = vpop.eup %1001  ;;  %v257_v11 = vmul.f32 %v811_v62, %v247_v7 }
 0x236   :  { %v1004_v14 = vpop.eup %1003  ;;  %v266_v15 = vadd.f32 %v812_v0, %v256_v9  ;;  %v248_v13 = vmul.f32 %v1002_v10, %v1183_v21 }
 0x237   :  { %v267_v17 = vadd.f32 %v812_v0, %v257_v11  ;;  %v511_v18 = vmul.f32 %v1004_v14, %v1185_v22 }
 0x238   :  { %891 = vmatmul.mubr.msk.f32.vlgmr.msra.gmra.mrb[0].mxu1 %vm76_vm0, %v266_v15  ;;  %v258_v19 = vmul.f32 %v811_v62, %v248_v13 }
 0x239   :  { %v1006_v23 = vpop.eup %1005  ;;  %963 = vmatpush3.bf16.msra.mxu1 %v960_v42  ;;  %893 = vmatprep.mubr.msk.f32.mxu1 %vm76_vm0, %v267_v17  ;;  %v519_v24 = vmul.f32 %v821_v12, %v511_v18 }
 0x23a   :  { %v512_v21 = vmul.f32 %v1006_v23, %v1193_v29  ;;  %965 = vmatprep.subr.bf16.mxu1 %v964_v16  ;;  %v268_v25 = vadd.f32 %v812_v0, %v258_v19  ;;  %v709_v29 = vld [vmem:[%s1313_s15 + $0x8] sm:$0xff] }
 0x23b   :  { %v527_v26 = vadd.f32 %v822_v20, %v519_v24  ;;  %v975_v30 = vpack.c.bf16 %v709_v29, %v708_v28 }
 0x23c   :  { %894 = vmatmul.mubr.msk.f32.gmra.mrb[2].mxu1 %vm76_vm0, %v268_v25  ;;  %v520_v22 = vmul.f32 %v821_v12, %v512_v21 }
 0x23d   :  { %967 = vmatpush3.bf16.msra.mxu1 %v964_v16  ;;  %915 = vmatprep.mubr.msk.f32.mxu1 %vm76_vm0, %v527_v26 }
 0x23e   :  { %v528_v27 = vadd.f32 %v822_v20, %v520_v22  ;;  %974 = vmatprep.subr.bf16.mxu1 %v1007_v33 }
 0x240   :  { %916 = vmatmul.mubr.msk.f32.vlgmr.msra.gmra.mrb[4].mxu1 %vm76_vm0, %v528_v27 }
 0x241   :  { %976 = vmatpush3.bf16.msra.mxu1 %v975_v30  ;;  %933 = vmatprep.mubr.msk.f32.mxu1 %vm1008_vm3, %v1009_v38 }
 0x242   :  { %977 = vmatprep.subr.bf16.mxu1 %v1007_v33 }
 0x245   :  { %979 = vmatpush3.bf16.msra.mxu1 %v978_v37 }
 0x248   :  { %934 = vmatmul.mubr.msk.f32.vlgmr.msra.gmra.mrb[6].mxu1 %vm76_vm0, %v707_v39 }
 0x30b   :  { %v892_v42 = vpop.f32.mrb[0].mxu1 }
 0x30c   :  { %v364_v43 = vadd.f32 %v892_v42, %v813_v41  ;;  %v358_v44 = vpop.f32.mrb[1].mxu1 }
 0x30d   :  { %v359_v45 = vadd.f32 %v813_v41, %v358_v44 }
 0x30e   :  { %378 = vst [vmem:[%s1318_s17 + $0x8] sm:$0xff] %v364_v43 }
 0x30f   :  { %377 = vst [vmem:[%s1318_s17] sm:$0xff] %v359_v45  ;;  %v895_v46 = vpop.f32.mrb[2].mxu1 }
 0x310   :  { %v374_v47 = vadd.f32 %v895_v46, %v813_v41  ;;  %v368_v48 = vpop.f32.mrb[3].mxu1 }
 0x311   :  { %v369_v49 = vadd.f32 %v813_v41, %v368_v48 }
 0x312   :  { %380 = vst [vmem:[%s1318_s17 + $0x18] sm:$0xff] %v374_v47 }
 0x313   :  { %379 = vst [vmem:[%s1318_s17 + $0x10] sm:$0xff] %v369_v49  ;;  %v917_v50 = vpop.f32.mrb[4].mxu1 }
 0x314   :  { %v605_v51 = vpop.f32.mrb[5].mxu1 }
 0x315   :  { %922 = vmatprep.mubr.msk.f32.mxu0 %vm616_vm1, %v605_v51 }
 0x316   :  { %923 = vmatmul.mubr.msk.f32.vlgmr.msra.gmra.mrb[6].mxu0 %vm616_vm1, %v917_v50 }
 0x31b   :  { %v788_v53 = vpop.f32.mrb[6].mxu1 }
 0x31c   :  { %v789_v54 = vadd.f32 %v829_v52, %v788_v53  ;;  %v935_v55 = vpop.f32.mrb[7].mxu1 }
 0x31e   :  { %793 = vst.msk [vmem:[%s1319_s19] sm:$0xf] %vm792_vm4, %v789_v54 }
 0x3e9   :  { %v924_v56 = vpop.f32.mrb[6].mxu0 }
 0x3ea   :  { %706 = vst.msk [vmem:[%s1320_s18 + $0x8] sm:$0xff] %vm704_vm5, %v924_v56  ;;  %v695_v57 = vpop.f32.mrb[7].mxu0 }
 0x3eb   :  { %705 = vst.msk [vmem:[%s1320_s18] sm:$0xff] %vm704_vm5, %v695_v57 }

// kernel: model_forward.4
= control target key start
LH: loop header
LB: loop body
LE: loop exit
PB: predicated region body
PF: predicated region fallthrough
CT: control target
= control target key end

     0   :  { %s4913_s29 = smov 0   ;;  %s6096_s0 = inlined_call_operand.vmem [shape: f32[52,32], index: 0, kind: input, shape index: {}]   ;;  %s6097_s1 = inlined_call_operand.vmem [shape: f32[52,52], index: 1, kind: input, shape index: {}]   ;;  %s6098_s2 = inlined_call_operand.vmem [shape: f32[2,32,96], index: 2, kind: input, shape index: {}]   ;;  %s6099_s3 = inlined_call_operand.vmem [shape: f32[2,1,96], index: 3, kind: input, shape index: {}]   ;;  %s6100_s4 = inlined_call_operand.vmem [shape: f32[2,32,32], index: 4, kind: input, shape index: {}]   ;;  %s6101_s5 = inlined_call_operand.vmem [shape: f32[2,1,32], index: 5, kind: input, shape index: {}]   ;;  %s6102_s6 = inlined_call_operand.vmem [shape: f32[2,1,32], index: 6, kind: input, shape index: {}]   ;;  %s6103_s7 = inlined_call_operand.vmem [shape: f32[2,1,32], index: 7, kind: input, shape index: {}]   ;;  %s6104_s8 = inlined_call_operand.vmem [shape: f32[2,32,64], index: 8, kind: input, shape index: {}]   ;;  %s6105_s9 = inlined_call_operand.vmem [shape: f32[2,1,64], index: 9, kind: input, shape index: {}]   ;;  %s6106_s10 = inlined_call_operand.vmem [shape: f32[2,64,32], index: 10, kind: input, shape index: {}]   ;;  %s6107_s11 = inlined_call_operand.vmem [shape: f32[2,1,32], index: 11, kind: input, shape index: {}]   ;;  %s6108_s12 = inlined_call_operand.vmem [shape: f32[2,1,32], index: 12, kind: input, shape index: {}]   ;;  %s6109_s13 = inlined_call_operand.vmem [shape: f32[2,1,32], index: 13, kind: input, shape index: {}]   ;;  %s6110_s14 = inlined_call_operand.vmem [shape: f32[52,32], index: 14, kind: output, shape index: {}]  }
   0x1   :  { %6115 = sst [smem:[#allocation5_spill]] %s6097_s1 }
   0x2   :  { %6116 = sst [smem:[#allocation6_spill]] %s6098_s2 }
   0x3   :  { %6117 = sst [smem:[#allocation7_spill]] %s6100_s4 }
   0x4   :  { %6118 = sst [smem:[#allocation8_spill]] %s6110_s14 }
   0x5 LB: > { %6119 = sst [smem:[#allocation3_spill]] %s4822_s29  ;;  %s4919_s30 = sadd.s32 4294967295, %s4822_s29   ;;  %s4822_s29 = sphi %s4913_s29, %s24_s29  }
   0x6   : > { %p3580_p0 = scmp.ge.s32.totalorder %s4822_s29, 1  ;;  %p501_p1 = scmp.lt.s32.totalorder %s4822_s29, 3 }
   0x8   : > { %p502_p2 = pnand %p3580_p0, %p501_p1 }
   0xa   : > { %505 = sbr.rel (%p502_p2) target bundleno = 3956 (0xf74), region = 76 }
  0x11   : > { %p581_p3 = scmp.lt.s32.totalorder %s4919_s30, 1  ;;  %s6120_s2 = sld [smem:[#allocation6_spill]] }
  0x12   : > { %s6121_s4 = sld [smem:[#allocation7_spill]]  ;;  %p3589_p4 = scmp.ne.s32.totalorder %s4919_s30, 0 }
  0x13   : > { %s4925_s15 = scalar_select %p581_p3, %s4919_s30, 1 }
  0x14   : > { %628 = sbr.rel (%p3589_p4) target bundleno = 27 (0x1b), region = 80  ;;  %v629_v0 = vld [vmem:[%s6096_s0] sm:$0xff] (!%p3589_p4)  ;;  %vm636_vm0 = vcmask (!%p3589_p4), 261120   ;;  %v630_v1 = vld [vmem:[%s6096_s0 + $0x8] sm:$0xff] (!%p3589_p4)  ;;  %v631_v2 = vld [vmem:[%s6096_s0 + $0x10] sm:$0xff] (!%p3589_p4)  ;;  %vm643_vm1 = vcmask (!%p3589_p4), 257024  }
  0x15   : > { %s3738_s16 = sshll.u32 %s4925_s15, 5  ;;  %s618_s17 = scalar_lea.vmem %s6107_s11, %s4925_s15  ;;  %637 = vst.msk [vmem:[#allocation2] sm:$0xff] (!%p3589_p4), %vm636_vm0, %v629_v0  ;;  %638 = vst.msk [vmem:[#allocation2 + $0x8] sm:$0xff] (!%p3589_p4), %vm636_vm0, %v630_v1  ;;  %v632_v3 = vld [vmem:[%s6096_s0 + $0x18] sm:$0xff] (!%p3589_p4)  ;;  %v633_v4 = vld [vmem:[%s6096_s0 + $0x20] sm:$0xff] (!%p3589_p4) }
  0x16   : > { %s621_s20 = scalar_lea.vmem %s6108_s12, %s4925_s15  ;;  %s624_s1 = scalar_lea.vmem %s6109_s13, %s4925_s15  ;;  %639 = vst.msk [vmem:[#allocation2 + $0x10] sm:$0xff] (!%p3589_p4), %vm636_vm0, %v631_v2  ;;  %v634_v5 = vld [vmem:[%s6096_s0 + $0x28] sm:$0xff] (!%p3589_p4)  ;;  %640 = vst.msk [vmem:[#allocation2 + $0x18] sm:$0xff] (!%p3589_p4), %vm636_vm0, %v632_v3  ;;  %v635_v6 = vld [vmem:[%s6096_s0 + $0x30] sm:$0xf] (!%p3589_p4) }
  0x17   : > { %s4935_s22 = scalar_lea.vmem %s6120_s2, %s3738_s16  ;;  %s4957_s2 = scalar_lea.vmem %s6104_s8, %s3738_s16  ;;  %641 = vst.msk [vmem:[#allocation2 + $0x20] sm:$0xff] (!%p3589_p4), %vm636_vm0, %v633_v4  ;;  %642 = vst.msk [vmem:[#allocation2 + $0x28] sm:$0xff] (!%p3589_p4), %vm636_vm0, %v634_v5 }
  0x18   : > { %s4940_s25 = scalar_lea.vmem %s6121_s4, %s3738_s16  ;;  %s610_s4 = scalar_lea.vmem %s6105_s9, %s4925_s15  ;;  %644 = vst.msk [vmem:[#allocation2 + $0x30] sm:$0xf] (!%p3589_p4), %vm643_vm1, %v635_v6 }
  0x19   : > { %6122 = sst [smem:[#allocation4_spill]] %s4940_s25  ;;  %s3741_s25 = sshll.u32 %s4925_s15, 6 }
  0x1a   : > { %s4967_s28 = scalar_lea.vmem %s6106_s10, %s3741_s25 }
  0x1b PF: > { %v659_v7 = vld [vmem:[%s4935_s22] sm:$0xff]  ;;  %v660_v8 = vld [vmem:[%s4935_s22 + $0x8] sm:$0xff]  ;;  %v661_v9 = vld [vmem:[%s4935_s22 + $0x10] sm:$0xff]  ;;  %v4824_v10 = vmov 0.0|0.0   ;;  %vm4825_vm2 = vmmov 0   ;;  %v4826_v13 = vmov 0.0   ;;  %s6123_s27 = scalar_lea.vmem %s6099_s3, %s4925_s15 }
  0x1c   : > { %4390 = vmatprep.subr.bf16.mxu0 %v4824_v10  ;;  %v4391_v11 = vpack.c.bf16 %v660_v8, %v659_v7  ;;  %v662_v12 = vld [vmem:[%s4935_s22 + $0x18] sm:$0xff]  ;;  %3931 = vmatprep.mubr.msk.f32.mxu0 %vm4825_vm2, %v4826_v13  ;;  %v645_v15 = vld [vmem:[#allocation2] sm:$0xff]  ;;  %vm670_vm3 = vcmask 261120   ;;  %v646_v16 = vld [vmem:[#allocation2 + $0x8] sm:$0xff]  ;;  %s4827_s14 = smov 96   ;;  %s4828_s19 = smov 88  }
  0x1d   : > { %4396 = vmatprep.subr.bf16.mxu1 %v4824_v10  ;;  %3966 = vmatprep.mubr.msk.f32.mxu1 %vm4825_vm2, %v4826_v13  ;;  %v4394_v14 = vpack.c.bf16 %v662_v12, %v661_v9  ;;  %v647_v17 = vld [vmem:[#allocation2 + $0x10] sm:$0xff]  ;;  %v648_v18 = vld [vmem:[#allocation2 + $0x18] sm:$0xff]  ;;  %v3590_v24 = vld [vmem:[%s6123_s27] ss:$0 sm:$0xff]  ;;  %s4829_s29 = smov 120   ;;  %vm817_vm4 = vcmask 64512  }
  0x1e   : > { %4392 = vmatpush3.bf16.msra.mxu0 %v4391_v11  ;;  %v649_v19 = vld [vmem:[#allocation2 + $0x20] sm:$0xff]  ;;  %v650_v20 = vld [vmem:[#allocation2 + $0x28] sm:$0xff]  ;;  %vm5084_vm5 = vmpackc.low %vm817_vm4, %vm817_vm4  ;;  %s6126_s21 = sld [smem:[#allocation5_spill]]  ;;  %vm960_vm6 = vcmask 424960   ;;  %s4830_s16 = smov 64   ;;  %vm979_vm7 = vcmask 420864  }
  0x1f   : > { %4393 = vmatprep.subr.bf16.mxu0 %v4824_v10  ;;  %v651_v21 = vld [vmem:[#allocation2 + $0x30] sm:$0xf]  ;;  %s4831_s25 = smov 56   ;;  %s4832_s22 = smov 80   ;;  %vm1080_vm8 = vcmask 1043456   ;;  %vm2892_vm9 = vcmask 257024  }
  0x20   : > { %s4833_s26 = smov 112   ;;  %s4834_s27 = smov 48   ;;  %vm3175_vm10 = vcmask 523264  }
  0x21   : > { %p3735_p5 = scmp.ne.s32.totalorder %s4919_s30, 1 }
  0x22   : > { %4395 = vmatpush3.bf16.msra.mxu0 %v4394_v14 }
  0x23   : > { %4408 = vmatprep.subr.bf16.mxu0 %v4824_v10 }
  0x25   : > { %3932 = vmatmul.mubr.msk.f32.vlgmr.msra.gmra.mrb[0].mxu0 %vm670_vm3, %v645_v15 }
  0x26   : > { %3934 = vmatprep.mubr.msk.f32.mxu0 %vm4825_vm2, %v4826_v13 }
  0x29   : > { %3935 = vmatmul.mubr.msk.f32.gmra.mrb[2].mxu0 %vm670_vm3, %v646_v16 }
  0x2a   : > { %3937 = vmatprep.mubr.msk.f32.mxu0 %vm4825_vm2, %v4826_v13 }
  0x2d   : > { %3938 = vmatmul.mubr.msk.f32.gmra.mrb[4].mxu0 %vm670_vm3, %v647_v17 }
  0x2e   : > { %3940 = vmatprep.mubr.msk.f32.mxu0 %vm4825_vm2, %v4826_v13 }
  0x31   : > { %3941 = vmatmul.mubr.msk.f32.gmra.mrb[6].mxu0 %vm670_vm3, %v648_v18 }
  0x32   : > { %3943 = vmatprep.mubr.msk.f32.mxu0 %vm4825_vm2, %v4826_v13 }
  0x35   : > { %3944 = vmatmul.mubr.msk.f32.gmra.mrb[8].mxu0 %vm670_vm3, %v649_v19 }
  0x36   : > { %3946 = vmatprep.mubr.msk.f32.mxu0 %vm4825_vm2, %v4826_v13 }
  0x39   : > { %3947 = vmatmul.mubr.msk.f32.gmra.mrb[10].mxu0 %vm670_vm3, %v650_v20  ;;  %v652_v20 = vld [vmem:[%s6126_s21] sm:$0xff] }
  0x3a   : > { %3949 = vmatprep.mubr.msk.f32.mxu0 %vm4825_vm2, %v4826_v13 }
  0x3d   : > { %3950 = vmatmul.mubr.msk.f32.gmra.mrb[12].mxu0 %vm670_vm3, %v651_v21 }
  0x3e   : > { %4001 = vmatprep.mubr.msk.f32.mxu0 %vm4825_vm2, %v4826_v13 }
  0xf8   : > { %v758_v22 = vpop.f32.mrb[0].mxu0 }
  0xf9   : > { %v3933_v23 = vpop.f32.mrb[1].mxu0  ;;  %v5041_v26 = vadd.f32 %v3590_v24, %v758_v22 }
  0xfc   : > { %v763_v25 = vpop.f32.mrb[2].mxu0 }
  0xfd   : > { %v5043_v27 = vadd.f32 %v3590_v24, %v763_v25  ;;  %v3936_v28 = vpop.f32.mrb[3].mxu0  ;;  %v5167_v25 = vld [vmem:[%s6126_s21 + $0x8] sm:$0xff] }
  0xff   : > { %v5047_v29 = vpack.i.bf16 %v5043_v27, %v5041_v26 }
 0x100   : > { %v768_v30 = vpop.f32.mrb[4].mxu0 }
 0x101   : > { %4529 = vrot.lane.b32.xlu0 %v5047_v29, %s4827_s14  ;;  %v3939_v31 = vpop.f32.mrb[5].mxu0  ;;  %v5050_v33 = vadd.f32 %v3590_v24, %v768_v30 }
 0x104   : > { %v773_v32 = vpop.f32.mrb[6].mxu0 }
 0x105   : > { %v5052_v34 = vadd.f32 %v3590_v24, %v773_v32  ;;  %v3942_v35 = vpop.f32.mrb[7].mxu0 }
 0x107   : > { %v5056_v36 = vpack.i.bf16 %v5052_v34, %v5050_v33 }
 0x108   : > { %v778_v37 = vpop.f32.mrb[8].mxu0 }
 0x109   : > { %4534 = vrot.lane.b32.xlu0 %v5056_v36, %s4827_s14  ;;  %v3945_v38 = vpop.f32.mrb[9].mxu0  ;;  %v5059_v40 = vadd.f32 %v3590_v24, %v778_v37  ;;  %v654_v37 = vld [vmem:[%s6126_s21 + $0x10] sm:$0xff] }
 0x10c   : > { %v783_v39 = vpop.f32.mrb[10].mxu0 }
 0x10d   : > { %v5061_v41 = vadd.f32 %v3590_v24, %v783_v39  ;;  %4544 = vrot.lane.b32.xlu0 %v5047_v29, %s4828_s19  ;;  %v3948_v42 = vpop.f32.mrb[11].mxu0 }
 0x10f   : > { %v5066_v43 = vpack.i.bf16 %v5061_v41, %v5059_v40 }
 0x110   : > { %v788_v44 = vpop.f32.mrb[12].mxu0 }
 0x111   : > { %4554 = vrot.lane.b32.xlu0 %v5066_v43, %s4828_s19  ;;  %4539 = vrot.lane.b32.xlu1 %v5066_v43, %s4827_s14  ;;  %v5070_v45 = vadd.f32 %v3590_v24, %v788_v44  ;;  %v3951_v46 = vpop.f32.mrb[13].mxu0 }
 0x115   : > { %1183 = vrot.lane.b32.xlu0 %v5041_v26, %s4829_s29  ;;  %815 = vrot.lane.b32.xlu1 %v5070_v45, %s4827_s14  ;;  %s6127_s14 = sld [smem:[#allocation4_spill]] }
 0x119   : > { %1187 = vrot.lane.b32.xlu0 %v5050_v33, %s4829_s29  ;;  %4549 = vrot.lane.b32.xlu1 %v5056_v36, %s4828_s19 }
 0x11d   : > { %1191 = vrot.lane.b32.xlu0 %v5059_v40, %s4829_s29  ;;  %1209 = vrot.lane.b32.xlu1 %v5070_v45, %s4828_s19 }
 0x121   : > { %1195 = vrot.lane.b32.xlu0 %v5070_v45, %s4829_s29  ;;  %1185 = vrot.lane.b32.xlu1 %v5043_v27, %s4829_s29 }
 0x125   : > { %1189 = vrot.lane.b32.xlu1 %v5052_v34, %s4829_s29 }
 0x129   : > { %1193 = vrot.lane.b32.xlu1 %v5061_v41, %s4829_s29  ;;  %s6129_s29 = scalar_lea.vmem %s6102_s6, %s4925_s15 }
 0x173   : > { %v4530_v47 = vpop.permute.xlu0 %4529 }
 0x174   : > { %v4532_v48 = vunpack.i.h.bf16 %v4530_v47  ;;  %v4531_v49 = vunpack.i.l.bf16 %v4530_v47  ;;  %v655_v47 = vld [vmem:[%s6126_s21 + $0x18] sm:$0xff] }
 0x176   : > { %v4397_v51 = vpack.c.bf16 %v4532_v48, %v4531_v49 }
 0x178   : > { %4399 = vmatpush3.bf16.xpose.msk.msra.mxu1 %vm5084_vm5, %v4397_v51 }
 0x179   : > { %4400 = vmatprep.subr.bf16.mxu1 %v4824_v10 }
 0x17b   : > { %v4535_v52 = vpop.permute.xlu0 %4534 }
 0x17c   : > { %v4537_v53 = vunpack.i.h.bf16 %v4535_v52  ;;  %v4536_v54 = vunpack.i.l.bf16 %v4535_v52 }
 0x17e   : > { %v4401_v55 = vpack.c.bf16 %v4537_v53, %v4536_v54  ;;  %v656_v54 = vld [vmem:[%s6126_s21 + $0x20] sm:$0xff] }
 0x17f   : > { %v4545_v60 = vpop.permute.xlu0 %4544 }
 0x180   : > { %4403 = vmatpush3.bf16.xpose.msk.msra.mxu1 %vm5084_vm5, %v4401_v55  ;;  %v4547_v62 = vunpack.i.h.bf16 %v4545_v60  ;;  %v4546_v63 = vunpack.i.l.bf16 %v4545_v60  ;;  %v657_v60 = vld [vmem:[%s6126_s21 + $0x28] sm:$0xff] }
 0x181   : > { %4404 = vmatprep.subr.bf16.mxu1 %v4824_v10 }
 0x182   : > { %v4418_v0 = vpack.c.bf16 %v4547_v62, %v4546_v63 }
 0x183   : > { %v4540_v56 = vpop.permute.xlu1 %4539  ;;  %v4555_v5 = vpop.permute.xlu0 %4554 }
 0x184   : > { %v4542_v57 = vunpack.i.h.bf16 %v4540_v56  ;;  %v4541_v58 = vunpack.i.l.bf16 %v4540_v56  ;;  %v4557_v6 = vunpack.i.h.bf16 %v4555_v5  ;;  %v4556_v7 = vunpack.i.l.bf16 %v4555_v5 }
 0x186   : > { %v4405_v59 = vpack.c.bf16 %v4542_v57, %v4541_v58  ;;  %v4426_v8 = vpack.c.bf16 %v4557_v6, %v4556_v7 }
 0x187   : > { %v816_v61 = vpop.permute.xlu1 %815  ;;  %v1184_v11 = vpop.permute.xlu0 %1183 }
 0x188   : > { %4407 = vmatpush3.bf16.xpose.msk.msra.mxu1 %vm5084_vm5, %v4405_v59 }
 0x189   : > { %3964 = vmatprep.subr.mxu1 %v4826_v13 }
 0x18b   : > { %v4550_v1 = vpop.permute.xlu1 %4549  ;;  %v1188_v14 = vpop.permute.xlu0 %1187 }
 0x18c   : > { %v4552_v2 = vunpack.i.h.bf16 %v4550_v1  ;;  %v4551_v3 = vunpack.i.l.bf16 %v4550_v1 }
 0x18e   : > { %v4422_v4 = vpack.c.bf16 %v4552_v2, %v4551_v3 }
 0x18f   : > { %v1210_v9 = vpop.permute.xlu1 %1209  ;;  %v1192_v16 = vpop.permute.xlu0 %1191 }
 0x190   : > { %3965 = vmatpush3.xpose.msk.msra.mxu1 %vm817_vm4, %v816_v61 }
 0x191   : > { %4417 = vmatprep.subr.bf16.mxu1 %v4824_v10 }
 0x193   : > { %3967 = vmatmul.mubr.msk.f32.vlgmr.msra.gmra.mrb[0].mxu1 %vm817_vm4, %v5041_v26  ;;  %v1186_v12 = vpop.permute.xlu1 %1185  ;;  %v1196_v18 = vpop.permute.xlu0 %1195 }
 0x194   : > { %4420 = vmatpush3.bf16.xpose.msk.msra.mxu1 %vm5084_vm5, %v4418_v0  ;;  %3969 = vmatprep.mubr.msk.f32.mxu1 %vm4825_vm2, %v4826_v13 }
 0x195   : > { %4421 = vmatprep.subr.bf16.mxu1 %v4824_v10 }
 0x197   : > { %3970 = vmatmul.mubr.msk.f32.gmra.mrb[2].mxu1 %vm817_vm4, %v5043_v27  ;;  %v1190_v15 = vpop.permute.xlu1 %1189 }
 0x198   : > { %3972 = vmatprep.mubr.msk.f32.mxu1 %vm4825_vm2, %v4826_v13 }
 0x19b   : > { %3973 = vmatmul.mubr.msk.f32.gmra.mrb[4].mxu1 %vm817_vm4, %v5050_v33  ;;  %v1194_v17 = vpop.permute.xlu1 %1193 }
 0x19c   : > { %4424 = vmatpush3.bf16.xpose.msk.msra.mxu1 %vm5084_vm5, %v4422_v4  ;;  %3975 = vmatprep.mubr.msk.f32.mxu1 %vm4825_vm2, %v4826_v13 }
 0x19d   : > { %4425 = vmatprep.subr.bf16.mxu1 %v4824_v10 }
 0x19f   : > { %3976 = vmatmul.mubr.msk.f32.gmra.mrb[6].mxu1 %vm817_vm4, %v5052_v34 }
 0x1a0   : > { %3978 = vmatprep.mubr.msk.f32.mxu1 %vm4825_vm2, %v4826_v13 }
 0x1a3   : > { %3979 = vmatmul.mubr.msk.f32.gmra.mrb[8].mxu1 %vm817_vm4, %v5059_v40 }
 0x1a4   : > { %4428 = vmatpush3.bf16.xpose.msk.msra.mxu1 %vm5084_vm5, %v4426_v8  ;;  %3981 = vmatprep.mubr.msk.f32.mxu1 %vm4825_vm2, %v4826_v13 }
 0x1a5   : > { %4034 = vmatprep.subr.mxu1 %v4826_v13 }
 0x1a7   : > { %3982 = vmatmul.mubr.msk.f32.gmra.mrb[10].mxu1 %vm817_vm4, %v5061_v41 }
 0x1a8   : > { %3984 = vmatprep.mubr.msk.f32.mxu1 %vm4825_vm2, %v4826_v13 }
 0x1ab   : > { %3985 = vmatmul.mubr.msk.f32.gmra.mrb[12].mxu1 %vm817_vm4, %v5070_v45 }
 0x1ac   : > { %4035 = vmatpush3.xpose.msk.msra.mxu1 %vm817_vm4, %v1210_v9  ;;  %4036 = vmatprep.mubr.msk.f32.mxu1 %vm4825_vm2, %v4826_v13 }
 0x1ad   : > { %4498 = vmatprep.subr.bf16.mxu1 %v4824_v10 }
 0x1af   : > { %4037 = vmatmul.mubr.msk.f32.vlgmr.msra.gmra.mrb[14].mxu1 %vm817_vm4, %v1184_v11 }
 0x1b0   : > { %4039 = vmatprep.mubr.msk.f32.mxu1 %vm4825_vm2, %v4826_v13 }
 0x1b3   : > { %4040 = vmatmul.mubr.msk.f32.gmra.mrb[16].mxu1 %vm817_vm4, %v1186_v12 }
 0x1b4   : > { %4042 = vmatprep.mubr.msk.f32.mxu1 %vm4825_vm2, %v4826_v13 }
 0x1b7   : > { %4043 = vmatmul.mubr.msk.f32.gmra.mrb[18].mxu1 %vm817_vm4, %v1188_v14 }
 0x1b8   : > { %4045 = vmatprep.mubr.msk.f32.mxu1 %vm4825_vm2, %v4826_v13 }
 0x1bb   : > { %4046 = vmatmul.mubr.msk.f32.gmra.mrb[20].mxu1 %vm817_vm4, %v1190_v15 }
 0x1bc   : > { %4048 = vmatprep.mubr.msk.f32.mxu1 %vm4825_vm2, %v4826_v13 }
 0x1bf   : > { %4049 = vmatmul.mubr.msk.f32.gmra.mrb[22].mxu1 %vm817_vm4, %v1192_v16 }
 0x1c0   : > { %4051 = vmatprep.mubr.msk.f32.mxu1 %vm4825_vm2, %v4826_v13 }
 0x1c3   : > { %4052 = vmatmul.mubr.msk.f32.gmra.mrb[24].mxu1 %vm817_vm4, %v1194_v17 }
 0x1c4   : > { %4054 = vmatprep.mubr.msk.f32.mxu1 %vm4825_vm2, %v4826_v13 }
 0x1c7   : > { %4055 = vmatmul.mubr.msk.f32.gmra.mrb[26].mxu1 %vm817_vm4, %v1196_v18 }
 0x1c8   : > { %4089 = vmatprep.mubr.msk.f32.mxu1 %vm4825_vm2, %v4826_v13 }
 0x266   : > { %v912_v19 = vpop.f32.mrb[0].mxu1 }
 0x267   : > { %v946_v21 = vmul.f32 0.35355338, %v912_v19  ;;  %v3968_v22 = vpop.f32.mrb[1].mxu1 }
 0x269   : > { %v5162_v23 = vadd.f32 %v946_v21, %v652_v20 }
 0x26a   : > { %v917_v24 = vpop.f32.mrb[2].mxu1 }
 0x26b   : > { %v947_v28 = vmul.f32 0.35355338, %v917_v24  ;;  %v3971_v30 = vpop.f32.mrb[3].mxu1  ;;  %v961_v31 = vsel %vm960_vm6, %v5162_v23, -inf }
 0x26c   : > { %962 = vmax.xlane.f32.xlu1 %v961_v31 }
 0x26d   : > { %v5172_v32 = vadd.f32 %v947_v28, %v5167_v25 }
 0x26e   : > { %v922_v35 = vpop.f32.mrb[4].mxu1 }
 0x26f   : > { %v948_v38 = vmul.f32 0.35355338, %v922_v35  ;;  %v3974_v39 = vpop.f32.mrb[5].mxu1  ;;  %v964_v42 = vsel %vm960_vm6, %v5172_v32, -inf  ;;  %v5219_v35 = vld [vmem:[%s6126_s21 + $0x30] sm:$0xf] }
 0x270   : > { %965 = vmax.xlane.f32.xlu0 %v964_v42 }
 0x271   : > { %v5179_v44 = vadd.f32 %v948_v38, %v654_v37 }
 0x272   : > { %v927_v46 = vpop.f32.mrb[6].mxu1 }
 0x273   : > { %v949_v48 = vmul.f32 0.35355338, %v927_v46  ;;  %v3977_v49 = vpop.f32.mrb[7].mxu1  ;;  %v967_v51 = vsel %vm960_vm6, %v5179_v44, -inf }
 0x274   : > { %968 = vmax.xlane.f32.xlu0 %v967_v51 }
 0x275   : > { %v5186_v52 = vadd.f32 %v949_v48, %v655_v47 }
 0x276   : > { %v932_v53 = vpop.f32.mrb[8].mxu1 }
 0x277   : > { %v950_v55 = vmul.f32 0.35355338, %v932_v53  ;;  %v3980_v56 = vpop.f32.mrb[9].mxu1  ;;  %v970_v57 = vsel %vm960_vm6, %v5186_v52, -inf }
 0x278   : > { %971 = vmax.xlane.f32.xlu1 %v970_v57 }
 0x279   : > { %v5193_v58 = vadd.f32 %v950_v55, %v656_v54 }
 0x27a   : > { %v937_v59 = vpop.f32.mrb[10].mxu1 }
 0x27b   : > { %v951_v61 = vmul.f32 0.35355338, %v937_v59  ;;  %v3983_v62 = vpop.f32.mrb[11].mxu1  ;;  %v973_v63 = vsel %vm960_vm6, %v5193_v58, -inf }
 0x27c   : > { %974 = vmax.xlane.f32.xlu0 %v973_v63 }
 0x27d   : > { %v5200_v0 = vadd.f32 %v951_v61, %v657_v60 }
 0x27e   : > { %v942_v1 = vpop.f32.mrb[12].mxu1 }
 0x27f   : > { %v3986_v2 = vpop.f32.mrb[13].mxu1  ;;  %v976_v3 = vsel %vm960_vm6, %v5200_v0, -inf  ;;  %v952_v31 = vmul.f32 0.35355338, %v942_v1 }
 0x280   : > { %977 = vmax.xlane.f32.xlu1 %v976_v3 }
 0x281   : > { %v5222_v38 = vadd.f32 %v952_v31, %v5219_v35 }
 0x282   : > { %v1305_v4 = vpop.f32.mrb[14].mxu1 }
 0x283   : > { %v1339_v5 = vmul.f32 0.35355338, %v1305_v4  ;;  %v4038_v6 = vpop.f32.mrb[15].mxu1  ;;  %v980_v42 = vsel %vm979_vm7, %v5222_v38, -inf }
 0x285   : > { %v5204_v7 = vadd.f32 %v1339_v5, %v652_v20 }
 0x286   : > { %v1310_v8 = vpop.f32.mrb[16].mxu1 }
 0x287   : > { %v4041_v9 = vpop.f32.mrb[17].mxu1  ;;  %v1353_v11 = vsel %vm960_vm6, %v5204_v7, -inf }
 0x288   : > { %1354 = vmax.xlane.f32.xlu1 %v1353_v11 }
 0x28a   : > { %v1315_v12 = vpop.f32.mrb[18].mxu1 }
 0x28b   : > { %v1341_v14 = vmul.f32 0.35355338, %v1315_v12  ;;  %v4044_v15 = vpop.f32.mrb[19].mxu1 }
 0x28d   : > { %v5208_v16 = vadd.f32 %v1341_v14, %v654_v37  ;;  %v1340_v37 = vmul.f32 0.35355338, %v1310_v8 }
 0x28e   : > { %v1320_v17 = vpop.f32.mrb[20].mxu1 }
 0x28f   : > { %v4047_v18 = vpop.f32.mrb[21].mxu1  ;;  %v1359_v19 = vsel %vm960_vm6, %v5208_v16, -inf  ;;  %v1342_v39 = vmul.f32 0.35355338, %v1320_v17  ;;  %v5227_v46 = vadd.f32 %v1340_v37, %v5167_v25 }
 0x290   : > { %1360 = vmax.xlane.f32.xlu1 %v1359_v19 }
 0x291   : > { %v1356_v49 = vsel %vm960_vm6, %v5227_v46, -inf  ;;  %v5231_v51 = vadd.f32 %v1342_v39, %v655_v47 }
 0x292   : > { %4559 = vrot.lane.b32.xlu0 %v5047_v29, %s4830_s16  ;;  %v1325_v20 = vpop.f32.mrb[22].mxu1 }
 0x293   : > { %v4050_v21 = vpop.f32.mrb[23].mxu1  ;;  %v1362_v53 = vsel %vm960_vm6, %v5231_v51, -inf  ;;  %v1343_v56 = vmul.f32 0.35355338, %v1325_v20 }
 0x295   : > { %v5239_v59 = vadd.f32 %v1343_v56, %v656_v54 }
 0x296   : > { %v1330_v22 = vpop.f32.mrb[24].mxu1 }
 0x297   : > { %v4053_v24 = vpop.f32.mrb[25].mxu1  ;;  %v1344_v48 = vmul.f32 0.35355338, %v1330_v22  ;;  %v1365_v61 = vsel %vm960_vm6, %v5239_v59, -inf }
 0x299   : > { %v5235_v55 = vadd.f32 %v1344_v48, %v657_v60 }
 0x29a   : > { %v1335_v28 = vpop.f32.mrb[26].mxu1 }
 0x29b   : > { %v4056_v30 = vpop.f32.mrb[27].mxu1  ;;  %v1368_v57 = vsel %vm960_vm6, %v5235_v55, -inf  ;;  %v1345_v25 = vmul.f32 0.35355338, %v1335_v28 }
 0x29d   : > { %v5244_v47 = vadd.f32 %v1345_v25, %v5219_v35 }
 0x29f   : > { %v1371_v60 = vsel %vm979_vm7, %v5244_v47, -inf }
 0x2a1   : > { %4564 = vrot.lane.b32.xlu1 %v5056_v36, %s4830_s16 }
 0x2b1   : > { %981 = vmax.xlane.f32.xlu0 %v980_v42 }
 0x2b5   : > { %1357 = vmax.xlane.f32.xlu0 %v1356_v49 }
 0x2b9   : > { %1363 = vmax.xlane.f32.xlu0 %v1362_v53 }
 0x2bd   : > { %1369 = vmax.xlane.f32.xlu0 %v1368_v57 }
 0x2c5   : > { %1366 = vmax.xlane.f32.xlu1 %v1365_v61 }
 0x2c9   : > { %1372 = vmax.xlane.f32.xlu1 %v1371_v60 }
 0x2f9   : > { %v963_v62 = vpop.xlane.xlu1 %962 }
 0x2fa   : > { %v983_v63 = vsub.f32 %v5162_v23, %v963_v62 }
 0x2fc   : > { %v990_v1 = vmul.f32 1.442695, %v983_v63 }
 0x2fd   : > { %v966_v2 = vpop.xlane.xlu0 %965 }
 0x2fe   : > { %4648 = vpow2.f32 %v990_v1  ;;  %v984_v54 = vsub.f32 %v5172_v32, %v966_v2 }
 0x300   : > { %v992_v3 = vmul.f32 1.442695, %v984_v54 }
 0x301   : > { %v969_v4 = vpop.xlane.xlu0 %968 }
 0x302   : > { %4650 = vpow2.f32 %v992_v3  ;;  %v985_v5 = vsub.f32 %v5179_v44, %v969_v4 }
 0x304   : > { %v994_v6 = vmul.f32 1.442695, %v985_v5 }
 0x305   : > { %v972_v8 = vpop.xlane.xlu1 %971 }
 0x306   : > { %4652 = vpow2.f32 %v994_v6  ;;  %v986_v9 = vsub.f32 %v5186_v52, %v972_v8 }
 0x308   : > { %v5252_v11 = vpop.eup %4648  ;;  %v996_v12 = vmul.f32 1.442695, %v986_v9 }
 0x309   : > { %v975_v14 = vpop.xlane.xlu0 %974  ;;  %v1004_v23 = vsel %vm960_vm6, %v5252_v11, 0.0 }
 0x30a   : > { %4654 = vpow2.f32 %v996_v12  ;;  %v987_v32 = vsub.f32 %v5193_v58, %v975_v14  ;;  %1005 = vadd.xlane.f32.xlu0 %v1004_v23 }
 0x30c   : > { %v5257_v15 = vpop.eup %4650  ;;  %v998_v17 = vmul.f32 1.442695, %v987_v32 }
 0x30d   : > { %v4560_v44 = vpop.permute.xlu0 %4559  ;;  %v1007_v18 = vsel %vm960_vm6, %v5257_v15, 0.0  ;;  %v978_v24 = vpop.xlane.xlu1 %977 }
 0x30e   : > { %4656 = vpow2.f32 %v998_v17  ;;  %v4562_v52 = vunpack.i.h.bf16 %v4560_v44  ;;  %v4561_v19 = vunpack.i.l.bf16 %v4560_v44  ;;  %1008 = vadd.xlane.f32.xlu1 %v1007_v18  ;;  %v988_v56 = vsub.f32 %v5200_v0, %v978_v24 }
 0x310   : > { %v5261_v20 = vpop.eup %4652  ;;  %v4409_v21 = vpack.c.bf16 %v4562_v52, %v4561_v19  ;;  %v1000_v57 = vmul.f32 1.442695, %v988_v56 }
 0x311   : > { %v1010_v22 = vsel %vm960_vm6, %v5261_v20, 0.0 }
 0x312   : > { %4410 = vmatpush3.bf16.msra.mxu0 %v4409_v21  ;;  %1011 = vadd.xlane.f32.xlu0 %v1010_v22  ;;  %4658 = vpow2.f32 %v1000_v57 }
 0x313   : > { %4411 = vmatprep.subr.bf16.mxu0 %v4824_v10 }
 0x314   : > { %v5266_v58 = vpop.eup %4654 }
 0x315   : > { %v1013_v28 = vsel %vm960_vm6, %v5266_v58, 0.0  ;;  %v1355_v31 = vpop.xlane.xlu1 %1354 }
 0x316   : > { %1014 = vadd.xlane.f32.xlu1 %v1013_v28  ;;  %v1374_v25 = vsub.f32 %v5204_v7, %v1355_v31 }
 0x318   : > { %v5270_v30 = vpop.eup %4656  ;;  %v1381_v62 = vmul.f32 1.442695, %v1374_v25 }
 0x319   : > { %v1016_v37 = vsel %vm960_vm6, %v5270_v30, 0.0 }
 0x31a   : > { %1017 = vadd.xlane.f32.xlu1 %v1016_v37 }
 0x31c   : > { %v5289_v7 = vpop.eup %4658 }
 0x31d   : > { %v1361_v39 = vpop.xlane.xlu1 %1360  ;;  %v1019_v9 = vsel %vm960_vm6, %v5289_v7, 0.0 }
 0x31e   : > { %v1376_v54 = vsub.f32 %v5208_v16, %v1361_v39 }
 0x320   : > { %v1385_v5 = vmul.f32 1.442695, %v1376_v54 }
 0x321   : > { %v4565_v42 = vpop.permute.xlu1 %4564 }
 0x322   : > { %v4567_v48 = vunpack.i.h.bf16 %v4565_v42  ;;  %v4566_v49 = vunpack.i.l.bf16 %v4565_v42 }
 0x324   : > { %v4412_v53 = vpack.c.bf16 %v4567_v48, %v4566_v49 }
 0x326   : > { %4413 = vmatpush3.bf16.msra.mxu0 %v4412_v53 }
 0x327   : > { %4414 = vmatprep.subr.bf16.mxu0 %v4824_v10 }
 0x328   : > { %1051 = vrot.lane.b32.xlu0 %v5070_v45, %s4830_s16 }
 0x32b   : > { %4569 = vrot.lane.b32.xlu1 %v5066_v43, %s4830_s16  ;;  %s4835_s16 = smov 72  }
 0x32c   : > { %4574 = vrot.lane.b32.xlu0 %v5047_v29, %s4831_s25 }
 0x330   : > { %4579 = vrot.lane.b32.xlu0 %v5056_v36, %s4831_s25 }
 0x33e   : > { %v982_v61 = vpop.xlane.xlu0 %981 }
 0x33f   : > { %v989_v60 = vsub.f32 %v5222_v38, %v982_v61 }
 0x341   : > { %v1002_v63 = vmul.f32 1.442695, %v989_v60 }
 0x342   : > { %v1358_v1 = vpop.xlane.xlu0 %1357 }
 0x343   : > { %4660 = vpow2.f32 %v1002_v63  ;;  %v1375_v2 = vsub.f32 %v5227_v46, %v1358_v1 }
 0x344   : > { %4662 = vpow2.f32 %v1381_v62 }
 0x345   : > { %v1383_v3 = vmul.f32 1.442695, %v1375_v2 }
 0x346   : > { %v1364_v4 = vpop.xlane.xlu0 %1363 }
 0x347   : > { %4664 = vpow2.f32 %v1383_v3  ;;  %v1377_v0 = vsub.f32 %v5231_v51, %v1364_v4 }
 0x348   : > { %4666 = vpow2.f32 %v1385_v5 }
 0x349   : > { %v1387_v38 = vmul.f32 1.442695, %v1377_v0 }
 0x34a   : > { %v1370_v8 = vpop.xlane.xlu0 %1369 }
 0x34b   : > { %4668 = vpow2.f32 %v1387_v38  ;;  %v1379_v51 = vsub.f32 %v5235_v55, %v1370_v8 }
 0x34d   : > { %v5291_v6 = vpop.eup %4660  ;;  %v1391_v17 = vmul.f32 1.442695, %v1379_v51 }
 0x34e   : > { %v1022_v46 = vsel %vm979_vm7, %v5291_v6, 0.0  ;;  %v5297_v16 = vpop.eup %4662 }
 0x34f   : > { %1020 = vadd.xlane.f32.xlu0 %v1019_v9  ;;  %1023 = vadd.xlane.f32.xlu1 %v1022_v46  ;;  %v1395_v14 = vsel %vm960_vm6, %v5297_v16, 0.0 }
 0x351   : > { %v5302_v23 = vpop.eup %4664 }
 0x352   : > { %v1367_v12 = vpop.xlane.xlu1 %1366  ;;  %v1398_v52 = vsel %vm960_vm6, %v5302_v23, 0.0  ;;  %v5307_v19 = vpop.eup %4666 }
 0x353   : > { %v1378_v32 = vsub.f32 %v5239_v59, %v1367_v12  ;;  %1396 = vadd.xlane.f32.xlu1 %v1395_v14  ;;  %v1401_v22 = vsel %vm960_vm6, %v5307_v19, 0.0 }
 0x355   : > { %v1389_v44 = vmul.f32 1.442695, %v1378_v32  ;;  %v5312_v24 = vpop.eup %4668 }
 0x356   : > { %v1373_v18 = vpop.xlane.xlu1 %1372  ;;  %v1404_v59 = vsel %vm960_vm6, %v5312_v24, 0.0 }
 0x357   : > { %4670 = vpow2.f32 %v1389_v44  ;;  %v1380_v55 = vsub.f32 %v5244_v47, %v1373_v18  ;;  %1399 = vadd.xlane.f32.xlu1 %v1398_v52 }
 0x358   : > { %4672 = vpow2.f32 %v1391_v17 }
 0x359   : > { %v1393_v21 = vmul.f32 1.442695, %v1380_v55 }
 0x35b   : > { %1402 = vadd.xlane.f32.xlu1 %v1401_v22  ;;  %4674 = vpow2.f32 %v1393_v21 }
 0x35f   : > { %1405 = vadd.xlane.f32.xlu1 %v1404_v59 }
 0x361   : > { %v5316_v28 = vpop.eup %4670 }
 0x362   : > { %v1407_v31 = vsel %vm960_vm6, %v5316_v28, 0.0  ;;  %v5320_v47 = vpop.eup %4672 }
 0x363   : > { %1408 = vadd.xlane.f32.xlu1 %v1407_v31  ;;  %v1410_v37 = vsel %vm960_vm6, %v5320_v47, 0.0 }
 0x365   : > { %4584 = vrot.lane.b32.xlu0 %v5066_v43, %s4831_s25  ;;  %v5326_v39 = vpop.eup %4674 }
 0x366   : > { %v1413_v42 = vsel %vm979_vm7, %v5326_v39, 0.0 }
 0x367   : > { %1411 = vadd.xlane.f32.xlu1 %v1410_v37 }
 0x369   : > { %1442 = vrot.lane.b32.xlu0 %v5070_v45, %s4831_s25  ;;  %s4837_s25 = smov 40  }
 0x36b   : > { %1414 = vadd.xlane.f32.xlu1 %v1413_v42 }
 0x36d   : > { %4594 = vrot.lane.b32.xlu0 %v5056_v36, %s4832_s22 }
 0x371   : > { %4599 = vrot.lane.b32.xlu0 %v5066_v43, %s4832_s22 }
 0x375   : > { %1841 = vrot.lane.b32.xlu0 %v5070_v45, %s4832_s22 }
 0x379   : > { %1815 = vrot.lane.b32.xlu0 %v5041_v26, %s4833_s26 }
 0x37c   : > { %4589 = vrot.lane.b32.xlu1 %v5047_v29, %s4832_s22 }
 0x37d   : > { %1817 = vrot.lane.b32.xlu0 %v5043_v27, %s4833_s26 }
 0x380   : > { %1819 = vrot.lane.b32.xlu1 %v5050_v33, %s4833_s26 }
 0x381   : > { %1821 = vrot.lane.b32.xlu0 %v5052_v34, %s4833_s26 }
 0x384   : > { %1823 = vrot.lane.b32.xlu1 %v5059_v40, %s4833_s26 }
 0x385   : > { %1825 = vrot.lane.b32.xlu0 %v5061_v41, %s4833_s26 }
 0x388   : > { %1827 = vrot.lane.b32.xlu1 %v5070_v45, %s4833_s26  ;;  %s6128_s26 = scalar_lea.vmem %s6101_s5, %s4925_s15 }
 0x389   : > { %4604 = vrot.lane.b32.xlu0 %v5047_v29, %s4834_s27 }
 0x38c   : > { %4609 = vrot.lane.b32.xlu1 %v5056_v36, %s4834_s27 }
 0x390   : > { %4614 = vrot.lane.b32.xlu1 %v5066_v43, %s4834_s27 }
 0x397   : > { %v1006_v48 = vpop.xlane.xlu0 %1005 }
 0x398   : > { %4676 = vrcp.f32 %v1006_v48 }
 0x39b   : > { %v1009_v49 = vpop.xlane.xlu1 %1008 }
 0x39c   : > { %4678 = vrcp.f32 %v1009_v49 }
 0x39f   : > { %v1012_v53 = vpop.xlane.xlu0 %1011 }
 0x3a0   : > { %4680 = vrcp.f32 %v1012_v53 }
 0x3a2   : > { %v4677_v8 = vpop.eup %4676 }
 0x3a3   : > { %v1052_v56 = vpop.permute.xlu0 %1051  ;;  %v1015_v57 = vpop.xlane.xlu1 %1014  ;;  %v1032_v9 = vmul.f32 %v4677_v8, %v5252_v11 }
 0x3a4   : > { %4682 = vrcp.f32 %v1015_v57  ;;  %v792_v57 = vld [vmem:[%s6127_s14] sm:$0xff] }
 0x3a6   : > { %v4679_v46 = vpop.eup %4678 }
 0x3a7   : > { %v4575_v25 = vpop.permute.xlu0 %4574  ;;  %v1018_v61 = vpop.xlane.xlu1 %1017  ;;  %v1033_v51 = vmul.f32 %v4679_v46, %v5257_v15 }
 0x3a8   : > { %v4577_v60 = vunpack.i.h.bf16 %v4575_v25  ;;  %v4576_v62 = vunpack.i.l.bf16 %v4575_v25  ;;  %4684 = vrcp.f32 %v1018_v61 }
 0x3aa   : > { %v4430_v63 = vpack.c.bf16 %v4577_v60, %v4576_v62  ;;  %v4681_v12 = vpop.eup %4680 }
 0x3ab   : > { %v4580_v1 = vpop.permute.xlu0 %4579  ;;  %v4570_v2 = vpop.permute.xlu1 %4569  ;;  %v1034_v11 = vmul.f32 %v4681_v12, %v5261_v20 }
 0x3ac   : > { %v4582_v54 = vunpack.i.h.bf16 %v4580_v1  ;;  %v4581_v3 = vunpack.i.l.bf16 %v4580_v1  ;;  %v4572_v4 = vunpack.i.h.bf16 %v4570_v2  ;;  %v4571_v5 = vunpack.i.l.bf16 %v4570_v2  ;;  %4502 = vmatpush3.bf16.msra.mxu1 %v4430_v63 }
 0x3ad   : > { %4499 = vmatprep.subr.bf16.mxu1 %v4824_v10 }
 0x3ae   : > { %v4433_v0 = vpack.c.bf16 %v4582_v54, %v4581_v3  ;;  %v4415_v38 = vpack.c.bf16 %v4572_v4, %v4571_v5  ;;  %v4683_v14 = vpop.eup %4682 }
 0x3af   : > { %v1035_v15 = vmul.f32 %v4683_v14, %v5266_v58 }
 0x3b0   : > { %4416 = vmatpush3.bf16.msra.mxu0 %v4415_v38  ;;  %4503 = vmatpush3.bf16.msra.mxu1 %v4433_v0 }
 0x3b1   : > { %3999 = vmatprep.subr.mxu0 %v4826_v13  ;;  %4500 = vmatprep.subr.bf16.mxu1 %v4824_v10 }
 0x3b2   : > { %v4685_v32 = vpop.eup %4684 }
 0x3b3   : > { %v1036_v17 = vmul.f32 %v4685_v32, %v5270_v30 }
 0x3b4   : > { %4000 = vmatpush3.msk.msra.mxu0 %vm1080_vm8, %v1052_v56 }
 0x3b5   : > { %4002 = vmatmul.mubr.msk.f32.vlgmr.msra.gmra.mrb[14].mxu0 %vm960_vm6, %v1032_v9  ;;  %4429 = vmatprep.subr.bf16.mxu0 %v4824_v10 }
 0x3b6   : > { %4431 = vmatpush3.bf16.msra.mxu0 %v4430_v63  ;;  %4004 = vmatprep.mubr.msk.f32.mxu0 %vm4825_vm2, %v4826_v13 }
 0x3b7   : > { %4432 = vmatprep.subr.bf16.mxu0 %v4824_v10 }
 0x3b9   : > { %4005 = vmatmul.mubr.msk.f32.gmra.mrb[16].mxu0 %vm960_vm6, %v1033_v51 }
 0x3ba   : > { %4434 = vmatpush3.bf16.msra.mxu0 %v4433_v0  ;;  %4007 = vmatprep.mubr.msk.f32.mxu0 %vm4825_vm2, %v4826_v13 }
 0x3bb   : > { %4435 = vmatprep.subr.bf16.mxu0 %v4824_v10 }
 0x3bd   : > { %4008 = vmatmul.mubr.msk.f32.gmra.mrb[18].mxu0 %vm960_vm6, %v1034_v11 }
 0x3be   : > { %4010 = vmatprep.mubr.msk.f32.mxu0 %vm4825_vm2, %v4826_v13 }
 0x3c1   : > { %4011 = vmatmul.mubr.msk.f32.gmra.mrb[20].mxu0 %vm960_vm6, %v1035_v15 }
 0x3c2   : > { %4013 = vmatprep.mubr.msk.f32.mxu0 %vm4825_vm2, %v4826_v13 }
 0x3c5   : > { %4014 = vmatmul.mubr.msk.f32.gmra.mrb[22].mxu0 %vm960_vm6, %v1036_v17 }
 0x3c6   : > { %4016 = vmatprep.mubr.msk.f32.mxu0 %vm4825_vm2, %v4826_v13 }
 0x3dc   : > { %v1021_v20 = vpop.xlane.xlu0 %1020  ;;  %v1024_v44 = vpop.xlane.xlu1 %1023 }
 0x3dd   : > { %4686 = vrcp.f32 %v1021_v20 }
 0x3de   : > { %4688 = vrcp.f32 %v1024_v44 }
 0x3e0   : > { %v4585_v18 = vpop.permute.xlu0 %4584  ;;  %v1397_v52 = vpop.xlane.xlu1 %1396 }
 0x3e1   : > { %v4587_v58 = vunpack.i.h.bf16 %v4585_v18  ;;  %v4586_v55 = vunpack.i.l.bf16 %v4585_v18  ;;  %4690 = vrcp.f32 %v1397_v52 }
 0x3e3   : > { %v4436_v21 = vpack.c.bf16 %v4587_v58, %v4586_v55 }
 0x3e4   : > { %v1400_v22 = vpop.xlane.xlu1 %1399  ;;  %v1443_v59 = vpop.permute.xlu0 %1442 }
 0x3e5   : > { %4437 = vmatpush3.bf16.msra.mxu0 %v4436_v21  ;;  %4504 = vmatpush3.bf16.msra.mxu1 %v4436_v21  ;;  %4692 = vrcp.f32 %v1400_v22 }
 0x3e6   : > { %4501 = vmatprep.subr.mxu1 %v4826_v13  ;;  %4069 = vmatprep.subr.mxu0 %v4826_v13 }
 0x3e7   : > { %v4687_v30 = vpop.eup %4686 }
 0x3e8   : > { %v1403_v31 = vpop.xlane.xlu1 %1402  ;;  %v1037_v37 = vmul.f32 %v4687_v30, %v5289_v7  ;;  %v4689_v42 = vpop.eup %4688 }
 0x3e9   : > { %4070 = vmatpush3.msk.msra.mxu0 %vm1080_vm8, %v1443_v59  ;;  %4505 = vmatpush3.msk.msra.mxu1 %vm1080_vm8, %v1443_v59  ;;  %4694 = vrcp.f32 %v1403_v31  ;;  %v1038_v49 = vmul.f32 %v4689_v42, %v5291_v6 }
 0x3ea   : > { %4017 = vmatmul.mubr.msk.f32.gmra.mrb[24].mxu0 %vm960_vm6, %v1037_v37  ;;  %4115 = vmatprep.subr.mxu0 %v4826_v13 }
 0x3eb   : > { %4019 = vmatprep.mubr.msk.f32.mxu0 %vm4825_vm2, %v4826_v13  ;;  %4092 = vmatprep.subr.mxu1 %v4826_v13  ;;  %v4691_v7 = vpop.eup %4690 }
 0x3ec   : > { %v1406_v48 = vpop.xlane.xlu1 %1405  ;;  %v1423_v53 = vmul.f32 %v4691_v7, %v5297_v16 }
 0x3ed   : > { %4696 = vrcp.f32 %v1406_v48 }
 0x3ee   : > { %4020 = vmatmul.mubr.msk.f32.gmra.mrb[26].mxu0 %vm960_vm6, %v1038_v49 }
 0x3ef   : > { %4071 = vmatprep.mubr.msk.f32.mxu0 %vm4825_vm2, %v4826_v13  ;;  %v4693_v25 = vpop.eup %4692 }
 0x3f0   : > { %v1409_v56 = vpop.xlane.xlu1 %1408  ;;  %v1424_v61 = vmul.f32 %v4693_v25, %v5302_v23 }
 0x3f1   : > { %4698 = vrcp.f32 %v1409_v56 }
 0x3f2   : > { %4072 = vmatmul.mubr.msk.f32.vlgmr.msra.gmra.mrb[28].mxu0 %vm960_vm6, %v1423_v53 }
 0x3f3   : > { %4074 = vmatprep.mubr.msk.f32.mxu0 %vm4825_vm2, %v4826_v13  ;;  %4116 = vmatpush3.msra.mxu0 %v792_v57  ;;  %v4695_v60 = vpop.eup %4694 }
 0x3f4   : > { %v1412_v6 = vpop.xlane.xlu1 %1411  ;;  %4450 = vmatprep.subr.bf16.mxu0 %v4824_v10  ;;  %v1425_v62 = vmul.f32 %v4695_v60, %v5307_v19 }
 0x3f5   : > { %4700 = vrcp.f32 %v1412_v6 }
 0x3f6   : > { %4075 = vmatmul.mubr.msk.f32.gmra.mrb[30].mxu0 %vm960_vm6, %v1424_v61 }
 0x3f7   : > { %4077 = vmatprep.mubr.msk.f32.mxu0 %vm4825_vm2, %v4826_v13  ;;  %v4697_v63 = vpop.eup %4696 }
 0x3f8   : > { %v1415_v16 = vpop.xlane.xlu1 %1414  ;;  %v1426_v23 = vmul.f32 %v4697_v63, %v5312_v24  ;;  %v793_v24 = vld [vmem:[%s6127_s14 + $0x8] sm:$0xff] }
 0x3f9   : > { %4702 = vrcp.f32 %v1415_v16 }
 0x3fa   : > { %4078 = vmatmul.mubr.msk.f32.gmra.mrb[32].mxu0 %vm960_vm6, %v1425_v62 }
 0x3fb   : > { %4080 = vmatprep.mubr.msk.f32.mxu0 %vm4825_vm2, %v4826_v13  ;;  %v4699_v1 = vpop.eup %4698 }
 0x3fc   : > { %v1427_v2 = vmul.f32 %v4699_v1, %v5316_v28  ;;  %v5422_v28 = vpop.permute.xlu0 %4594  ;;  %v4590_v0 = vpop.permute.xlu1 %4589 }
 0x3fd   : > { %v4592_v25 = vunpack.i.h.bf16 %v4590_v0  ;;  %v4591_v6 = vunpack.i.l.bf16 %v4590_v0  ;;  %v4596_v1 = vunpack.i.l.bf16 %v5422_v28 }
 0x3fe   : > { %4081 = vmatmul.mubr.msk.f32.gmra.mrb[34].mxu0 %vm960_vm6, %v1426_v23  ;;  %v4597_v23 = vunpack.i.h.bf16 %v5422_v28 }
 0x3ff   : > { %4083 = vmatprep.mubr.msk.f32.mxu0 %vm4825_vm2, %v4826_v13  ;;  %v4701_v54 = vpop.eup %4700  ;;  %v4439_v16 = vpack.c.bf16 %v4592_v25, %v4591_v6 }
 0x400   : > { %v1428_v4 = vmul.f32 %v4701_v54, %v5320_v47  ;;  %v5424_v5 = vpop.permute.xlu0 %4599  ;;  %v5432_v8 = vpop.permute.xlu1 %1819 }
 0x401   : > { %v4601_v28 = vunpack.i.l.bf16 %v5424_v5 }
 0x402   : > { %4084 = vmatmul.mubr.msk.f32.gmra.mrb[36].mxu0 %vm960_vm6, %v1427_v2 }
 0x403   : > { %v4703_v19 = vpop.eup %4702  ;;  %4086 = vmatprep.mubr.msk.f32.mxu0 %vm4825_vm2, %v4826_v13 }
 0x404   : > { %v1429_v3 = vmul.f32 %v4703_v19, %v5326_v39  ;;  %v5426_v39 = vpop.permute.xlu0 %1841  ;;  %v5436_v46 = vpop.permute.xlu1 %1823  ;;  %v4443_v19 = vpack.c.bf16 %v4597_v23, %v4596_v1 }
 0x406   : > { %4087 = vmatmul.mubr.msk.f32.gmra.mrb[38].mxu0 %vm960_vm6, %v1428_v4  ;;  %4090 = vmatmul.mubr.msk.f32.vlgmr.msra.gmra.mrb[28].mxu1 %vm960_vm6, %v1429_v3 }
 0x407   : > { %4117 = vmatprep.mubr.msk.f32.mxu0 %vm4825_vm2, %v4826_v13  ;;  %4094 = vmatprep.mubr.msk.f32.mxu1 %vm4825_vm2, %v4826_v13 }
 0x408   : > { %4093 = vmatpush3.msra.mxu1 %v793_v24  ;;  %v5428_v47 = vpop.permute.xlu0 %1815  ;;  %v5440_v12 = vpop.permute.xlu1 %1827  ;;  %v4602_v24 = vunpack.i.h.bf16 %v5424_v5 }
 0x409   : > { %4438 = vmatprep.subr.bf16.mxu1 %v4824_v10 }
 0x40c   : > { %v5430_v38 = vpop.permute.xlu0 %1817  ;;  %v4610_v14 = vpop.permute.xlu1 %4609 }
 0x40d   : > { %v4612_v20 = vunpack.i.h.bf16 %v4610_v14  ;;  %v4611_v44 = vunpack.i.l.bf16 %v4610_v14  ;;  %v4447_v14 = vpack.c.bf16 %v4602_v24, %v4601_v28 }
 0x40f   : > { %v4454_v55 = vpack.c.bf16 %v4612_v20, %v4611_v44 }
 0x410   : > { %v5434_v9 = vpop.permute.xlu0 %1821  ;;  %v4615_v52 = vpop.permute.xlu1 %4614 }
 0x411   : > { %v4617_v21 = vunpack.i.h.bf16 %v4615_v52  ;;  %v4616_v22 = vunpack.i.l.bf16 %v4615_v52 }
 0x413   : > { %v4457_v31 = vpack.c.bf16 %v4617_v21, %v4616_v22 }
 0x414   : > { %v5438_v51 = vpop.permute.xlu0 %1825 }
 0x418   : > { %v4605_v11 = vpop.permute.xlu0 %4604 }
 0x419   : > { %v4607_v15 = vunpack.i.h.bf16 %v4605_v11  ;;  %v4606_v32 = vunpack.i.l.bf16 %v4605_v11 }
 0x41b   : > { %v4451_v17 = vpack.c.bf16 %v4607_v15, %v4606_v32 }
 0x488   : > { %v1149_v18 = vpop.f32.mrb[14].mxu0 }
 0x489   : > { %v4003_v58 = vpop.f32.mrb[15].mxu0  ;;  %4118 = vmatmul.mubr.msk.f32.vlgmr.msra.gmra.mrb[40].mxu0 %vm817_vm4, %v1149_v18 }
 0x48a   : > { %4452 = vmatpush3.bf16.msra.mxu0 %v4451_v17  ;;  %4120 = vmatprep.mubr.msk.f32.mxu0 %vm4825_vm2, %v4826_v13 }
 0x48b   : > { %4453 = vmatprep.subr.bf16.mxu0 %v4824_v10 }
 0x48c   : > { %v1154_v30 = vpop.f32.mrb[16].mxu0 }
 0x48d   : > { %v4006_v59 = vpop.f32.mrb[17].mxu0  ;;  %4121 = vmatmul.mubr.msk.f32.gmra.mrb[42].mxu0 %vm817_vm4, %v1154_v30 }
 0x48e   : > { %4455 = vmatpush3.bf16.msra.mxu0 %v4454_v55  ;;  %4123 = vmatprep.mubr.msk.f32.mxu0 %vm4825_vm2, %v4826_v13 }
 0x48f   : > { %4456 = vmatprep.subr.bf16.mxu0 %v4824_v10 }
 0x490   : > { %v1159_v37 = vpop.f32.mrb[18].mxu0 }
 0x491   : > { %v4009_v42 = vpop.f32.mrb[19].mxu0  ;;  %4124 = vmatmul.mubr.msk.f32.gmra.mrb[44].mxu0 %vm817_vm4, %v1159_v37 }
 0x492   : > { %4458 = vmatpush3.bf16.msra.mxu0 %v4457_v31  ;;  %4126 = vmatprep.mubr.msk.f32.mxu0 %vm4825_vm2, %v4826_v13 }
 0x493   : > { %4185 = vmatprep.subr.mxu0 %v4826_v13 }
 0x494   : > { %v1164_v48 = vpop.f32.mrb[20].mxu0 }
 0x495   : > { %v4012_v49 = vpop.f32.mrb[21].mxu0  ;;  %4127 = vmatmul.mubr.msk.f32.gmra.mrb[46].mxu0 %vm817_vm4, %v1164_v48 }
 0x496   : > { %4129 = vmatprep.mubr.msk.f32.mxu0 %vm4825_vm2, %v4826_v13 }
 0x498   : > { %v1169_v7 = vpop.f32.mrb[22].mxu0 }
 0x499   : > { %v4015_v53 = vpop.f32.mrb[23].mxu0  ;;  %4130 = vmatmul.mubr.msk.f32.gmra.mrb[48].mxu0 %vm817_vm4, %v1169_v7 }
 0x49a   : > { %4132 = vmatprep.mubr.msk.f32.mxu0 %vm4825_vm2, %v4826_v13 }
 0x4bd   : > { %v1174_v56 = vpop.f32.mrb[24].mxu0 }
 0x4be   : > { %v4018_v57 = vpop.f32.mrb[25].mxu0  ;;  %4133 = vmatmul.mubr.msk.f32.gmra.mrb[50].mxu0 %vm817_vm4, %v1174_v56 }
 0x4bf   : > { %4135 = vmatprep.mubr.msk.f32.mxu0 %vm4825_vm2, %v4826_v13 }
 0x4c1   : > { %v1179_v61 = vpop.f32.mrb[26].mxu0 }
 0x4c2   : > { %v4021_v60 = vpop.f32.mrb[27].mxu0  ;;  %4136 = vmatmul.mubr.msk.f32.gmra.mrb[52].mxu0 %vm817_vm4, %v1179_v61 }
 0x4c3   : > { %4187 = vmatprep.mubr.msk.f32.mxu0 %vm4825_vm2, %v4826_v13 }
 0x4c5   : > { %v1539_v62 = vpop.f32.mrb[28].mxu0 }
 0x4c6   : > { %v4073_v63 = vpop.f32.mrb[29].mxu0  ;;  %4095 = vmatmul.mubr.msk.f32.vlgmr.msra.gmra.mrb[30].mxu1 %vm817_vm4, %v1539_v62 }
 0x4c7   : > { %4441 = vmatpush3.bf16.xpose.msk.msra.mxu1 %vm5084_vm5, %v4439_v16  ;;  %4097 = vmatprep.mubr.msk.f32.mxu1 %vm4825_vm2, %v4826_v13 }
 0x4c8   : > { %4442 = vmatprep.subr.bf16.mxu1 %v4824_v10 }
 0x4c9   : > { %v1544_v2 = vpop.f32.mrb[30].mxu0 }
 0x4ca   : > { %v4076_v54 = vpop.f32.mrb[31].mxu0  ;;  %4098 = vmatmul.mubr.msk.f32.gmra.mrb[32].mxu1 %vm817_vm4, %v1544_v2 }
 0x4cb   : > { %4100 = vmatprep.mubr.msk.f32.mxu1 %vm4825_vm2, %v4826_v13 }
 0x4cd   : > { %v1549_v3 = vpop.f32.mrb[32].mxu0 }
 0x4ce   : > { %v4079_v4 = vpop.f32.mrb[33].mxu0  ;;  %4101 = vmatmul.mubr.msk.f32.gmra.mrb[34].mxu1 %vm817_vm4, %v1549_v3 }
 0x4cf   : > { %4445 = vmatpush3.bf16.xpose.msk.msra.mxu1 %vm5084_vm5, %v4443_v19  ;;  %4103 = vmatprep.mubr.msk.f32.mxu1 %vm4825_vm2, %v4826_v13  ;;  %v5548_v4 = vld [vmem:[%s6126_s21] sm:$0xff] }
 0x4d0   : > { %4446 = vmatprep.subr.bf16.mxu1 %v4824_v10 }
 0x4d1   : > { %v1554_v0 = vpop.f32.mrb[34].mxu0 }
 0x4d2   : > { %v4082_v11 = vpop.f32.mrb[35].mxu0  ;;  %4104 = vmatmul.mubr.msk.f32.gmra.mrb[36].mxu1 %vm817_vm4, %v1554_v0 }
 0x4d3   : > { %4106 = vmatprep.mubr.msk.f32.mxu1 %vm4825_vm2, %v4826_v13 }
 0x4d5   : > { %v1559_v15 = vpop.f32.mrb[36].mxu0 }
 0x4d6   : > { %v4085_v32 = vpop.f32.mrb[37].mxu0  ;;  %4107 = vmatmul.mubr.msk.f32.gmra.mrb[38].mxu1 %vm817_vm4, %v1559_v15  ;;  %v5555_v15 = vld [vmem:[%s6126_s21 + $0x8] sm:$0xff] }
 0x4d7   : > { %4449 = vmatpush3.bf16.xpose.msk.msra.mxu1 %vm5084_vm5, %v4447_v14  ;;  %4109 = vmatprep.mubr.msk.f32.mxu1 %vm4825_vm2, %v4826_v13 }
 0x4d8   : > { %4150 = vmatprep.subr.mxu1 %v4826_v13 }
 0x4d9   : > { %v1564_v5 = vpop.f32.mrb[38].mxu0  ;;  %v1569_v17 = vpop.f32.mrb[28].mxu1 }
 0x4da   : > { %v4088_v20 = vpop.f32.mrb[39].mxu0  ;;  %v4091_v44 = vpop.f32.mrb[29].mxu1  ;;  %4110 = vmatmul.mubr.msk.f32.gmra.mrb[40].mxu1 %vm817_vm4, %v1564_v5 }
 0x4db   : > { %4112 = vmatprep.mubr.msk.f32.mxu1 %vm4825_vm2, %v4826_v13 }
 0x4de   : > { %4113 = vmatmul.mubr.msk.f32.gmra.mrb[42].mxu1 %vm817_vm4, %v1569_v17 }
 0x4df   : > { %4151 = vmatpush3.xpose.msk.msra.mxu1 %vm817_vm4, %v5426_v39  ;;  %4152 = vmatprep.mubr.msk.f32.mxu1 %vm4825_vm2, %v4826_v13 }
 0x4e0   : > { %4208 = vmatprep.subr.mxu1 %v4826_v13 }
 0x4e2   : > { %4153 = vmatmul.mubr.msk.f32.vlgmr.msra.gmra.mrb[44].mxu1 %vm817_vm4, %v5428_v47 }
 0x4e3   : > { %4155 = vmatprep.mubr.msk.f32.mxu1 %vm4825_vm2, %v4826_v13 }
 0x4e6   : > { %4156 = vmatmul.mubr.msk.f32.gmra.mrb[46].mxu1 %vm817_vm4, %v5430_v38 }
 0x4e7   : > { %4158 = vmatprep.mubr.msk.f32.mxu1 %vm4825_vm2, %v4826_v13 }
 0x4ea   : > { %4159 = vmatmul.mubr.msk.f32.gmra.mrb[48].mxu1 %vm817_vm4, %v5432_v8 }
 0x4eb   : > { %4161 = vmatprep.mubr.msk.f32.mxu1 %vm4825_vm2, %v4826_v13 }
 0x4ee   : > { %4162 = vmatmul.mubr.msk.f32.gmra.mrb[50].mxu1 %vm817_vm4, %v5434_v9 }
 0x4ef   : > { %4164 = vmatprep.mubr.msk.f32.mxu1 %vm4825_vm2, %v4826_v13 }
 0x4f2   : > { %4165 = vmatmul.mubr.msk.f32.gmra.mrb[52].mxu1 %vm817_vm4, %v5436_v46 }
 0x4f3   : > { %4167 = vmatprep.mubr.msk.f32.mxu1 %vm4825_vm2, %v4826_v13 }
 0x4f6   : > { %4168 = vmatmul.mubr.msk.f32.gmra.mrb[54].mxu1 %vm817_vm4, %v5438_v51 }
 0x4f7   : > { %4170 = vmatprep.mubr.msk.f32.mxu1 %vm4825_vm2, %v4826_v13 }
 0x4fa   : > { %4171 = vmatmul.mubr.msk.f32.gmra.mrb[56].mxu1 %vm817_vm4, %v5440_v12 }
 0x4fb   : > { %4210 = vmatprep.mubr.msk.f32.mxu1 %vm4825_vm2, %v4826_v13 }
 0x55c   : > { %v1781_v39 = vpop.f32.mrb[40].mxu0 }
 0x55d   : > { %v4119_v47 = vpop.f32.mrb[41].mxu0 }
 0x560   : > { %v1786_v38 = vpop.f32.mrb[42].mxu0 }
 0x561   : > { %v4122_v8 = vpop.f32.mrb[43].mxu0 }
 0x564   : > { %v1791_v9 = vpop.f32.mrb[44].mxu0 }
 0x565   : > { %v4125_v46 = vpop.f32.mrb[45].mxu0 }
 0x568   : > { %v1796_v18 = vpop.f32.mrb[46].mxu0 }
 0x569   : > { %v4128_v52 = vpop.f32.mrb[47].mxu0 }
 0x56c   : > { %v1801_v58 = vpop.f32.mrb[48].mxu0 }
 0x56d   : > { %v4131_v55 = vpop.f32.mrb[49].mxu0 }
 0x591   : > { %v1806_v51 = vpop.f32.mrb[50].mxu0 }
 0x592   : > { %v4134_v21 = vpop.f32.mrb[51].mxu0 }
 0x595   : > { %v1811_v22 = vpop.f32.mrb[52].mxu0 }
 0x596   : > { %v4137_v30 = vpop.f32.mrb[53].mxu0 }
 0x599   : > { %v1660_v59 = vpop.f32.mrb[30].mxu1 }
 0x59a   : > { %v5531_v31 = vadd.f32 %v1781_v39, %v1660_v59  ;;  %v4096_v12 = vpop.f32.mrb[31].mxu1  ;;  %v5562_v39 = vld [vmem:[%s6126_s21 + $0x10] sm:$0xff] }
 0x59d   : > { %v1665_v37 = vpop.f32.mrb[32].mxu1 }
 0x59e   : > { %v5533_v42 = vadd.f32 %v1786_v38, %v1665_v37  ;;  %v4099_v48 = vpop.f32.mrb[33].mxu1 }
 0x5a1   : > { %v1670_v49 = vpop.f32.mrb[34].mxu1 }
 0x5a2   : > { %v5535_v7 = vadd.f32 %v1791_v9, %v1670_v49  ;;  %v4102_v53 = vpop.f32.mrb[35].mxu1  ;;  %v5583_v49 = vld [vmem:[%s6126_s21 + $0x28] sm:$0xff] }
 0x5a5   : > { %v1675_v56 = vpop.f32.mrb[36].mxu1 }
 0x5a6   : > { %v5537_v57 = vadd.f32 %v1796_v18, %v1675_v56  ;;  %v4105_v25 = vpop.f32.mrb[37].mxu1  ;;  %v5569_v18 = vld [vmem:[%s6126_s21 + $0x18] sm:$0xff] }
 0x5a9   : > { %v1680_v6 = vpop.f32.mrb[38].mxu1 }
 0x5aa   : > { %v5539_v61 = vadd.f32 %v1801_v58, %v1680_v6  ;;  %v4108_v60 = vpop.f32.mrb[39].mxu1 }
 0x5ad   : > { %v1685_v16 = vpop.f32.mrb[40].mxu1 }
 0x5ae   : > { %v5541_v62 = vadd.f32 %v1806_v51, %v1685_v16  ;;  %v4111_v63 = vpop.f32.mrb[41].mxu1 }
 0x5b1   : > { %v1690_v23 = vpop.f32.mrb[42].mxu1 }
 0x5b2   : > { %v5543_v1 = vadd.f32 %v1811_v22, %v1690_v23  ;;  %v4114_v2 = vpop.f32.mrb[43].mxu1  ;;  %v5576_v22 = vld [vmem:[%s6126_s21 + $0x20] sm:$0xff] }
 0x5b5   : > { %v1937_v54 = vpop.f32.mrb[44].mxu1 }
 0x5b6   : > { %v1971_v19 = vmul.f32 0.35355338, %v1937_v54  ;;  %v4154_v3 = vpop.f32.mrb[45].mxu1 }
 0x5b8   : > { %v1978_v24 = vadd.f32 %v5548_v4, %v1971_v19 }
 0x5b9   : > { %v1942_v28 = vpop.f32.mrb[46].mxu1 }
 0x5ba   : > { %v1972_v0 = vmul.f32 0.35355338, %v1942_v28  ;;  %v4157_v11 = vpop.f32.mrb[47].mxu1  ;;  %v1985_v14 = vsel %vm960_vm6, %v1978_v24, -inf }
 0x5bb   : > { %1986 = vmax.xlane.f32.xlu0 %v1985_v14 }
 0x5bc   : > { %v1979_v32 = vadd.f32 %v5555_v15, %v1972_v0 }
 0x5bd   : > { %v1947_v5 = vpop.f32.mrb[48].mxu1 }
 0x5be   : > { %v1973_v17 = vmul.f32 0.35355338, %v1947_v5  ;;  %v4160_v20 = vpop.f32.mrb[49].mxu1  ;;  %v1988_v44 = vsel %vm960_vm6, %v1979_v32, -inf }
 0x5bf   : > { %1989 = vmax.xlane.f32.xlu1 %v1988_v44 }
 0x5c0   : > { %v1980_v47 = vadd.f32 %v5562_v39, %v1973_v17 }
 0x5c1   : > { %v1952_v38 = vpop.f32.mrb[50].mxu1 }
 0x5c2   : > { %v1974_v8 = vmul.f32 0.35355338, %v1952_v38  ;;  %v4163_v9 = vpop.f32.mrb[51].mxu1  ;;  %v1991_v46 = vsel %vm960_vm6, %v1980_v47, -inf }
 0x5c3   : > { %1992 = vmax.xlane.f32.xlu0 %v1991_v46 }
 0x5c4   : > { %v1981_v52 = vadd.f32 %v5569_v18, %v1974_v8 }
 0x5c5   : > { %v1957_v58 = vpop.f32.mrb[52].mxu1 }
 0x5c6   : > { %v1975_v55 = vmul.f32 0.35355338, %v1957_v58  ;;  %v4166_v51 = vpop.f32.mrb[53].mxu1  ;;  %v1994_v21 = vsel %vm960_vm6, %v1981_v52, -inf }
 0x5c7   : > { %1995 = vmax.xlane.f32.xlu0 %v1994_v21 }
 0x5c8   : > { %v1982_v30 = vadd.f32 %v5576_v22, %v1975_v55 }
 0x5c9   : > { %v1962_v59 = vpop.f32.mrb[54].mxu1 }
 0x5ca   : > { %v1976_v12 = vmul.f32 0.35355338, %v1962_v59  ;;  %v4169_v37 = vpop.f32.mrb[55].mxu1  ;;  %v1997_v48 = vsel %vm960_vm6, %v1982_v30, -inf }
 0x5cb   : > { %1998 = vmax.xlane.f32.xlu1 %v1997_v48 }
 0x5cc   : > { %v1983_v53 = vadd.f32 %v5583_v49, %v1976_v12 }
 0x5cd   : > { %v1967_v56 = vpop.f32.mrb[56].mxu1 }
 0x5ce   : > { %v1977_v25 = vmul.f32 0.35355338, %v1967_v56  ;;  %v4172_v6 = vpop.f32.mrb[57].mxu1  ;;  %v2000_v60 = vsel %vm960_vm6, %v1983_v53, -inf }
 0x5cf   : > { %2001 = vmax.xlane.f32.xlu0 %v2000_v60 }
 0x5d0   : > { %v1984_v16 = vadd.f32 %v1977_v25, %v5219_v35 }
 0x5d2   : > { %v2003_v63 = vsel %vm979_vm7, %v1984_v16, -inf }
 0x5d3   : > { %2004 = vmax.xlane.f32.xlu1 %v2003_v63 }
 0x5e4   : > { %4619 = vrot.lane.b32.xlu1 %v5047_v29, %s4835_s16 }
 0x5e5   : > { %2074 = vrot.lane.b32.xlu0 %v5070_v45, %s4834_s27  ;;  %s4836_s27 = smov 104  }
 0x648   : > { %v1987_v23 = vpop.xlane.xlu0 %1986 }
 0x649   : > { %v2006_v2 = vsub.f32 %v1978_v24, %v1987_v23 }
 0x64b   : > { %v2013_v54 = vmul.f32 1.442695, %v2006_v2 }
 0x64c   : > { %v1990_v19 = vpop.xlane.xlu1 %1989 }
 0x64d   : > { %4704 = vpow2.f32 %v2013_v54  ;;  %v2007_v3 = vsub.f32 %v1979_v32, %v1990_v19 }
 0x64f   : > { %v2015_v28 = vmul.f32 1.442695, %v2007_v3 }
 0x650   : > { %v1993_v0 = vpop.xlane.xlu0 %1992 }
 0x651   : > { %4706 = vpow2.f32 %v2015_v28  ;;  %v2008_v35 = vsub.f32 %v1980_v47, %v1993_v0 }
 0x653   : > { %v2017_v11 = vmul.f32 1.442695, %v2008_v35 }
 0x654   : > { %v1996_v5 = vpop.xlane.xlu0 %1995 }
 0x655   : > { %4708 = vpow2.f32 %v2017_v11  ;;  %v2009_v51 = vsub.f32 %v1981_v52, %v1996_v5 }
 0x657   : > { %v4705_v14 = vpop.eup %4704  ;;  %v2019_v21 = vmul.f32 1.442695, %v2009_v51 }
 0x658   : > { %v1999_v17 = vpop.xlane.xlu1 %1998  ;;  %v2027_v20 = vsel %vm960_vm6, %v4705_v14, 0.0 }
 0x659   : > { %v2010_v44 = vsub.f32 %v1982_v30, %v1999_v17  ;;  %2028 = vadd.xlane.f32.xlu0 %v2027_v20 }
 0x65b   : > { %v4707_v38 = vpop.eup %4706  ;;  %v2021_v8 = vmul.f32 1.442695, %v2010_v44 }
 0x65c   : > { %v2002_v24 = vpop.xlane.xlu0 %2001  ;;  %v2030_v9 = vsel %vm960_vm6, %v4707_v38, 0.0 }
 0x65d   : > { %4710 = vpow2.f32 %v2021_v8  ;;  %2031 = vadd.xlane.f32.xlu1 %v2030_v9  ;;  %v2011_v30 = vsub.f32 %v1983_v53, %v2002_v24 }
 0x65e   : > { %4712 = vpow2.f32 %v2019_v21 }
 0x65f   : > { %v5595_v32 = vpop.eup %4708  ;;  %v2023_v59 = vmul.f32 1.442695, %v2011_v30 }
 0x660   : > { %v2075_v46 = vpop.permute.xlu0 %2074  ;;  %v2033_v47 = vsel %vm960_vm6, %v5595_v32, 0.0  ;;  %v2005_v12 = vpop.xlane.xlu1 %2004 }
 0x661   : > { %4186 = vmatpush3.msk.msra.mxu0 %vm1080_vm8, %v2075_v46  ;;  %2034 = vadd.xlane.f32.xlu1 %v2033_v47  ;;  %4714 = vpow2.f32 %v2023_v59  ;;  %v2012_v37 = vsub.f32 %v1984_v16, %v2005_v12 }
 0x662   : > { %4459 = vmatprep.subr.bf16.mxu0 %v4824_v10 }
 0x663   : > { %v2025_v56 = vmul.f32 1.442695, %v2012_v37  ;;  %v794_v37 = vld [vmem:[%s6127_s14 + $0x10] sm:$0xff] }
 0x664   : > { %v4620_v16 = vpop.permute.xlu1 %4619  ;;  %4209 = vmatpush3.msra.mxu1 %v794_v37 }
 0x665   : > { %4716 = vpow2.f32 %v2025_v56  ;;  %v4622_v54 = vunpack.i.h.bf16 %v4620_v16  ;;  %4471 = vmatprep.subr.bf16.mxu1 %v4824_v10 }
 0x667   : > { %v5601_v58 = vpop.eup %4710 }
 0x668   : > { %v2039_v55 = vsel %vm960_vm6, %v5601_v58, 0.0  ;;  %v4713_v48 = vpop.eup %4712 }
 0x669   : > { %2040 = vadd.xlane.f32.xlu1 %v2039_v55  ;;  %v2036_v25 = vsel %vm960_vm6, %v4713_v48, 0.0 }
 0x66b   : > { %v5610_v6 = vpop.eup %4714 }
 0x66c   : > { %v2042_v52 = vsel %vm960_vm6, %v5610_v6, 0.0 }
 0x66f   : > { %4624 = vrot.lane.b32.xlu0 %v5056_v36, %s4835_s16  ;;  %v5614_v60 = vpop.eup %4716 }
 0x670   : > { %v2045_v53 = vsel %vm979_vm7, %v5614_v60, 0.0 }
 0x67a   : > { %2359 = vrot.lane.b32.xlu1 %v5070_v45, %s4835_s16 }
 0x68e   : > { %2037 = vadd.xlane.f32.xlu0 %v2036_v25 }
 0x692   : > { %2043 = vadd.xlane.f32.xlu0 %v2042_v52 }
 0x69e   : > { %2046 = vadd.xlane.f32.xlu1 %v2045_v53 }
 0x6a8   : > { %4629 = vrot.lane.b32.xlu0 %v5066_v43, %s4835_s16 }
 0x6ac   : > { %2333 = vrot.lane.b32.xlu0 %v5041_v26, %s4836_s27  ;;  %v4621_v26 = vunpack.i.l.bf16 %v4620_v16 }
 0x6af   : > { %2335 = vrot.lane.b32.xlu1 %v5043_v27, %s4836_s27 }
 0x6b0   : > { %2337 = vrot.lane.b32.xlu0 %v5050_v33, %s4836_s27  ;;  %v4460_v33 = vpack.c.bf16 %v4622_v54, %v4621_v26 }
 0x6b3   : > { %2339 = vrot.lane.b32.xlu1 %v5052_v34, %s4836_s27 }
 0x6b4   : > { %2341 = vrot.lane.b32.xlu0 %v5059_v40, %s4836_s27 }
 0x6b7   : > { %2343 = vrot.lane.b32.xlu1 %v5061_v41, %s4836_s27 }
 0x6b8   : > { %2345 = vrot.lane.b32.xlu0 %v5070_v45, %s4836_s27  ;;  %s6130_s27 = scalar_lea.vmem %s6103_s7, %s4925_s15 }
 0x6e6   : > { %v2029_v63 = vpop.xlane.xlu0 %2028 }
 0x6e7   : > { %4718 = vrcp.f32 %v2029_v63 }
 0x6ea   : > { %v2032_v23 = vpop.xlane.xlu1 %2031  ;;  %v4625_v3 = vpop.permute.xlu0 %4624 }
 0x6eb   : > { %4720 = vrcp.f32 %v2032_v23  ;;  %v4627_v41 = vunpack.i.h.bf16 %v4625_v3  ;;  %v4626_v28 = vunpack.i.l.bf16 %v4625_v3 }
 0x6ed   : > { %v4464_v11 = vpack.c.bf16 %v4627_v41, %v4626_v28 }
 0x6ee   : > { %v2035_v2 = vpop.xlane.xlu1 %2034 }
 0x6ef   : > { %4722 = vrcp.f32 %v2035_v2 }
 0x6f1   : > { %v4719_v27 = vpop.eup %4718 }
 0x6f2   : > { %v2055_v19 = vmul.f32 %v4719_v27, %v4705_v14 }
 0x6f4   : > { %4188 = vmatmul.mubr.msk.f32.vlgmr.msra.gmra.mrb[54].mxu0 %vm960_vm6, %v2055_v19 }
 0x6f5   : > { %v4721_v34 = vpop.eup %4720  ;;  %4462 = vmatpush3.bf16.xpose.msk.msra.mxu0 %vm5084_vm5, %v4460_v33  ;;  %4190 = vmatprep.mubr.msk.f32.mxu0 %vm4825_vm2, %v4826_v13 }
 0x6f6   : > { %v2056_v40 = vmul.f32 %v4721_v34, %v4707_v38  ;;  %4463 = vmatprep.subr.bf16.mxu0 %v4824_v10  ;;  %v2041_v14 = vpop.xlane.xlu1 %2040 }
 0x6f8   : > { %4191 = vmatmul.mubr.msk.f32.gmra.mrb[56].mxu0 %vm960_vm6, %v2056_v40 }
 0x6f9   : > { %v4723_v0 = vpop.eup %4722  ;;  %4193 = vmatprep.mubr.msk.f32.mxu0 %vm4825_vm2, %v4826_v13 }
 0x6fa   : > { %v2057_v35 = vmul.f32 %v4723_v0, %v5595_v32  ;;  %v2360_v9 = vpop.permute.xlu1 %2359 }
 0x6fc   : > { %4194 = vmatmul.mubr.msk.f32.gmra.mrb[58].mxu0 %vm960_vm6, %v2057_v35 }
 0x6fd   : > { %4466 = vmatpush3.bf16.xpose.msk.msra.mxu0 %vm5084_vm5, %v4464_v11  ;;  %4196 = vmatprep.mubr.msk.f32.mxu0 %vm4825_vm2, %v4826_v13 }
 0x6fe   : > { %4467 = vmatprep.subr.bf16.mxu0 %v4824_v10 }
 0x71b   : > { %v2038_v5 = vpop.xlane.xlu0 %2037 }
 0x71c   : > { %4724 = vrcp.f32 %v2038_v5 }
 0x71d   : > { %4726 = vrcp.f32 %v2041_v14 }
 0x71f   : > { %v2044_v17 = vpop.xlane.xlu0 %2043 }
 0x720   : > { %4728 = vrcp.f32 %v2044_v17 }
 0x723   : > { %v4630_v20 = vpop.permute.xlu0 %4629 }
 0x724   : > { %v4632_v44 = vunpack.i.h.bf16 %v4630_v20  ;;  %v4631_v38 = vunpack.i.l.bf16 %v4630_v20 }
 0x726   : > { %v4725_v8 = vpop.eup %4724  ;;  %v4468_v24 = vpack.c.bf16 %v4632_v44, %v4631_v38 }
 0x727   : > { %v2058_v32 = vmul.f32 %v4725_v8, %v4713_v48  ;;  %v4727_v46 = vpop.eup %4726  ;;  %v2334_v30 = vpop.permute.xlu0 %2333 }
 0x728   : > { %4470 = vmatpush3.bf16.xpose.msk.msra.mxu0 %vm5084_vm5, %v4468_v24  ;;  %v2059_v55 = vmul.f32 %v4727_v46, %v5601_v58 }
 0x729   : > { %4197 = vmatmul.mubr.msk.f32.gmra.mrb[60].mxu0 %vm960_vm6, %v2058_v32  ;;  %4243 = vmatprep.subr.mxu0 %v4826_v13 }
 0x72a   : > { %4199 = vmatprep.mubr.msk.f32.mxu0 %vm4825_vm2, %v4826_v13  ;;  %v4729_v51 = vpop.eup %4728 }
 0x72b   : > { %v2047_v47 = vpop.xlane.xlu1 %2046  ;;  %v2060_v50 = vmul.f32 %v4729_v51, %v5610_v6  ;;  %v2338_v12 = vpop.permute.xlu0 %2337 }
 0x72c   : > { %4730 = vrcp.f32 %v2047_v47 }
 0x72d   : > { %4200 = vmatmul.mubr.msk.f32.gmra.mrb[62].mxu0 %vm960_vm6, %v2059_v55 }
 0x72e   : > { %4202 = vmatprep.mubr.msk.f32.mxu0 %vm4825_vm2, %v4826_v13 }
 0x72f   : > { %v2336_v59 = vpop.permute.xlu1 %2335  ;;  %v2342_v56 = vpop.permute.xlu0 %2341 }
 0x730   : > { %4244 = vmatpush3.xpose.msk.msra.mxu0 %vm817_vm4, %v2360_v9 }
 0x731   : > { %4203 = vmatmul.mubr.msk.f32.gmra.mrb[64].mxu0 %vm960_vm6, %v2060_v50  ;;  %4301 = vmatprep.subr.mxu0 %v4826_v13 }
 0x732   : > { %4205 = vmatprep.mubr.msk.f32.mxu0 %vm4825_vm2, %v4826_v13 }
 0x733   : > { %v2340_v48 = vpop.permute.xlu1 %2339  ;;  %v2346_v6 = vpop.permute.xlu0 %2345 }
 0x736   : > { %v4731_v58 = vpop.eup %4730 }
 0x737   : > { %v2061_v21 = vmul.f32 %v4731_v58, %v5614_v60  ;;  %v2344_v25 = vpop.permute.xlu1 %2343 }
 0x739   : > { %4206 = vmatmul.mubr.msk.f32.gmra.mrb[66].mxu0 %vm960_vm6, %v2061_v21 }
 0x73a   : > { %4245 = vmatprep.mubr.msk.f32.mxu0 %vm4825_vm2, %v4826_v13 }
 0x73d   : > { %4246 = vmatmul.mubr.msk.f32.vlgmr.msra.gmra.mrb[68].mxu0 %vm817_vm4, %v2334_v30 }
 0x73e   : > { %4248 = vmatprep.mubr.msk.f32.mxu0 %vm4825_vm2, %v4826_v13 }
 0x741   : > { %4249 = vmatmul.mubr.msk.f32.gmra.mrb[70].mxu0 %vm817_vm4, %v2336_v59 }
 0x742   : > { %4251 = vmatprep.mubr.msk.f32.mxu0 %vm4825_vm2, %v4826_v13 }
 0x745   : > { %4252 = vmatmul.mubr.msk.f32.gmra.mrb[72].mxu0 %vm817_vm4, %v2338_v12 }
 0x746   : > { %4254 = vmatprep.mubr.msk.f32.mxu0 %vm4825_vm2, %v4826_v13 }
 0x749   : > { %4255 = vmatmul.mubr.msk.f32.gmra.mrb[74].mxu0 %vm817_vm4, %v2340_v48 }
 0x74a   : > { %4257 = vmatprep.mubr.msk.f32.mxu0 %vm4825_vm2, %v4826_v13 }
 0x74d   : > { %4258 = vmatmul.mubr.msk.f32.gmra.mrb[76].mxu0 %vm817_vm4, %v2342_v56 }
 0x74e   : > { %4260 = vmatprep.mubr.msk.f32.mxu0 %vm4825_vm2, %v4826_v13 }
 0x751   : > { %4261 = vmatmul.mubr.msk.f32.gmra.mrb[78].mxu0 %vm817_vm4, %v2344_v25  ;;  %v4808_v25 = vld [vmem:[%s6126_s21 + $0x30] sm:$0xf] }
 0x752   : > { %4263 = vmatprep.mubr.msk.f32.mxu0 %vm4825_vm2, %v4826_v13 }
 0x755   : > { %4264 = vmatmul.mubr.msk.f32.gmra.mrb[80].mxu0 %vm817_vm4, %v2346_v6 }
 0x756   : > { %4303 = vmatprep.mubr.msk.f32.mxu0 %vm4825_vm2, %v4826_v13 }
 0x7c7   : > { %v2171_v52 = vpop.f32.mrb[54].mxu0 }
 0x7c8   : > { %v4189_v60 = vpop.f32.mrb[55].mxu0  ;;  %4211 = vmatmul.mubr.msk.f32.vlgmr.msra.gmra.mrb[58].mxu1 %vm817_vm4, %v2171_v52 }
 0x7c9   : > { %4213 = vmatprep.mubr.msk.f32.mxu1 %vm4825_vm2, %v4826_v13 }
 0x7cb   : > { %v2176_v53 = vpop.f32.mrb[56].mxu0 }
 0x7cc   : > { %v4192_v16 = vpop.f32.mrb[57].mxu0  ;;  %4214 = vmatmul.mubr.msk.f32.gmra.mrb[60].mxu1 %vm817_vm4, %v2176_v53 }
 0x7cd   : > { %4216 = vmatprep.mubr.msk.f32.mxu1 %vm4825_vm2, %v4826_v13 }
 0x7cf   : > { %v2181_v63 = vpop.f32.mrb[58].mxu0 }
 0x7d0   : > { %v4195_v23 = vpop.f32.mrb[59].mxu0  ;;  %4217 = vmatmul.mubr.msk.f32.gmra.mrb[62].mxu1 %vm817_vm4, %v2181_v63 }
 0x7d1   : > { %4219 = vmatprep.mubr.msk.f32.mxu1 %vm4825_vm2, %v4826_v13 }
 0x7fc   : > { %v2186_v2 = vpop.f32.mrb[60].mxu0 }
 0x7fd   : > { %v4198_v54 = vpop.f32.mrb[61].mxu0  ;;  %4220 = vmatmul.mubr.msk.f32.gmra.mrb[64].mxu1 %vm817_vm4, %v2186_v2 }
 0x7fe   : > { %4222 = vmatprep.mubr.msk.f32.mxu1 %vm4825_vm2, %v4826_v13 }
 0x800   : > { %v2191_v26 = vpop.f32.mrb[62].mxu0 }
 0x801   : > { %v4201_v27 = vpop.f32.mrb[63].mxu0  ;;  %4223 = vmatmul.mubr.msk.f32.gmra.mrb[66].mxu1 %vm817_vm4, %v2191_v26 }
 0x802   : > { %4225 = vmatprep.mubr.msk.f32.mxu1 %vm4825_vm2, %v4826_v13 }
 0x804   : > { %v2196_v19 = vpop.f32.mrb[64].mxu0 }
 0x805   : > { %v4204_v33 = vpop.f32.mrb[65].mxu0  ;;  %4226 = vmatmul.mubr.msk.f32.gmra.mrb[68].mxu1 %vm817_vm4, %v2196_v19 }
 0x806   : > { %4228 = vmatprep.mubr.msk.f32.mxu1 %vm4825_vm2, %v4826_v13 }
 0x80c   : > { %v2201_v3 = vpop.f32.mrb[66].mxu0 }
 0x80d   : > { %v4207_v34 = vpop.f32.mrb[67].mxu0  ;;  %4229 = vmatmul.mubr.msk.f32.gmra.mrb[70].mxu1 %vm817_vm4, %v2201_v3 }
 0x80e   : > { %4280 = vmatprep.mubr.msk.f32.mxu1 %vm4825_vm2, %v4826_v13 }
 0x810   : > { %v2455_v40 = vpop.f32.mrb[68].mxu0 }
 0x811   : > { %v2489_v41 = vmul.f32 0.35355338, %v2455_v40  ;;  %v4247_v28 = vpop.f32.mrb[69].mxu0 }
 0x813   : > { %v2496_v0 = vadd.f32 %v5548_v4, %v2489_v41 }
 0x814   : > { %v2460_v35 = vpop.f32.mrb[70].mxu0 }
 0x815   : > { %v2490_v11 = vmul.f32 0.35355338, %v2460_v35  ;;  %v4250_v14 = vpop.f32.mrb[71].mxu0  ;;  %v2503_v5 = vsel %vm960_vm6, %v2496_v0, -inf }
 0x816   : > { %2504 = vmax.xlane.f32.xlu1 %v2503_v5 }
 0x817   : > { %v2497_v17 = vadd.f32 %v5555_v15, %v2490_v11 }
 0x818   : > { %v2465_v20 = vpop.f32.mrb[72].mxu0 }
 0x819   : > { %v2491_v44 = vmul.f32 0.35355338, %v2465_v20  ;;  %v4253_v38 = vpop.f32.mrb[73].mxu0  ;;  %v2506_v8 = vsel %vm960_vm6, %v2497_v17, -inf }
 0x81a   : > { %2507 = vmax.xlane.f32.xlu0 %v2506_v8 }
 0x81b   : > { %v2498_v24 = vadd.f32 %v5562_v39, %v2491_v44 }
 0x81c   : > { %v2470_v9 = vpop.f32.mrb[74].mxu0 }
 0x81d   : > { %v2492_v32 = vmul.f32 0.35355338, %v2470_v9  ;;  %v4256_v46 = vpop.f32.mrb[75].mxu0  ;;  %v2509_v4 = vsel %vm960_vm6, %v2498_v24, -inf }
 0x81e   : > { %2510 = vmax.xlane.f32.xlu0 %v2509_v4 }
 0x81f   : > { %v2499_v47 = vadd.f32 %v5569_v18, %v2492_v32 }
 0x820   : > { %v2475_v55 = vpop.f32.mrb[76].mxu0 }
 0x821   : > { %v2493_v51 = vmul.f32 0.35355338, %v2475_v55  ;;  %v4259_v50 = vpop.f32.mrb[77].mxu0  ;;  %v2512_v15 = vsel %vm960_vm6, %v2499_v47, -inf }
 0x822   : > { %2513 = vmax.xlane.f32.xlu1 %v2512_v15 }
 0x823   : > { %v2500_v58 = vadd.f32 %v5576_v22, %v2493_v51 }
 0x824   : > { %v2480_v21 = vpop.f32.mrb[78].mxu0 }
 0x825   : > { %v2494_v30 = vmul.f32 0.35355338, %v2480_v21  ;;  %v4262_v59 = vpop.f32.mrb[79].mxu0  ;;  %v2515_v39 = vsel %vm960_vm6, %v2500_v58, -inf }
 0x826   : > { %2516 = vmax.xlane.f32.xlu0 %v2515_v39 }
 0x827   : > { %v2501_v12 = vadd.f32 %v5583_v49, %v2494_v30 }
 0x828   : > { %v2485_v37 = vpop.f32.mrb[80].mxu0 }
 0x829   : > { %v2495_v48 = vmul.f32 0.35355338, %v2485_v37  ;;  %v4265_v56 = vpop.f32.mrb[81].mxu0  ;;  %v2518_v18 = vsel %vm960_vm6, %v2501_v12, -inf }
 0x82a   : > { %2519 = vmax.xlane.f32.xlu1 %v2518_v18 }
 0x82b   : > { %v5722_v6 = vadd.f32 %v4808_v25, %v2495_v48 }
 0x82d   : > { %v2521_v22 = vsel %vm979_vm7, %v5722_v6, -inf }
 0x82e   : > { %2522 = vmax.xlane.f32.xlu0 %v2521_v22 }
 0x83b   : > { %4634 = vrot.lane.b32.xlu1 %v5047_v29, %s4837_s25 }
 0x844   : > { %4639 = vrot.lane.b32.xlu0 %v5056_v36, %s4837_s25 }
 0x89b   : > { %v2292_v49 = vpop.f32.mrb[58].mxu1 }
 0x89c   : > { %v5731_v52 = vadd.f32 %v2292_v49, %v5531_v31  ;;  %v4212_v60 = vpop.f32.mrb[59].mxu1 }
 0x89f   : > { %v2297_v53 = vpop.f32.mrb[60].mxu1 }
 0x8a0   : > { %v5734_v16 = vadd.f32 %v2297_v53, %v5533_v42  ;;  %v4215_v63 = vpop.f32.mrb[61].mxu1 }
 0x8a3   : > { %v2302_v23 = vpop.f32.mrb[62].mxu1  ;;  %v2505_v2 = vpop.xlane.xlu1 %2504 }
 0x8a4   : > { %v5737_v54 = vadd.f32 %v2302_v23, %v5535_v7  ;;  %v2524_v26 = vsub.f32 %v2496_v0, %v2505_v2  ;;  %v4218_v29 = vpop.f32.mrb[63].mxu1 }
 0x8a6   : > { %v2531_v27 = vmul.f32 1.442695, %v2524_v26 }
 0x8a7   : > { %v2508_v19 = vpop.xlane.xlu0 %2507 }
 0x8a8   : > { %4732 = vpow2.f32 %v2531_v27  ;;  %v2525_v36 = vsub.f32 %v2497_v17, %v2508_v19 }
 0x8aa   : > { %v2533_v33 = vmul.f32 1.442695, %v2525_v36 }
 0x8ab   : > { %v2511_v31 = vpop.xlane.xlu0 %2510 }
 0x8ac   : > { %4734 = vpow2.f32 %v2533_v33  ;;  %v2526_v3 = vsub.f32 %v2498_v24, %v2511_v31 }
 0x8ae   : > { %v2535_v34 = vmul.f32 1.442695, %v2526_v3 }
 0x8af   : > { %v2514_v40 = vpop.xlane.xlu1 %2513 }
 0x8b0   : > { %4736 = vpow2.f32 %v2535_v34  ;;  %v2527_v42 = vsub.f32 %v2499_v47, %v2514_v40 }
 0x8b2   : > { %v5739_v41 = vpop.eup %4732  ;;  %v2537_v28 = vmul.f32 1.442695, %v2527_v42 }
 0x8b3   : > { %v2517_v35 = vpop.xlane.xlu0 %2516  ;;  %v2545_v7 = vsel %vm960_vm6, %v5739_v41, 0.0 }
 0x8b4   : > { %4738 = vpow2.f32 %v2537_v28  ;;  %v2528_v0 = vsub.f32 %v2500_v58, %v2517_v35  ;;  %2546 = vadd.xlane.f32.xlu1 %v2545_v7 }
 0x8b6   : > { %v5743_v11 = vpop.eup %4734  ;;  %v2539_v14 = vmul.f32 1.442695, %v2528_v0 }
 0x8b7   : > { %v2520_v5 = vpop.xlane.xlu1 %2519  ;;  %v2548_v17 = vsel %vm960_vm6, %v5743_v11, 0.0 }
 0x8b8   : > { %4740 = vpow2.f32 %v2539_v14  ;;  %v2529_v20 = vsub.f32 %v2501_v12, %v2520_v5  ;;  %2549 = vadd.xlane.f32.xlu0 %v2548_v17 }
 0x8ba   : > { %v5747_v44 = vpop.eup %4736  ;;  %v2541_v38 = vmul.f32 1.442695, %v2529_v20 }
 0x8bb   : > { %v4635_v8 = vpop.permute.xlu1 %4634  ;;  %v2523_v24 = vpop.xlane.xlu0 %2522  ;;  %v2551_v9 = vsel %vm960_vm6, %v5747_v44, 0.0 }
 0x8bc   : > { %4742 = vpow2.f32 %v2541_v38  ;;  %v4637_v32 = vunpack.i.h.bf16 %v4635_v8  ;;  %v4636_v46 = vunpack.i.l.bf16 %v4635_v8  ;;  %2552 = vadd.xlane.f32.xlu1 %v2551_v9  ;;  %v795_v38 = vld [vmem:[%s6127_s14 + $0x18] sm:$0xff] }
 0x8bd   : > { %4302 = vmatpush3.msra.mxu0 %v795_v38 }
 0x8be   : > { %v5751_v4 = vpop.eup %4738  ;;  %v4472_v47 = vpack.c.bf16 %v4637_v32, %v4636_v46  ;;  %4486 = vmatprep.subr.bf16.mxu0 %v4824_v10 }
 0x8bf   : > { %v4640_v55 = vpop.permute.xlu0 %4639  ;;  %v2554_v51 = vsel %vm960_vm6, %v5751_v4, 0.0 }
 0x8c0   : > { %v4642_v50 = vunpack.i.h.bf16 %v4640_v55  ;;  %v4641_v15 = vunpack.i.l.bf16 %v4640_v55  ;;  %4473 = vmatpush3.bf16.msra.mxu1 %v4472_v47  ;;  %2555 = vadd.xlane.f32.xlu0 %v2554_v51 }
 0x8c1   : > { %4474 = vmatprep.subr.bf16.mxu1 %v4824_v10 }
 0x8c2   : > { %v5756_v58 = vpop.eup %4740  ;;  %v4475_v21 = vpack.c.bf16 %v4642_v50, %v4641_v15 }
 0x8c3   : > { %v2557_v30 = vsel %vm960_vm6, %v5756_v58, 0.0 }
 0x8c4   : > { %2558 = vadd.xlane.f32.xlu0 %v2557_v30  ;;  %4476 = vmatpush3.bf16.msra.mxu1 %v4475_v21 }
 0x8c5   : > { %4477 = vmatprep.subr.bf16.mxu1 %v4824_v10 }
 0x8c6   : > { %v5761_v59 = vpop.eup %4742 }
 0x8c7   : > { %v2560_v39 = vsel %vm960_vm6, %v5761_v59, 0.0 }
 0x8c8   : > { %2561 = vadd.xlane.f32.xlu1 %v2560_v39  ;;  %v3714_v39 = vld [vmem:[%s6128_s26] ss:$0 sm:$0xff] }
 0x8d0   : > { %v2307_v12 = vpop.f32.mrb[64].mxu1 }
 0x8d1   : > { %v5766_v37 = vadd.f32 %v2307_v12, %v5537_v57  ;;  %v4221_v48 = vpop.f32.mrb[65].mxu1 }
 0x8d4   : > { %v2312_v56 = vpop.f32.mrb[66].mxu1 }
 0x8d5   : > { %v5769_v18 = vadd.f32 %v2312_v56, %v5539_v61  ;;  %v4224_v25 = vpop.f32.mrb[67].mxu1  ;;  %v2530_v61 = vsub.f32 %v5722_v6, %v2523_v24 }
 0x8d7   : > { %v2543_v23 = vmul.f32 1.442695, %v2530_v61 }
 0x8d8   : > { %v2317_v22 = vpop.f32.mrb[68].mxu1 }
 0x8d9   : > { %v5772_v49 = vadd.f32 %v2317_v22, %v5541_v62  ;;  %v4227_v60 = vpop.f32.mrb[69].mxu1  ;;  %2592 = vrot.lane.b32.xlu1 %v5070_v45, %s4837_s25  ;;  %4744 = vpow2.f32 %v2543_v23 }
 0x8da   : > { %4644 = vrot.lane.b32.xlu0 %v5066_v43, %s4837_s25 }
 0x8e0   : > { %v2322_v53 = vpop.f32.mrb[70].mxu1 }
 0x8e1   : > { %v5779_v57 = vadd.f32 %v2322_v53, %v5543_v1  ;;  %v4230_v63 = vpop.f32.mrb[71].mxu1  ;;  %v4809_v53 = vld [vmem:[#allocation2] sm:$0xff] }
 0x8e3   : > { %v4745_v2 = vpop.eup %4744 }
 0x8e4   : > { %v2563_v62 = vsel %vm979_vm7, %v4745_v2, 0.0 }
 0x8f9   : > { %2564 = vadd.xlane.f32.xlu0 %v2563_v62 }
 0x941   : > { %v2547_v29 = vpop.xlane.xlu1 %2546 }
 0x942   : > { %4746 = vrcp.f32 %v2547_v29  ;;  %v4810_v29 = vld [vmem:[#allocation2 + $0x8] sm:$0xff] }
 0x945   : > { %v2550_v26 = vpop.xlane.xlu0 %2549 }
 0x946   : > { %4748 = vrcp.f32 %v2550_v26 }
 0x949   : > { %v2553_v19 = vpop.xlane.xlu1 %2552 }
 0x94a   : > { %4750 = vrcp.f32 %v2553_v19 }
 0x94c   : > { %v4747_v6 = vpop.eup %4746 }
 0x94d   : > { %v2556_v27 = vpop.xlane.xlu0 %2555  ;;  %v2573_v3 = vmul.f32 %v4747_v6, %v5739_v41 }
 0x94e   : > { %4752 = vrcp.f32 %v2556_v27 }
 0x950   : > { %v4749_v40 = vpop.eup %4748 }
 0x951   : > { %v2559_v45 = vpop.xlane.xlu0 %2558  ;;  %v2574_v42 = vmul.f32 %v4749_v40, %v5743_v11 }
 0x952   : > { %4754 = vrcp.f32 %v2559_v45 }
 0x954   : > { %v4751_v28 = vpop.eup %4750 }
 0x955   : > { %v4645_v43 = vpop.permute.xlu0 %4644  ;;  %v2562_v33 = vpop.xlane.xlu1 %2561  ;;  %v2575_v41 = vmul.f32 %v4751_v28, %v5747_v44 }
 0x956   : > { %v4647_v36 = vunpack.i.h.bf16 %v4645_v43  ;;  %v4646_v1 = vunpack.i.l.bf16 %v4645_v43  ;;  %4756 = vrcp.f32 %v2562_v33 }
 0x958   : > { %v4478_v31 = vpack.c.bf16 %v4647_v36, %v4646_v1  ;;  %v4753_v35 = vpop.eup %4752  ;;  %v4811_v36 = vld [vmem:[#allocation2 + $0x10] sm:$0xff] }
 0x959   : > { %v2593_v34 = vpop.permute.xlu1 %2592  ;;  %v2576_v7 = vmul.f32 %v4753_v35, %v5751_v4 }
 0x95a   : > { %4479 = vmatpush3.bf16.msra.mxu1 %v4478_v31 }
 0x95b   : > { %4278 = vmatprep.subr.mxu1 %v4826_v13 }
 0x95c   : > { %v4755_v0 = vpop.eup %4754 }
 0x95d   : > { %v2577_v11 = vmul.f32 %v4755_v0, %v5756_v58 }
 0x95e   : > { %4279 = vmatpush3.msk.msra.mxu1 %vm1080_vm8, %v2593_v34  ;;  %v4812_v34 = vld [vmem:[#allocation2 + $0x18] sm:$0xff] }
 0x95f   : > { %4281 = vmatmul.mubr.msk.f32.vlgmr.msra.gmra.mrb[72].mxu1 %vm960_vm6, %v2573_v3  ;;  %4480 = vmatprep.subr.bf16.mxu1 %v4824_v10 }
 0x960   : > { %4283 = vmatprep.mubr.msk.f32.mxu1 %vm4825_vm2, %v4826_v13  ;;  %v4757_v14 = vpop.eup %4756 }
 0x961   : > { %v2578_v5 = vmul.f32 %v4757_v14, %v5761_v59 }
 0x963   : > { %4284 = vmatmul.mubr.msk.f32.gmra.mrb[74].mxu1 %vm960_vm6, %v2574_v42 }
 0x964   : > { %4286 = vmatprep.mubr.msk.f32.mxu1 %vm4825_vm2, %v4826_v13 }
 0x967   : > { %4287 = vmatmul.mubr.msk.f32.gmra.mrb[76].mxu1 %vm960_vm6, %v2575_v41 }
 0x968   : > { %4289 = vmatprep.mubr.msk.f32.mxu1 %vm4825_vm2, %v4826_v13 }
 0x96b   : > { %4290 = vmatmul.mubr.msk.f32.gmra.mrb[78].mxu1 %vm960_vm6, %v2576_v7  ;;  %v4813_v7 = vld [vmem:[#allocation2 + $0x20] sm:$0xff] }
 0x96c   : > { %4292 = vmatprep.mubr.msk.f32.mxu1 %vm4825_vm2, %v4826_v13 }
 0x96f   : > { %4293 = vmatmul.mubr.msk.f32.gmra.mrb[80].mxu1 %vm960_vm6, %v2577_v11 }
 0x970   : > { %4295 = vmatprep.mubr.msk.f32.mxu1 %vm4825_vm2, %v4826_v13 }
 0x973   : > { %4296 = vmatmul.mubr.msk.f32.gmra.mrb[82].mxu1 %vm960_vm6, %v2578_v5  ;;  %v4814_v5 = vld [vmem:[#allocation2 + $0x28] sm:$0xff] }
 0x974   : > { %4298 = vmatprep.mubr.msk.f32.mxu1 %vm4825_vm2, %v4826_v13 }
 0x986   : > { %v2565_v17 = vpop.xlane.xlu0 %2564 }
 0x987   : > { %4758 = vrcp.f32 %v2565_v17 }
 0x991   : > { %v4759_v20 = vpop.eup %4758 }
 0x992   : > { %v2579_v44 = vmul.f32 %v4759_v20, %v4745_v2 }
 0x994   : > { %4299 = vmatmul.mubr.msk.f32.gmra.mrb[84].mxu1 %vm960_vm6, %v2579_v44 }
 0x995   : > { %4332 = vmatprep.mubr.msk.f32.mxu1 %vm4825_vm2, %v4826_v13 }
 0xa32   : > { %v2689_v8 = vpop.f32.mrb[72].mxu1 }
 0xa33   : > { %v4282_v24 = vpop.f32.mrb[73].mxu1  ;;  %4304 = vmatmul.mubr.msk.f32.vlgmr.msra.gmra.mrb[82].mxu0 %vm817_vm4, %v2689_v8 }
 0xa34   : > { %4306 = vmatprep.mubr.msk.f32.mxu0 %vm4825_vm2, %v4826_v13  ;;  %v4815_v24 = vld [vmem:[#allocation2 + $0x30] sm:$0xf] }
 0xa36   : > { %v2694_v9 = vpop.f32.mrb[74].mxu1 }
 0xa37   : > { %v4285_v32 = vpop.f32.mrb[75].mxu1  ;;  %4307 = vmatmul.mubr.msk.f32.gmra.mrb[84].mxu0 %vm817_vm4, %v2694_v9 }
 0xa38   : > { %4309 = vmatprep.mubr.msk.f32.mxu0 %vm4825_vm2, %v4826_v13 }
 0xa3a   : > { %v2699_v46 = vpop.f32.mrb[76].mxu1 }
 0xa3b   : > { %v4288_v4 = vpop.f32.mrb[77].mxu1  ;;  %4310 = vmatmul.mubr.msk.f32.gmra.mrb[86].mxu0 %vm817_vm4, %v2699_v46 }
 0xa3c   : > { %4312 = vmatprep.mubr.msk.f32.mxu0 %vm4825_vm2, %v4826_v13 }
 0xa3e   : > { %v2704_v47 = vpop.f32.mrb[78].mxu1 }
 0xa3f   : > { %v4291_v55 = vpop.f32.mrb[79].mxu1  ;;  %4313 = vmatmul.mubr.msk.f32.gmra.mrb[88].mxu0 %vm817_vm4, %v2704_v47 }
 0xa40   : > { %4315 = vmatprep.mubr.msk.f32.mxu0 %vm4825_vm2, %v4826_v13 }
 0xa42   : > { %v2709_v51 = vpop.f32.mrb[80].mxu1 }
 0xa43   : > { %v4294_v50 = vpop.f32.mrb[81].mxu1  ;;  %4316 = vmatmul.mubr.msk.f32.gmra.mrb[90].mxu0 %vm817_vm4, %v2709_v51 }
 0xa44   : > { %4318 = vmatprep.mubr.msk.f32.mxu0 %vm4825_vm2, %v4826_v13 }
 0xa46   : > { %v2714_v15 = vpop.f32.mrb[82].mxu1 }
 0xa47   : > { %v4297_v58 = vpop.f32.mrb[83].mxu1  ;;  %4319 = vmatmul.mubr.msk.f32.gmra.mrb[92].mxu0 %vm817_vm4, %v2714_v15 }
 0xa48   : > { %4321 = vmatprep.mubr.msk.f32.mxu0 %vm4825_vm2, %v4826_v13 }
 0xa67   : > { %v2719_v21 = vpop.f32.mrb[84].mxu1 }
 0xa68   : > { %v4300_v30 = vpop.f32.mrb[85].mxu1  ;;  %4322 = vmatmul.mubr.msk.f32.gmra.mrb[94].mxu0 %vm817_vm4, %v2719_v21 }
 0xa69   : > { %4369 = vmatprep.mubr.msk.f32.mxu0 %vm4825_vm2, %v4826_v13 }
 0xb06   : > { %v2810_v59 = vpop.f32.mrb[82].mxu0 }
 0xb07   : > { %v2844_v12 = vadd.f32 %v2810_v59, %v5731_v52  ;;  %v4305_v48 = vpop.f32.mrb[83].mxu0 }
 0xb09   : > { %v2858_v56 = vadd.f32 %v3714_v39, %v2844_v12 }
 0xb0a   : > { %v2815_v25 = vpop.f32.mrb[84].mxu0 }
 0xb0b   : > { %v2845_v22 = vadd.f32 %v2815_v25, %v5734_v16  ;;  %v4308_v60 = vpop.f32.mrb[85].mxu0  ;;  %v2865_v63 = vadd.f32 %v4809_v53, %v2858_v56 }
 0xb0d   : > { %v2859_v61 = vadd.f32 %v3714_v39, %v2845_v22  ;;  %v2874_v23 = vsel %vm670_vm3, %v2865_v63, 0.0 }
 0xb0e   : > { %2875 = vadd.xlane.f32.xlu0 %v2874_v23  ;;  %v2820_v2 = vpop.f32.mrb[86].mxu0 }
 0xb0f   : > { %v2846_v62 = vadd.f32 %v2820_v2, %v5737_v54  ;;  %v4311_v26 = vpop.f32.mrb[87].mxu0  ;;  %v2866_v27 = vadd.f32 %v4810_v29, %v2859_v61 }
 0xb11   : > { %v2860_v45 = vadd.f32 %v3714_v39, %v2846_v62  ;;  %v2877_v52 = vsel %vm670_vm3, %v2866_v27, 0.0 }
 0xb12   : > { %2878 = vadd.xlane.f32.xlu0 %v2877_v52  ;;  %v2825_v19 = vpop.f32.mrb[88].mxu0  ;;  %v2993_v52 = vld [vmem:[%s4957_s2] sm:$0xff] }
 0xb13   : > { %v2847_v16 = vadd.f32 %v2825_v19, %v5766_v37  ;;  %v4314_v43 = vpop.f32.mrb[89].mxu0  ;;  %v2867_v1 = vadd.f32 %v4811_v36, %v2860_v45  ;;  %v2994_v19 = vld [vmem:[%s4957_s2 + $0x8] sm:$0xff]  ;;  %v2996_v36 = vld [vmem:[%s4957_s2 + $0x18] sm:$0xff] }
 0xb14   : > { %v2995_v43 = vld [vmem:[%s4957_s2 + $0x10] sm:$0xff] }
 0xb15   : > { %v2861_v33 = vadd.f32 %v3714_v39, %v2847_v16  ;;  %v2880_v31 = vsel %vm670_vm3, %v2867_v1, 0.0  ;;  %v4481_v16 = vpack.c.bf16 %v2994_v19, %v2993_v52  ;;  %v3160_v52 = vld [vmem:[%s4967_s28] sm:$0xff]  ;;  %v3161_v19 = vld [vmem:[%s4967_s28 + $0x8] sm:$0xff] }
 0xb16   : > { %2881 = vadd.xlane.f32.xlu1 %v2880_v31  ;;  %v2830_v6 = vpop.f32.mrb[90].mxu0 }
 0xb17   : > { %v2848_v54 = vadd.f32 %v2830_v6, %v5769_v18  ;;  %v4317_v3 = vpop.f32.mrb[91].mxu0  ;;  %v2868_v40 = vadd.f32 %v4812_v34, %v2861_v33  ;;  %4482 = vmatpush3.bf16.msra.mxu1 %v4481_v16  ;;  %v4487_v16 = vpack.c.bf16 %v3161_v19, %v3160_v52 }
 0xb18   : > { %4483 = vmatprep.subr.bf16.mxu1 %v4824_v10 }
 0xb19   : > { %v2862_v42 = vadd.f32 %v3714_v39, %v2848_v54  ;;  %v2883_v28 = vsel %vm670_vm3, %v2868_v40, 0.0  ;;  %4488 = vmatpush3.bf16.msra.mxu0 %v4487_v16 }
 0xb1a   : > { %2884 = vadd.xlane.f32.xlu0 %v2883_v28  ;;  %v2835_v41 = vpop.f32.mrb[92].mxu0  ;;  %4489 = vmatprep.subr.bf16.mxu0 %v4824_v10 }
 0xb1b   : > { %v2849_v37 = vadd.f32 %v2835_v41, %v5772_v49  ;;  %v4320_v35 = vpop.f32.mrb[93].mxu0  ;;  %v2869_v0 = vadd.f32 %v4813_v7, %v2862_v42 }
 0xb1d   : > { %v2863_v11 = vadd.f32 %v3714_v39, %v2849_v37  ;;  %v2886_v14 = vsel %vm670_vm3, %v2869_v0, 0.0 }
 0xb1e   : > { %2887 = vadd.xlane.f32.xlu0 %v2886_v14 }
 0xb1f   : > { %v2870_v17 = vadd.f32 %v4814_v5, %v2863_v11 }
 0xb21   : > { %v2889_v18 = vsel %vm670_vm3, %v2870_v17, 0.0 }
 0xb22   : > { %2890 = vadd.xlane.f32.xlu0 %v2889_v18 }
 0xb3b   : > { %v2840_v20 = vpop.f32.mrb[94].mxu0 }
 0xb3c   : > { %v2850_v44 = vadd.f32 %v2840_v20, %v5779_v57  ;;  %v4323_v38 = vpop.f32.mrb[95].mxu0 }
 0xb3d   : > { %v3716_v38 = vld [vmem:[%s6130_s27] ss:$0 sm:$0xff] }
 0xb3e   : > { %v2864_v8 = vadd.f32 %v3714_v39, %v2850_v44 }
 0xb40   : > { %v2871_v49 = vadd.f32 %v4815_v24, %v2864_v8 }
 0xb42   : > { %v2893_v9 = vsel %vm2892_vm9, %v2871_v49, 0.0 }
 0xb43   : > { %2894 = vadd.xlane.f32.xlu0 %v2893_v9 }
 0xb9b   : > { %v2876_v32 = vpop.xlane.xlu0 %2875 }
 0xb9c   : > { %v2897_v46 = vmul.f32 0.03125, %v2876_v32 }
 0xb9e   : > { %v5855_v4 = vsub.f32 %v2865_v63, %v2897_v46 }
 0xb9f   : > { %v2879_v47 = vpop.xlane.xlu0 %2878 }
 0xba0   : > { %v2898_v55 = vmul.f32 0.03125, %v2879_v47  ;;  %v2911_v51 = vmul.f32 %v5855_v4, %v5855_v4 }
 0xba2   : > { %v5859_v50 = vsub.f32 %v2866_v27, %v2898_v55  ;;  %v2918_v57 = vsel %vm670_vm3, %v2911_v51, 0.0 }
 0xba3   : > { %v2882_v15 = vpop.xlane.xlu1 %2881  ;;  %2919 = vadd.xlane.f32.xlu0 %v2918_v57 }
 0xba4   : > { %v2899_v58 = vmul.f32 0.03125, %v2882_v15  ;;  %v2912_v21 = vmul.f32 %v5859_v50, %v5859_v50 }
 0xba6   : > { %v5864_v30 = vsub.f32 %v2867_v1, %v2899_v58  ;;  %v2921_v59 = vsel %vm670_vm3, %v2912_v21, 0.0  ;;  %v4484_v1 = vpack.c.bf16 %v2996_v36, %v2995_v43  ;;  %v3162_v43 = vld [vmem:[%s4967_s28 + $0x10] sm:$0xff]  ;;  %v3163_v36 = vld [vmem:[%s4967_s28 + $0x18] sm:$0xff] }
 0xba7   : > { %v2885_v39 = vpop.xlane.xlu0 %2884  ;;  %2922 = vadd.xlane.f32.xlu0 %v2921_v59 }
 0xba8   : > { %v2900_v12 = vmul.f32 0.03125, %v2885_v39  ;;  %v2913_v48 = vmul.f32 %v5864_v30, %v5864_v30  ;;  %4485 = vmatpush3.bf16.msra.mxu1 %v4484_v1  ;;  %v4490_v1 = vpack.c.bf16 %v3163_v36, %v3162_v43 }
 0xbaa   : > { %v5869_v56 = vsub.f32 %v2868_v40, %v2900_v12  ;;  %v2924_v25 = vsel %vm670_vm3, %v2913_v48, 0.0  ;;  %4491 = vmatpush3.bf16.msra.mxu0 %v4490_v1 }
 0xbab   : > { %v2888_v22 = vpop.xlane.xlu0 %2887  ;;  %2925 = vadd.xlane.f32.xlu0 %v2924_v25  ;;  %4492 = vmatprep.subr.bf16.mxu0 %v4824_v10 }
 0xbac   : > { %v2901_v60 = vmul.f32 0.03125, %v2888_v22  ;;  %v2914_v53 = vmul.f32 %v5869_v56, %v5869_v56 }
 0xbae   : > { %v5874_v63 = vsub.f32 %v2869_v0, %v2901_v60  ;;  %v2927_v61 = vsel %vm670_vm3, %v2914_v53, 0.0 }
 0xbaf   : > { %v2891_v23 = vpop.xlane.xlu0 %2890  ;;  %2928 = vadd.xlane.f32.xlu0 %v2927_v61 }
 0xbb0   : > { %v2902_v2 = vmul.f32 0.03125, %v2891_v23  ;;  %v2915_v62 = vmul.f32 %v5874_v63, %v5874_v63 }
 0xbb2   : > { %v5879_v26 = vsub.f32 %v2870_v17, %v2902_v2  ;;  %v2930_v29 = vsel %vm670_vm3, %v2915_v62, 0.0  ;;  %v3715_v17 = vld [vmem:[%s6129_s29] ss:$0 sm:$0xff] }
 0xbb3   : > { %2931 = vadd.xlane.f32.xlu0 %v2930_v29 }
 0xbb4   : > { %v2916_v27 = vmul.f32 %v5879_v26, %v5879_v26 }
 0xbb6   : > { %v2933_v45 = vsel %vm670_vm3, %v2916_v27, 0.0 }
 0xbb7   : > { %2934 = vadd.xlane.f32.xlu1 %v2933_v45 }
 0xbd0   : > { %v2895_v33 = vpop.xlane.xlu0 %2894 }
 0xbd1   : > { %v2903_v31 = vmul.f32 0.03125, %v2895_v33  ;;  %v3164_v33 = vld [vmem:[%s4967_s28 + $0x20] sm:$0xff] }
 0xbd3   : > { %v5890_v6 = vsub.f32 %v2871_v49, %v2903_v31  ;;  %v3165_v31 = vld [vmem:[%s4967_s28 + $0x28] sm:$0xff] }
 0xbd5   : > { %v2917_v54 = vmul.f32 %v5890_v6, %v5890_v6 }
 0xbd7   : > { %v2936_v3 = vsel %vm2892_vm9, %v2917_v54, 0.0  ;;  %v3166_v54 = vld [vmem:[%s4967_s28 + $0x30] sm:$0xff] }
 0xbd8   : > { %2937 = vadd.xlane.f32.xlu0 %v2936_v3  ;;  %v3167_v3 = vld [vmem:[%s4967_s28 + $0x38] sm:$0xff] }
 0xc30   : > { %v2920_v34 = vpop.xlane.xlu0 %2919 }
 0xc31   : > { %v2939_v40 = vmul.f32 0.03125, %v2920_v34  ;;  %v4496_v34 = vpack.c.bf16 %v3167_v3, %v3166_v54 }
 0xc33   : > { %v2946_v42 = vadd.f32 1e-12, %v2939_v40  ;;  %v5968_v40 = vld [vmem:[%s610_s4] ss:$0 sm:$0xff] }
 0xc34   : > { %v2923_v28 = vpop.xlane.xlu0 %2922 }
 0xc35   : > { %4760 = vrsqrt.f32 %v2946_v42  ;;  %v2940_v41 = vmul.f32 0.03125, %v2923_v28 }
 0xc37   : > { %v2947_v37 = vadd.f32 1e-12, %v2940_v41 }
 0xc38   : > { %v2926_v35 = vpop.xlane.xlu0 %2925 }
 0xc39   : > { %4762 = vrsqrt.f32 %v2947_v37  ;;  %v2941_v7 = vmul.f32 0.03125, %v2926_v35 }
 0xc3b   : > { %v2948_v0 = vadd.f32 1e-12, %v2941_v7 }
 0xc3c   : > { %v2929_v11 = vpop.xlane.xlu0 %2928 }
 0xc3d   : > { %4764 = vrsqrt.f32 %v2948_v0  ;;  %v2942_v14 = vmul.f32 0.03125, %v2929_v11 }
 0xc3f   : > { %v4761_v5 = vpop.eup %4760  ;;  %v2949_v18 = vadd.f32 1e-12, %v2942_v14 }
 0xc40   : > { %v2960_v20 = vmul.f32 %v4761_v5, %v5855_v4  ;;  %v2932_v44 = vpop.xlane.xlu0 %2931 }
 0xc41   : > { %4766 = vrsqrt.f32 %v2949_v18  ;;  %v2943_v8 = vmul.f32 0.03125, %v2932_v44 }
 0xc42   : > { %v2973_v24 = vmul.f32 %v3715_v17, %v2960_v20 }
 0xc43   : > { %v4763_v49 = vpop.eup %4762  ;;  %v2950_v9 = vadd.f32 1e-12, %v2943_v8 }
 0xc44   : > { %v5906_v32 = vadd.f32 %v3716_v38, %v2973_v24  ;;  %v2935_v46 = vpop.xlane.xlu1 %2934  ;;  %v2961_v47 = vmul.f32 %v4763_v49, %v5859_v50 }
 0xc45   : > { %4768 = vrsqrt.f32 %v2950_v9  ;;  %v2944_v55 = vmul.f32 0.03125, %v2935_v46 }
 0xc46   : > { %4333 = vmatmul.mubr.msk.f32.vlgmr.msra.gmra.mrb[86].mxu1 %vm670_vm3, %v5906_v32  ;;  %v2974_v4 = vmul.f32 %v3715_v17, %v2961_v47 }
 0xc47   : > { %v4765_v51 = vpop.eup %4764  ;;  %v2951_v57 = vadd.f32 1e-12, %v2944_v55  ;;  %4335 = vmatprep.mubr.msk.f32.mxu1 %vm4825_vm2, %v4826_v13 }
 0xc48   : > { %v5913_v15 = vadd.f32 %v3716_v38, %v2974_v4  ;;  %v2962_v58 = vmul.f32 %v4765_v51, %v5864_v30 }
 0xc49   : > { %4770 = vrsqrt.f32 %v2951_v57 }
 0xc4a   : > { %4336 = vmatmul.mubr.msk.f32.gmra.mrb[88].mxu1 %vm670_vm3, %v5913_v15  ;;  %v2975_v50 = vmul.f32 %v3715_v17, %v2962_v58 }
 0xc4b   : > { %v4767_v21 = vpop.eup %4766  ;;  %4338 = vmatprep.mubr.msk.f32.mxu1 %vm4825_vm2, %v4826_v13 }
 0xc4c   : > { %v5920_v59 = vadd.f32 %v3716_v38, %v2975_v50  ;;  %v2963_v39 = vmul.f32 %v4767_v21, %v5869_v56 }
 0xc4e   : > { %4339 = vmatmul.mubr.msk.f32.gmra.mrb[90].mxu1 %vm670_vm3, %v5920_v59  ;;  %v2976_v12 = vmul.f32 %v3715_v17, %v2963_v39 }
 0xc4f   : > { %v4769_v48 = vpop.eup %4768  ;;  %4341 = vmatprep.mubr.msk.f32.mxu1 %vm4825_vm2, %v4826_v13 }
 0xc50   : > { %v5927_v30 = vadd.f32 %v3716_v38, %v2976_v12  ;;  %v2964_v25 = vmul.f32 %v4769_v48, %v5874_v63 }
 0xc52   : > { %4342 = vmatmul.mubr.msk.f32.gmra.mrb[92].mxu1 %vm670_vm3, %v5927_v30  ;;  %v2977_v22 = vmul.f32 %v3715_v17, %v2964_v25 }
 0xc53   : > { %v4771_v60 = vpop.eup %4770  ;;  %4344 = vmatprep.mubr.msk.f32.mxu1 %vm4825_vm2, %v4826_v13 }
 0xc54   : > { %v5934_v56 = vadd.f32 %v3716_v38, %v2977_v22  ;;  %v2965_v53 = vmul.f32 %v4771_v60, %v5879_v26 }
 0xc56   : > { %4345 = vmatmul.mubr.msk.f32.gmra.mrb[94].mxu1 %vm670_vm3, %v5934_v56  ;;  %v2978_v61 = vmul.f32 %v3715_v17, %v2965_v53 }
 0xc57   : > { %4347 = vmatprep.mubr.msk.f32.mxu1 %vm4825_vm2, %v4826_v13 }
 0xc58   : > { %v5941_v63 = vadd.f32 %v3716_v38, %v2978_v61 }
 0xc5a   : > { %4348 = vmatmul.mubr.msk.f32.gmra.mrb[96].mxu1 %vm670_vm3, %v5941_v63 }
 0xc5b   : > { %4350 = vmatprep.mubr.msk.f32.mxu1 %vm4825_vm2, %v4826_v13 }
 0xc65   : > { %v2938_v23 = vpop.xlane.xlu0 %2937 }
 0xc66   : > { %v2945_v2 = vmul.f32 0.03125, %v2938_v23 }
 0xc68   : > { %v2952_v62 = vadd.f32 1e-12, %v2945_v2 }
 0xc6a   : > { %4772 = vrsqrt.f32 %v2952_v62 }
 0xc74   : > { %v4773_v26 = vpop.eup %4772 }
 0xc75   : > { %v2966_v29 = vmul.f32 %v4773_v26, %v5890_v6  ;;  %v4493_v6 = vpack.c.bf16 %v3165_v31, %v3164_v33 }
 0xc77   : > { %v2979_v27 = vmul.f32 %v3715_v17, %v2966_v29  ;;  %4494 = vmatpush3.bf16.msra.mxu0 %v4493_v6 }
 0xc78   : > { %4495 = vmatprep.subr.bf16.mxu0 %v4824_v10 }
 0xc79   : > { %v5948_v45 = vadd.f32 %v3716_v38, %v2979_v27 }
 0xc7b   : > { %4351 = vmatmul.mubr.msk.f32.gmra.mrb[98].mxu1 %vm670_vm3, %v5948_v45  ;;  %4497 = vmatpush3.bf16.msra.mxu0 %v4496_v34 }
 0xd19   : > { %v3091_v42 = vpop.f32.mrb[86].mxu1 }
 0xd1a   : > { %v3092_v28 = vadd.f32 %v5968_v40, %v3091_v42  ;;  %v4334_v41 = vpop.f32.mrb[87].mxu1 }
 0xd1c   : > { %v3132_v37 = vmul.f32 0.70710677, %v3092_v28  ;;  %v3125_v24 = vmul.f32 0.5, %v3092_v28  ;;  %v3725_v28 = vld [vmem:[%s618_s17] ss:$0 sm:$0xff] }
 0xd1d   : > { %v3096_v35 = vpop.f32.mrb[88].mxu1 }
 0xd1e   : > { %4774 = verf.f32 %v3132_v37  ;;  %v3097_v7 = vadd.f32 %v5968_v40, %v3096_v35  ;;  %v4337_v10 = vpop.f32.mrb[89].mxu1 }
 0xd20   : > { %v3133_v0 = vmul.f32 0.70710677, %v3097_v7  ;;  %v3126_v57 = vmul.f32 0.5, %v3097_v7 }
 0xd21   : > { %v3101_v11 = vpop.f32.mrb[90].mxu1 }
 0xd22   : > { %4776 = verf.f32 %v3133_v0  ;;  %v3102_v14 = vadd.f32 %v5968_v40, %v3101_v11  ;;  %v4340_v5 = vpop.f32.mrb[91].mxu1 }
 0xd24   : > { %v3134_v17 = vmul.f32 0.70710677, %v3102_v14  ;;  %v3127_v22 = vmul.f32 0.5, %v3102_v14 }
 0xd25   : > { %v3106_v18 = vpop.f32.mrb[92].mxu1 }
 0xd26   : > { %4778 = verf.f32 %v3134_v17  ;;  %v3107_v20 = vadd.f32 %v5968_v40, %v3106_v18  ;;  %v4343_v44 = vpop.f32.mrb[93].mxu1 }
 0xd28   : > { %v4775_v38 = vpop.eup %4774  ;;  %v3135_v8 = vmul.f32 0.70710677, %v3107_v20  ;;  %v3128_v23 = vmul.f32 0.5, %v3107_v20 }
 0xd29   : > { %v3146_v49 = vadd.f32 1.0, %v4775_v38  ;;  %v3111_v9 = vpop.f32.mrb[94].mxu1 }
 0xd2a   : > { %4780 = verf.f32 %v3135_v8  ;;  %v3112_v46 = vadd.f32 %v5968_v40, %v3111_v9  ;;  %v4346_v47 = vpop.f32.mrb[95].mxu1 }
 0xd2b   : > { %v3153_v55 = vmul.f32 %v3146_v49, %v3125_v24 }
 0xd2c   : > { %v4777_v4 = vpop.eup %4776  ;;  %v3136_v51 = vmul.f32 0.70710677, %v3112_v46  ;;  %v3129_v29 = vmul.f32 0.5, %v3112_v46 }
 0xd2d   : > { %v3147_v58 = vadd.f32 1.0, %v4777_v4  ;;  %v3116_v50 = vpop.f32.mrb[96].mxu1  ;;  %4370 = vmatmul.mubr.msk.f32.vlgmr.msra.gmra.mrb[96].mxu0 %vm3175_vm10, %v3153_v55 }
 0xd2e   : > { %4782 = verf.f32 %v3136_v51  ;;  %v3117_v21 = vadd.f32 %v5968_v40, %v3116_v50  ;;  %v4349_v39 = vpop.f32.mrb[97].mxu1  ;;  %4372 = vmatprep.mubr.msk.f32.mxu0 %vm4825_vm2, %v4826_v13 }
 0xd2f   : > { %v3154_v12 = vmul.f32 %v3147_v58, %v3126_v57 }
 0xd30   : > { %v4779_v48 = vpop.eup %4778  ;;  %v3137_v25 = vmul.f32 0.70710677, %v3117_v21  ;;  %v3130_v16 = vmul.f32 0.5, %v3117_v21 }
 0xd31   : > { %v3148_v60 = vadd.f32 1.0, %v4779_v48  ;;  %4373 = vmatmul.mubr.msk.f32.gmra.mrb[98].mxu0 %vm3175_vm10, %v3154_v12 }
 0xd32   : > { %4784 = verf.f32 %v3137_v25  ;;  %4375 = vmatprep.mubr.msk.f32.mxu0 %vm4825_vm2, %v4826_v13 }
 0xd33   : > { %v3155_v53 = vmul.f32 %v3148_v60, %v3127_v22 }
 0xd34   : > { %v4781_v61 = vpop.eup %4780 }
 0xd35   : > { %v3149_v2 = vadd.f32 1.0, %v4781_v61  ;;  %4376 = vmatmul.mubr.msk.f32.gmra.mrb[100].mxu0 %vm3175_vm10, %v3155_v53 }
 0xd36   : > { %4378 = vmatprep.mubr.msk.f32.mxu0 %vm4825_vm2, %v4826_v13 }
 0xd37   : > { %v3156_v62 = vmul.f32 %v3149_v2, %v3128_v23 }
 0xd38   : > { %v4783_v26 = vpop.eup %4782 }
 0xd39   : > { %v3150_v27 = vadd.f32 1.0, %v4783_v26  ;;  %4379 = vmatmul.mubr.msk.f32.gmra.mrb[102].mxu0 %vm3175_vm10, %v3156_v62 }
 0xd3a   : > { %4381 = vmatprep.mubr.msk.f32.mxu0 %vm4825_vm2, %v4826_v13 }
 0xd3b   : > { %v3157_v52 = vmul.f32 %v3150_v27, %v3129_v29 }
 0xd3c   : > { %v4785_v19 = vpop.eup %4784 }
 0xd3d   : > { %v3151_v43 = vadd.f32 1.0, %v4785_v19  ;;  %4382 = vmatmul.mubr.msk.f32.gmra.mrb[104].mxu0 %vm3175_vm10, %v3157_v52 }
 0xd3e   : > { %4384 = vmatprep.mubr.msk.f32.mxu0 %vm4825_vm2, %v4826_v13 }
 0xd3f   : > { %v3158_v36 = vmul.f32 %v3151_v43, %v3130_v16 }
 0xd41   : > { %4385 = vmatmul.mubr.msk.f32.gmra.mrb[106].mxu0 %vm3175_vm10, %v3158_v36 }
 0xd42   : > { %4387 = vmatprep.mubr.msk.f32.mxu0 %vm4825_vm2, %v4826_v13 }
 0xd4e   : > { %v3121_v1 = vpop.f32.mrb[98].mxu1 }
 0xd4f   : > { %v3122_v33 = vadd.f32 %v5968_v40, %v3121_v1  ;;  %v4352_v31 = vpop.f32.mrb[99].mxu1 }
 0xd51   : > { %v3138_v6 = vmul.f32 0.70710677, %v3122_v33  ;;  %v3131_v3 = vmul.f32 0.5, %v3122_v33 }
 0xd53   : > { %4786 = verf.f32 %v3138_v6 }
 0xd5d   : > { %v4787_v54 = vpop.eup %4786 }
 0xd5e   : > { %v3152_v34 = vadd.f32 1.0, %v4787_v54 }
 0xd60   : > { %v3159_v42 = vmul.f32 %v3152_v34, %v3131_v3 }
 0xd62   : > { %4388 = vmatmul.mubr.msk.f32.gmra.mrb[108].mxu0 %vm3175_vm10, %v3159_v42 }
 0xe00   : > { %v3263_v41 = vpop.f32.mrb[96].mxu0 }
 0xe01   : > { %v3264_v37 = vadd.f32 %v3725_v28, %v3263_v41  ;;  %v4371_v13 = vpop.f32.mrb[97].mxu0 }
 0xe03   : > { %v3297_v35 = vadd.f32 %v3264_v37, %v5906_v32 }
 0xe04   : > { %v3268_v40 = vpop.f32.mrb[98].mxu0 }
 0xe05   : > { %v3269_v7 = vadd.f32 %v3725_v28, %v3268_v40  ;;  %v4374_v10 = vpop.f32.mrb[99].mxu0  ;;  %v3306_v0 = vsel %vm670_vm3, %v3297_v35, 0.0 }
 0xe06   : > { %3307 = vadd.xlane.f32.xlu1 %v3306_v0 }
 0xe07   : > { %v3298_v11 = vadd.f32 %v3269_v7, %v5913_v15 }
 0xe08   : > { %v3273_v14 = vpop.f32.mrb[100].mxu0 }
 0xe09   : > { %v3274_v5 = vadd.f32 %v3725_v28, %v3273_v14  ;;  %v4377_v17 = vpop.f32.mrb[101].mxu0  ;;  %v3309_v18 = vsel %vm670_vm3, %v3298_v11, 0.0 }
 0xe0a   : > { %3310 = vadd.xlane.f32.xlu0 %v3309_v18 }
 0xe0b   : > { %v3299_v20 = vadd.f32 %v3274_v5, %v5920_v59 }
 0xe0c   : > { %v3278_v44 = vpop.f32.mrb[102].mxu0 }
 0xe0d   : > { %v3279_v38 = vadd.f32 %v3725_v28, %v3278_v44  ;;  %v4380_v8 = vpop.f32.mrb[103].mxu0  ;;  %v3312_v32 = vsel %vm670_vm3, %v3299_v20, 0.0 }
 0xe0e   : > { %3313 = vadd.xlane.f32.xlu1 %v3312_v32 }
 0xe0f   : > { %v3300_v24 = vadd.f32 %v3279_v38, %v5927_v30 }
 0xe10   : > { %v3283_v49 = vpop.f32.mrb[104].mxu0 }
 0xe11   : > { %v3284_v9 = vadd.f32 %v3725_v28, %v3283_v49  ;;  %v4383_v46 = vpop.f32.mrb[105].mxu0  ;;  %v3315_v15 = vsel %vm670_vm3, %v3300_v24, 0.0 }
 0xe12   : > { %3316 = vadd.xlane.f32.xlu0 %v3315_v15  ;;  %v3734_v15 = vld [vmem:[%s624_s1] ss:$0 sm:$0xff] }
 0xe13   : > { %v3301_v47 = vadd.f32 %v3284_v9, %v5934_v56 }
 0xe14   : > { %v3288_v55 = vpop.f32.mrb[106].mxu0 }
 0xe15   : > { %v3289_v4 = vadd.f32 %v3725_v28, %v3288_v55  ;;  %v4386_v51 = vpop.f32.mrb[107].mxu0  ;;  %v3318_v59 = vsel %vm670_vm3, %v3301_v47, 0.0 }
 0xe16   : > { %3319 = vadd.xlane.f32.xlu1 %v3318_v59 }
 0xe17   : > { %v3302_v57 = vadd.f32 %v3289_v4, %v5941_v63 }
 0xe19   : > { %v3321_v58 = vsel %vm670_vm3, %v3302_v57, 0.0 }
 0xe1a   : > { %3322 = vadd.xlane.f32.xlu0 %v3321_v58 }
 0xe35   : > { %v3293_v30 = vpop.f32.mrb[108].mxu0 }
 0xe36   : > { %v3294_v50 = vadd.f32 %v3725_v28, %v3293_v30  ;;  %v4389_v21 = vpop.f32.mrb[109].mxu0 }
 0xe38   : > { %v3303_v39 = vadd.f32 %v3294_v50, %v5948_v45 }
 0xe3a   : > { %v3324_v12 = vsel %vm2892_vm9, %v3303_v39, 0.0 }
 0xe3b   : > { %3325 = vadd.xlane.f32.xlu1 %v3324_v12 }
 0xe93   : > { %v3308_v56 = vpop.xlane.xlu1 %3307 }
 0xe94   : > { %v3327_v48 = vmul.f32 0.03125, %v3308_v56 }
 0xe96   : > { %v3334_v25 = vsub.f32 %v3297_v35, %v3327_v48 }
 0xe97   : > { %v3311_v22 = vpop.xlane.xlu0 %3310 }
 0xe98   : > { %v3328_v60 = vmul.f32 0.03125, %v3311_v22  ;;  %v3341_v53 = vmul.f32 %v3334_v25, %v3334_v25 }
 0xe9a   : > { %v3335_v61 = vsub.f32 %v3298_v11, %v3328_v60  ;;  %v3348_v63 = vsel %vm670_vm3, %v3341_v53, 0.0 }
 0xe9b   : > { %v3314_v23 = vpop.xlane.xlu1 %3313  ;;  %3349 = vadd.xlane.f32.xlu0 %v3348_v63 }
 0xe9c   : > { %v3329_v2 = vmul.f32 0.03125, %v3314_v23  ;;  %v3342_v62 = vmul.f32 %v3335_v61, %v3335_v61 }
 0xe9e   : > { %v6016_v26 = vsub.f32 %v3299_v20, %v3329_v2  ;;  %v3351_v45 = vsel %vm670_vm3, %v3342_v62, 0.0 }
 0xe9f   : > { %v3317_v29 = vpop.xlane.xlu0 %3316  ;;  %3352 = vadd.xlane.f32.xlu1 %v3351_v45 }
 0xea0   : > { %v3330_v27 = vmul.f32 0.03125, %v3317_v29  ;;  %v3343_v52 = vmul.f32 %v6016_v26, %v6016_v26 }
 0xea2   : > { %v6021_v19 = vsub.f32 %v3300_v24, %v3330_v27  ;;  %v3354_v16 = vsel %vm670_vm3, %v3343_v52, 0.0  ;;  %v3733_v24 = vld [vmem:[%s621_s20] ss:$0 sm:$0xff]  ;;  %s6131_s20 = sld [smem:[#allocation8_spill]] (!%p3735_p5) }
 0xea3   : > { %v3320_v43 = vpop.xlane.xlu1 %3319  ;;  %3355 = vadd.xlane.f32.xlu0 %v3354_v16 }
 0xea4   : > { %v3331_v36 = vmul.f32 0.03125, %v3320_v43  ;;  %v3344_v1 = vmul.f32 %v6021_v19, %v6021_v19 }
 0xea6   : > { %v6026_v33 = vsub.f32 %v3301_v47, %v3331_v36  ;;  %v3357_v31 = vsel %vm670_vm3, %v3344_v1, 0.0 }
 0xea7   : > { %v3323_v6 = vpop.xlane.xlu0 %3322  ;;  %3358 = vadd.xlane.f32.xlu1 %v3357_v31 }
 0xea8   : > { %v3332_v54 = vmul.f32 0.03125, %v3323_v6  ;;  %v3345_v3 = vmul.f32 %v6026_v33, %v6026_v33 }
 0xeaa   : > { %v6031_v34 = vsub.f32 %v3302_v57, %v3332_v54  ;;  %v3360_v42 = vsel %vm670_vm3, %v3345_v3, 0.0 }
 0xeab   : > { %3361 = vadd.xlane.f32.xlu0 %v3360_v42 }
 0xeac   : > { %v3346_v28 = vmul.f32 %v6031_v34, %v6031_v34 }
 0xeae   : > { %v3363_v41 = vsel %vm670_vm3, %v3346_v28, 0.0 }
 0xeaf   : > { %3364 = vadd.xlane.f32.xlu1 %v3363_v41 }
 0xec8   : > { %v3326_v37 = vpop.xlane.xlu1 %3325 }
 0xec9   : > { %v3333_v13 = vmul.f32 0.03125, %v3326_v37 }
 0xecb   : > { %v6037_v35 = vsub.f32 %v3303_v39, %v3333_v13 }
 0xecd   : > { %v3347_v40 = vmul.f32 %v6037_v35, %v6037_v35 }
 0xecf   : > { %v3366_v7 = vsel %vm2892_vm9, %v3347_v40, 0.0 }
 0xed0   : > { %3367 = vadd.xlane.f32.xlu0 %v3366_v7 }
 0xf28   : > { %v3350_v10 = vpop.xlane.xlu0 %3349 }
 0xf29   : > { %v3369_v0 = vmul.f32 0.03125, %v3350_v10 }
 0xf2b   : > { %v3376_v11 = vadd.f32 1e-12, %v3369_v0 }
 0xf2c   : > { %v3353_v14 = vpop.xlane.xlu1 %3352 }
 0xf2d   : > { %4788 = vrsqrt.f32 %v3376_v11  ;;  %v3370_v5 = vmul.f32 0.03125, %v3353_v14 }
 0xf2f   : > { %v3377_v17 = vadd.f32 1e-12, %v3370_v5 }
 0xf30   : > { %v3356_v18 = vpop.xlane.xlu0 %3355 }
 0xf31   : > { %4790 = vrsqrt.f32 %v3377_v17  ;;  %v3371_v20 = vmul.f32 0.03125, %v3356_v18 }
 0xf33   : > { %v3378_v44 = vadd.f32 1e-12, %v3371_v20 }
 0xf34   : > { %v3359_v38 = vpop.xlane.xlu1 %3358 }
 0xf35   : > { %4792 = vrsqrt.f32 %v3378_v44  ;;  %v3372_v8 = vmul.f32 0.03125, %v3359_v38 }
 0xf37   : > { %v4789_v32 = vpop.eup %4788  ;;  %v3379_v49 = vadd.f32 1e-12, %v3372_v8 }
 0xf38   : > { %v3390_v9 = vmul.f32 %v4789_v32, %v3334_v25  ;;  %v3362_v46 = vpop.xlane.xlu0 %3361 }
 0xf39   : > { %4794 = vrsqrt.f32 %v3379_v49  ;;  %v3373_v47 = vmul.f32 0.03125, %v3362_v46 }
 0xf3a   : > { %v3403_v55 = vmul.f32 %v3733_v24, %v3390_v9 }
 0xf3b   : > { %v4791_v4 = vpop.eup %4790  ;;  %v3380_v51 = vadd.f32 1e-12, %v3373_v47 }
 0xf3c   : > { %v3416_v59 = vadd.f32 %v3734_v15, %v3403_v55  ;;  %v3391_v57 = vmul.f32 %v4791_v4, %v3335_v61  ;;  %v3365_v58 = vpop.xlane.xlu1 %3364 }
 0xf3d   : > { %4796 = vrsqrt.f32 %v3380_v51  ;;  %v3374_v30 = vmul.f32 0.03125, %v3365_v58 }
 0xf3e   : > { %3423 = vst.msk [vmem:[#allocation2] sm:$0xff] %vm670_vm3, %v3416_v59  ;;  %v3404_v50 = vmul.f32 %v3733_v24, %v3391_v57  ;;  %3434 = vst.msk [vmem:[%s6131_s20] sm:$0xff] (!%p3735_p5), %vm670_vm3, %v3416_v59 }
 0xf3f   : > { %v4793_v21 = vpop.eup %4792  ;;  %v3381_v39 = vadd.f32 1e-12, %v3374_v30 }
 0xf40   : > { %v3417_v12 = vadd.f32 %v3734_v15, %v3404_v50  ;;  %v3392_v56 = vmul.f32 %v4793_v21, %v6016_v26 }
 0xf41   : > { %4798 = vrsqrt.f32 %v3381_v39 }
 0xf42   : > { %3424 = vst.msk [vmem:[#allocation2 + $0x8] sm:$0xff] %vm670_vm3, %v3417_v12  ;;  %v3405_v48 = vmul.f32 %v3733_v24, %v3392_v56  ;;  %3435 = vst.msk [vmem:[%s6131_s20 + $0x8] sm:$0xff] (!%p3735_p5), %vm670_vm3, %v3417_v12 }
 0xf43   : > { %v4795_v25 = vpop.eup %4794 }
 0xf44   : > { %v3418_v22 = vadd.f32 %v3734_v15, %v3405_v48  ;;  %v3393_v60 = vmul.f32 %v4795_v25, %v6021_v19 }
 0xf46   : > { %3425 = vst.msk [vmem:[#allocation2 + $0x10] sm:$0xff] %vm670_vm3, %v3418_v22  ;;  %v3406_v53 = vmul.f32 %v3733_v24, %v3393_v60  ;;  %3436 = vst.msk [vmem:[%s6131_s20 + $0x10] sm:$0xff] (!%p3735_p5), %vm670_vm3, %v3418_v22 }
 0xf47   : > { %v4797_v61 = vpop.eup %4796 }
 0xf48   : > { %v3419_v63 = vadd.f32 %v3734_v15, %v3406_v53  ;;  %v3394_v23 = vmul.f32 %v4797_v61, %v6026_v33 }
 0xf4a   : > { %3426 = vst.msk [vmem:[#allocation2 + $0x18] sm:$0xff] %vm670_vm3, %v3419_v63  ;;  %v3407_v2 = vmul.f32 %v3733_v24, %v3394_v23  ;;  %3437 = vst.msk [vmem:[%s6131_s20 + $0x18] sm:$0xff] (!%p3735_p5), %vm670_vm3, %v3419_v63 }
 0xf4b   : > { %v4799_v62 = vpop.eup %4798 }
 0xf4c   : > { %v3420_v26 = vadd.f32 %v3734_v15, %v3407_v2  ;;  %v3395_v45 = vmul.f32 %v4799_v62, %v6031_v34 }
 0xf4e   : > { %3427 = vst.msk [vmem:[#allocation2 + $0x20] sm:$0xff] %vm670_vm3, %v3420_v26  ;;  %v3408_v29 = vmul.f32 %v3733_v24, %v3395_v45  ;;  %3438 = vst.msk [vmem:[%s6131_s20 + $0x20] sm:$0xff] (!%p3735_p5), %vm670_vm3, %v3420_v26 }
 0xf50   : > { %v3421_v27 = vadd.f32 %v3734_v15, %v3408_v29 }
 0xf52   : > { %3428 = vst.msk [vmem:[#allocation2 + $0x28] sm:$0xff] %vm670_vm3, %v3421_v27  ;;  %3439 = vst.msk [vmem:[%s6131_s20 + $0x28] sm:$0xff] (!%p3735_p5), %vm670_vm3, %v3421_v27 }
 0xf5d   : > { %v3368_v52 = vpop.xlane.xlu0 %3367 }
 0xf5e   : > { %v3375_v19 = vmul.f32 0.03125, %v3368_v52 }
 0xf60   : > { %v3382_v16 = vadd.f32 1e-12, %v3375_v19 }
 0xf62   : > { %4800 = vrsqrt.f32 %v3382_v16 }
 0xf6c   : > { %v4801_v43 = vpop.eup %4800 }
 0xf6d   : > { %v3396_v36 = vmul.f32 %v4801_v43, %v6037_v35  ;;  %3433 = sbr.rel (%p3735_p5) target bundleno = 3956 (0xf74), region = 84 }
 0xf6f   : > { %v3409_v1 = vmul.f32 %v3733_v24, %v3396_v36 }
 0xf71   : > { %v3422_v33 = vadd.f32 %v3734_v15, %v3409_v1 }
 0xf73   : > { %3429 = vst.msk [vmem:[#allocation2 + $0x30] sm:$0xf] %vm2892_vm9, %v3422_v33  ;;  %3440 = vst.msk [vmem:[%s6131_s20 + $0x30] sm:$0xf] (!%p3735_p5), %vm2892_vm9, %v3422_v33 }
 0xf74 PF: > { %s6132_s17 = sld [smem:[#allocation3_spill]] }
 0xf7a   : > { %s24_s29 = sadd.s32 1, %s6132_s17  }
 0xf7b   : > { %p21_p6 = scmp.ge.s32.totalorder %s24_s29, 4  }
 0xf7d   :  { %23 = sbr.rel (!%p21_p6) target bundleno = 5 (0x5), region = 143 }

</bundles_post_ra>
